<compile_context>
chip_gen: v7x
topology: tpu7x:2x2x1
jax: 0.10.0
libtpu: 0.0.40
codegen_flags: <defaults>
</compile_context>

<pallas_src>
import functools

import jax
import jax.numpy as jnp
from jax import lax
from jax.experimental import pallas as pl
from jax.experimental.pallas import tpu as pltpu

_BN_EPS = 1e-5
_MXU_DTYPE = jnp.bfloat16   # MXU operand dtype (set to jnp.float32 for exact f32 matmuls)


# ---------------------------------------------------------------------------
# Pallas kernels
# ---------------------------------------------------------------------------
def _shuffle_kernel(x_ref, w_ref, b_ref, y_ref, mom_ref):
    # x: (1, S, W, Cin)   w: (Cin, 4*Ch) bf16   b: (1, 4*Ch)
    # y: (1, S, W, 4*Ch) = relu(x @ w + b)
    # mom: (1, 1, 2, 4*Ch) = [sum, sum_sq] over the strip's pixels.
    S, W, Cin = x_ref.shape[1], x_ref.shape[2], x_ref.shape[3]
    C4 = y_ref.shape[3]
    x = x_ref[0].reshape(S * W, Cin).astype(_MXU_DTYPE)
    y = jnp.dot(x, w_ref[...], preferred_element_type=jnp.float32) + b_ref[...]
    y = jnp.maximum(y, 0.0)
    y_ref[0] = y.reshape(S, W, C4)
    mom_ref[0, 0, 0, :] = jnp.sum(y, axis=0)
    mom_ref[0, 0, 1, :] = jnp.sum(y * y, axis=0)


def _make_conv3x3_kernel(n_in, affine_flags):
    """3x3 conv (padding=1) over a row strip, summed over n_in channel groups.

    Per input t: mid (1,S,W,Ct), top (1,1,W,Ct), bot (1,1,W,Ct) halo rows.
    Inputs with affine_flags[t]=True get relu(x*scale+offset) fused in (previous layer's
    training-mode BatchNorm + ReLU); others pass through raw (e.g. the skip connection).
    Output: raw conv (no bias) + per-strip channel moments for the next BatchNorm.
    """
    def kernel(*refs):
        pos = 0
        mids, tops, bots = [], [], []
        for _ in range(n_in):
            mids.append(refs[pos]); tops.append(refs[pos + 1]); bots.append(refs[pos + 2])
            pos += 3
        scs, ofs = [], []
        for t in range(n_in):
            if affine_flags[t]:
                scs.append(refs[pos]); ofs.append(refs[pos + 1]); pos += 2
            else:
                scs.append(None); ofs.append(None)
        wrefs = [refs[pos + t] for t in range(n_in)]
        pos += n_in
        y_ref, mom_ref = refs[pos], refs[pos + 1]
        pos += 2
        xps = list(refs[pos:pos + n_in])

        S, W = mids[0].shape[1], mids[0].shape[2]
        W2 = W + 2
        L = S * W2
        Cout = y_ref.shape[3]

        sid = pl.program_id(1)
        has_top = sid > 0
        has_bot = sid < pl.num_programs(1) - 1

        # ---- build the zero-padded strip (top halo | S rows | bottom halo) per input ----
        for t in range(n_in):
            C = mids[t].shape[3]
            mid = mids[t][0]          # (S, W, C)  f32
            top = tops[t][0, 0]       # (W, C)
            bot = bots[t][0, 0]       # (W, C)
            if affine_flags[t]:
                sc = scs[t][0, :]
                of = ofs[t][0, :]
                mid = jnp.maximum(mid * sc + of, 0.0)
                top = jnp.maximum(top * sc + of, 0.0)
                bot = jnp.maximum(bot * sc + of, 0.0)
            top = jnp.where(has_top, top, 0.0)     # outside the image -> zero padding
            bot = jnp.where(has_bot, bot, 0.0)
            zrow = jnp.zeros((1, W, C), jnp.float32)
            core = jnp.concatenate([top[None], mid, bot[None], zrow], axis=0)  # (S+3, W, C)
            zcol = jnp.zeros((S + 3, 1, C), jnp.float32)
            full = jnp.concatenate([zcol, core, zcol], axis=1)                 # (S+3, W+2, C)
            # Full overwrite every step: no persistent state, no redundant zeroing pass.
            xps[t][...] = full.reshape((S + 3) * W2, C)

        # ---- 3x3 conv as 9 accumulated MXU matmuls on contiguous sublane slices ----------
        acc = jnp.zeros((L, Cout), jnp.float32)
        for di in range(3):
            for dj in range(3):
                off = di * W2 + dj
                for t in range(n_in):
                    patch = xps[t][off:off + L, :].astype(_MXU_DTYPE)
                    acc = acc + jnp.dot(patch, wrefs[t][di, dj],
                                        preferred_element_type=jnp.float32)

        yv = acc.reshape(S, W2, Cout)[:, :W, :]    # crop the 2 junk columns once
        y_ref[0] = yv
        mom_ref[0, 0, 0, :] = jnp.sum(yv, axis=(0, 1))
        mom_ref[0, 0, 1, :] = jnp.sum(yv * yv, axis=(0, 1))

    return kernel


# ---------------------------------------------------------------------------
# pallas_call wrappers
# ---------------------------------------------------------------------------
def _pick_strip(h, row_bytes, max_rows=None, budget_bytes=8 << 20):
    """Largest divisor of h whose strip stays within the per-buffer VMEM budget."""
    cap = h if max_rows is None else max(1, min(h, max_rows))
    best = 1
    for s in range(1, cap + 1):
        if h % s == 0 and s * row_bytes <= budget_bytes:
            best = s
    return best


def _vmem_limit(est_bytes):
    return int(min(64 << 20, max(32 << 20, 2 * est_bytes)))


def shuffle_matmul(x, w, b, strip):
    # x: (N, H, W, Cin), w: (Cin, 4*Ch) bf16, b: (4*Ch,)
    N, H, W, Cin = x.shape
    C4 = w.shape[1]
    S = strip
    assert H % S == 0
    ns = H // S
    est = 2 * (S * W * Cin * 4 + S * W * C4 * 4 + 2 * C4 * 4) \
        + 2 * int(w.size) * w.dtype.itemsize + 2 * C4 * 4
    return pl.pallas_call(
        _shuffle_kernel,
        out_shape=(jax.ShapeDtypeStruct((N, H, W, C4), jnp.float32),
                   jax.ShapeDtypeStruct((N, ns, 2, C4), jnp.float32)),
        grid=(N, ns),
        in_specs=[pl.BlockSpec((1, S, W, Cin), lambda n, s: (n, s, 0, 0)),
                  pl.BlockSpec((Cin, C4), lambda n, s: (0, 0)),
                  pl.BlockSpec((1, C4), lambda n, s: (0, 0))],
        out_specs=(pl.BlockSpec((1, S, W, C4), lambda n, s: (n, s, 0, 0)),
                   pl.BlockSpec((1, 1, 2, C4), lambda n, s: (n, s, 0, 0))),
        compiler_params=pltpu.CompilerParams(
            dimension_semantics=("parallel", "parallel"),
            vmem_limit_bytes=_vmem_limit(est)),
    )(x, w, b.reshape(1, C4))


def conv3x3_bnrelu(inputs, weights, affine, strip):
    # inputs: list of (N, H, W, C_t) raw activations; weights: list of (3,3,C_t,Cout) bf16;
    # affine[t]: (scale, offset) of the previous layer's BN to fuse (with ReLU), or None.
    N, H, W, _ = inputs[0].shape
    Cout = weights[0].shape[-1]
    n_in = len(inputs)
    S = strip
    assert H % S == 0
    ns = H // S
    affine_flags = tuple(a is not None for a in affine)
    kernel = _make_conv3x3_kernel(n_in, affine_flags)

    in_specs, args = [], []
    for x in inputs:
        C = x.shape[3]
        in_specs.append(pl.BlockSpec((1, S, W, C), lambda n, s: (n, s, 0, 0)))
        # 1-row halos: clamped at the image border; the kernel zeroes them when outside.
        in_specs.append(pl.BlockSpec(
            (1, 1, W, C), lambda n, s: (n, jnp.maximum(s * S - 1, 0), 0, 0)))
        in_specs.append(pl.BlockSpec(
            (1, 1, W, C), lambda n, s: (n, jnp.minimum(s * S + S, H - 1), 0, 0)))
        args += [x, x, x]
    for t, a in enumerate(affine):
        if a is not None:
            sc, of = a
            C = inputs[t].shape[3]
            in_specs.append(pl.BlockSpec((1, C), lambda n, s: (0, 0)))
            in_specs.append(pl.BlockSpec((1, C), lambda n, s: (0, 0)))
            args += [sc.reshape(1, C).astype(jnp.float32),
                     of.reshape(1, C).astype(jnp.float32)]
    for w in weights:
        in_specs.append(pl.BlockSpec(w.shape, lambda n, s: (0, 0, 0, 0)))
        args.append(w)

    scratch = [pltpu.VMEM(((S + 3) * (W + 2), x.shape[3]), jnp.float32) for x in inputs]

    est = 0
    for x in inputs:
        C = x.shape[3]
        est += 2 * (S * W * C + 2 * W * C) * 4          # strip + halo blocks (double buffer)
        est += (S + 3) * (W + 2) * C * 4                # padded scratch
    est += 2 * (S * W * Cout + 2 * Cout) * 4            # outputs
    est += 2 * sum(int(w.size) * w.dtype.itemsize for w in weights)

    return pl.pallas_call(
        kernel,
        out_shape=(jax.ShapeDtypeStruct((N, H, W, Cout), jnp.float32),
                   jax.ShapeDtypeStruct((N, ns, 2, Cout), jnp.float32)),
        grid=(N, ns),
        in_specs=in_specs,
        out_specs=(pl.BlockSpec((1, S, W, Cout), lambda n, s: (n, s, 0, 0)),
                   pl.BlockSpec((1, 1, 2, Cout), lambda n, s: (n, s, 0, 0))),
        scratch_shapes=scratch,
        compiler_params=pltpu.CompilerParams(
            dimension_semantics=("parallel", "parallel"),
            vmem_limit_bytes=_vmem_limit(est)),
    )(*args)


# ---------------------------------------------------------------------------
# BatchNorm statistics from in-kernel moments (training-mode / biased variance)
# ---------------------------------------------------------------------------
def _stats_from_moments(mom, count):
    tot = jnp.sum(mom, axis=(0, 1))                 # (2, C)
    mean = tot[0] / count
    var = jnp.maximum(tot[1] / count - mean * mean, 0.0)
    return mean, var


def _scale_offset(mean, var, gamma, beta, eps=_BN_EPS):
    scale = gamma / jnp.sqrt(var + eps)
    offset = beta - mean * scale
    return scale, offset


# ---------------------------------------------------------------------------
# UnetBlock forward (Pallas path)
# ---------------------------------------------------------------------------
def unet_block_pallas(up_in_nchw, skip_in_nchw, p, max_strip_rows=None):
    up = jnp.transpose(up_in_nchw, (0, 2, 3, 1)).astype(jnp.float32)     # NHWC
    skip = jnp.transpose(skip_in_nchw, (0, 2, 3, 1)).astype(jnp.float32)  # NHWC
    N, H, W, Cin = up.shape
    Ch = Cin // 2
    C4 = 4 * Ch
    Ho, Wo = 2 * H, 2 * W
    cnt = N * Ho * Wo

    # --- PixelShuffle_ICNR: 1x1 conv as strip-tiled MXU matmul (+ ReLU, moments) ----
    s_shuf = _pick_strip(H, row_bytes=W * (Cin + C4) * 4, max_rows=max_strip_rows)
    y, mom0 = shuffle_matmul(up, p["w_shuf"].astype(_MXU_DTYPE), p["b_shuf"], s_shuf)
    # Pixel-shuffle permutation (pure data movement, left to XLA).
    # TODO(synk): fold this into the shuffle kernel to remove the HBM round trip.
    up_raw = (y.reshape(N, H, W, Ch, 2, 2)
               .transpose(0, 1, 4, 2, 5, 3)
               .reshape(N, Ho, Wo, Ch))
    # BN stats of the shuffled activation: fold the 4 sub-positions of each channel.
    tot0 = jnp.sum(mom0, axis=(0, 1))                 # (2, 4*Ch)
    sum0 = tot0[0].reshape(Ch, 4).sum(axis=1)
    ssq0 = tot0[1].reshape(Ch, 4).sum(axis=1)
    mean0 = sum0 / cnt
    var0 = jnp.maximum(ssq0 / cnt - mean0 * mean0, 0.0)
    sc0, of0 = _scale_offset(mean0, var0, p["gamma_bn"], p["beta_bn"])

    # --- optional resize of the skip connection -------------------------------------
    if skip.shape[1:3] != (Ho, Wo):
        # TODO(synk): jax.image.resize antialiases on downsampling, unlike
        # F.interpolate(antialias=False); only the upsampling path matches exactly.
        skip = jax.image.resize(
            skip, (skip.shape[0], Ho, Wo, skip.shape[3]), method="bilinear")
    Cs = skip.shape[3]
    Cout = p["w1"].shape[-1]

    s_conv = _pick_strip(Ho, row_bytes=(Wo + 2) * (Ch + Cs + 2 * Cout) * 4,
                         max_rows=max_strip_rows)

    # --- conv1: split-K over [up_raw | skip] (no HBM concat); BN0+ReLU fused into the
    #     up half; conv bias dropped (cancelled by the training-mode BN that follows) ----
    wa = p["w1"][:, :, :Ch, :].astype(_MXU_DTYPE)
    wb = p["w1"][:, :, Ch:, :].astype(_MXU_DTYPE)
    z1, mom1 = conv3x3_bnrelu([up_raw, skip], [wa, wb], [(sc0, of0), None], s_conv)
    mean1, var1 = _stats_from_moments(mom1, cnt)
    sc1, of1 = _scale_offset(mean1, var1, p["gamma1"], p["beta1"])

    # --- conv2: BN1+ReLU fused into the input ----------------------------------------
    z2, mom2 = conv3x3_bnrelu([z1], [p["w2"].astype(_MXU_DTYPE)], [(sc1, of1)], s_conv)
    mean2, var2 = _stats_from_moments(mom2, cnt)
    sc2, of2 = _scale_offset(mean2, var2, p["gamma2"], p["beta2"])

    # --- final BN2 + ReLU in plain JAX: fused by XLA with the NHWC->NCHW transpose ----
    out = jnp.maximum(z2 * sc2 + of2, 0.0)
    return jnp.transpose(out, (0, 3, 1, 2))


# ---------------------------------------------------------------------------
# Pure-JAX reference (for correctness check)
# ---------------------------------------------------------------------------
def unet_block_ref(up_in_nchw, skip_in_nchw, p, eps=_BN_EPS):
    dn = ("NHWC", "HWIO", "NHWC")
    hi = lax.Precision.HIGHEST

    def bn_relu(x, g, b):
        m = jnp.mean(x, axis=(0, 1, 2))
        v = jnp.mean((x - m) ** 2, axis=(0, 1, 2))
        return jnp.maximum((x - m) / jnp.sqrt(v + eps) * g + b, 0.0)

    up = jnp.transpose(up_in_nchw, (0, 2, 3, 1)).astype(jnp.float32)
    skip = jnp.transpose(skip_in_nchw, (0, 2, 3, 1)).astype(jnp.float32)
    N, H, W, Cin = up.shape
    Ch = Cin // 2

    y = lax.conv_general_dilated(up, p["w_shuf"].reshape(1, 1, Cin, 4 * Ch),
                                 (1, 1), "VALID", dimension_numbers=dn,
                                 precision=hi) + p["b_shuf"]
    y = (y.reshape(N, H, W, Ch, 2, 2).transpose(0, 1, 4, 2, 5, 3)
          .reshape(N, 2 * H, 2 * W, Ch))
    y = jnp.maximum(y, 0.0)
    y = bn_relu(y, p["gamma_bn"], p["beta_bn"])

    if skip.shape[1:3] != y.shape[1:3]:
        skip = jax.image.resize(skip, (skip.shape[0], y.shape[1], y.shape[2],
                                       skip.shape[3]), method="bilinear")
    x = jnp.concatenate([y, skip], axis=-1)

    x = lax.conv_general_dilated(x, p["w1"], (1, 1), ((1, 1), (1, 1)),
                                 dimension_numbers=dn, precision=hi) + p["b1"]
    x = bn_relu(x, p["gamma1"], p["beta1"])
    x = lax.conv_general_dilated(x, p["w2"], (1, 1), ((1, 1), (1, 1)),
                                 dimension_numbers=dn, precision=hi) + p["b2"]
    x = bn_relu(x, p["gamma2"], p["beta2"])
    return jnp.transpose(x, (0, 3, 1, 2))


# ---------------------------------------------------------------------------
# Deterministic synthetic parameters (shapes from UnetBlock.__init__)
# ---------------------------------------------------------------------------
def init_params(key, c_up, c_skip, c_out):
    ch = c_up // 2
    ks = jax.random.split(key, 12)
    f32 = jnp.float32
    cin1 = ch + c_skip
    return {
        # PixelShuffle_ICNR conv: 1x1, c_up -> 4*ch  (stored as (Cin, Cout) for matmul)
        "w_shuf": (jax.random.normal(ks[0], (c_up, 4 * ch), f32)
                   * (2.0 / c_up) ** 0.5),
        "b_shuf": jax.random.normal(ks[1], (4 * ch,), f32) * 0.01,
        "gamma_bn": 1.0 + 0.1 * jax.random.normal(ks[2], (ch,), f32),
        "beta_bn": 0.1 * jax.random.normal(ks[3], (ch,), f32),
        # conv1: 3x3, (ch + c_skip) -> c_out   (HWIO)
        "w1": (jax.random.normal(ks[4], (3, 3, cin1, c_out), f32)
               * (2.0 / (9 * cin1)) ** 0.5),
        "b1": jax.random.normal(ks[5], (c_out,), f32) * 0.01,
        "gamma1": 1.0 + 0.1 * jax.random.normal(ks[6], (c_out,), f32),
        "beta1": 0.1 * jax.random.normal(ks[7], (c_out,), f32),
        # conv2: 3x3, c_out -> c_out   (HWIO)
        "w2": (jax.random.normal(ks[8], (3, 3, c_out, c_out), f32)
               * (2.0 / (9 * c_out)) ** 0.5),
        "b2": jax.random.normal(ks[9], (c_out,), f32) * 0.01,
        "gamma2": 1.0 + 0.1 * jax.random.normal(ks[10], (c_out,), f32),
        "beta2": 0.1 * jax.random.normal(ks[11], (c_out,), f32),
    }


if __name__ == "__main__":
    up_in_channels, skip_in_channels, out_channels = 16, 12, 16
    key = jax.random.PRNGKey(0)
    kp, k1, k2 = jax.random.split(key, 3)
    params = init_params(kp, up_in_channels, skip_in_channels, out_channels)

    # PyTorch-convention NCHW inputs (spatial of skip = 2x spatial of up_in).
    up_in = jax.random.normal(k1, (2, up_in_channels, 8, 8), jnp.float32)
    skip_in = jax.random.normal(k2, (2, skip_in_channels, 16, 16), jnp.float32)

    # Small strips at toy size so every halo path (top/bottom border + interior) runs.
    fwd = jax.jit(functools.partial(unet_block_pallas, max_strip_rows=4))
    out = jax.block_until_ready(fwd(up_in, skip_in, params))

    ref = jax.block_until_ready(unet_block_ref(up_in, skip_in, params))
    assert out.shape == (2, out_channels, 16, 16), out.shape
    max_err = float(jnp.max(jnp.abs(out - ref)))
    mean_err = float(jnp.mean(jnp.abs(out - ref)))
    # Tolerances sized for bf16 MXU operands (per perf review); f32-accumulated.
    assert max_err < 5e-2 and mean_err < 1e-2, (max_err, mean_err)

    print("KERNEL_OK")
</pallas_src>

<mosaic_0001>
module attributes {stable_mosaic.version = 11 : i64} {
  func.func @_shuffle_kernel(%arg0: i32, %arg1: i32, %arg2: memref<1x4x8x16xf32, #tpu.memory_space<vmem>>, %arg3: memref<16x32xbf16, #tpu.memory_space<vmem>>, %arg4: memref<1x32xf32, #tpu.memory_space<vmem>>, %arg5: memref<1x4x8x32xf32, #tpu.memory_space<vmem>>, %arg6: memref<1x1x2x32xf32, #tpu.memory_space<vmem>>) attributes {dimension_semantics = [#tpu.dimension_semantics<parallel>, #tpu.dimension_semantics<parallel>], iteration_bounds = array<i64: 2, 2>, scalar_prefetch = 0 : i64, scratch_operands = 0 : i64, tpu.core_type = #tpu.core_type<tc>, window_params = [{transform_indices = @transform_0, window_bounds = array<i64: 1, 4, 8, 16>}, {pipeline_mode = #tpu.pipeline_mode<synchronous>, transform_indices = @transform_1, window_bounds = array<i64: 16, 32>}, {pipeline_mode = #tpu.pipeline_mode<synchronous>, transform_indices = @transform_2, window_bounds = array<i64: 1, 32>}, {transform_indices = @transform_3, window_bounds = array<i64: 1, 4, 8, 32>}, {transform_indices = @transform_4, window_bounds = array<i64: 1, 1, 2, 32>}]} {
    %c0 = arith.constant 0 : index
    %c0_0 = arith.constant 0 : index
    %c0_1 = arith.constant 0 : index
    %c0_2 = arith.constant 0 : index
    %0 = vector.load %arg2[%c0, %c0_0, %c0_1, %c0_2] : memref<1x4x8x16xf32, #tpu.memory_space<vmem>>, vector<1x4x8x16xf32>
    %1 = vector.shape_cast %0 : vector<1x4x8x16xf32> to vector<4x8x16xf32>
    %2 = vector.shape_cast %1 : vector<4x8x16xf32> to vector<32x16xf32>
    %3 = arith.truncf %2 : vector<32x16xf32> to vector<32x16xbf16>
    %c0_3 = arith.constant 0 : index
    %c0_4 = arith.constant 0 : index
    %4 = vector.load %arg3[%c0_3, %c0_4] : memref<16x32xbf16, #tpu.memory_space<vmem>>, vector<16x32xbf16>
    %cst = arith.constant dense<0.000000e+00> : vector<32x32xf32>
    %5 = tpu.matmul %3, %4, %cst {dimension_numbers = #tpu.dot_dimension_numbers<[1], [0], [0], [1], [0, 0, 1, 1], [], []>} : vector<32x16xbf16>, vector<16x32xbf16>, vector<32x32xf32> -> vector<32x32xf32>
    %c0_5 = arith.constant 0 : index
    %c0_6 = arith.constant 0 : index
    %6 = vector.load %arg4[%c0_5, %c0_6] : memref<1x32xf32, #tpu.memory_space<vmem>>, vector<1x32xf32>
    %7 = vector.broadcast %6 : vector<1x32xf32> to vector<32x32xf32>
    %8 = arith.addf %5, %7 : vector<32x32xf32>
    %cst_7 = arith.constant 0.000000e+00 : f32
    %9 = vector.broadcast %cst_7 : f32 to vector<32x32xf32>
    %10 = arith.maximumf %8, %9 : vector<32x32xf32>
    %11 = vector.shape_cast %10 : vector<32x32xf32> to vector<4x8x32xf32>
    %c0_8 = arith.constant 0 : index
    %c0_9 = arith.constant 0 : index
    %c0_10 = arith.constant 0 : index
    %c0_11 = arith.constant 0 : index
    %12 = vector.load %arg5[%c0_8, %c0_9, %c0_10, %c0_11] : memref<1x4x8x32xf32, #tpu.memory_space<vmem>>, vector<1x4x8x32xf32>
    %13 = vector.shape_cast %12 : vector<1x4x8x32xf32> to vector<4x8x32xf32>
    %14 = vector.shape_cast %11 : vector<4x8x32xf32> to vector<1x4x8x32xf32>
    tpu.vector_store %arg5[%c0_8, %c0_9, %c0_10, %c0_11], %14 {strides = array<i32>} : memref<1x4x8x32xf32, #tpu.memory_space<vmem>>, vector<1x4x8x32xf32>,
    %cst_12 = arith.constant dense<0.000000e+00> : vector<32xf32>
    %15 = vector.multi_reduction <add>, %10, %cst_12 [0] : vector<32x32xf32> to vector<32xf32>
    %c0_13 = arith.constant 0 : index
    %c0_14 = arith.constant 0 : index
    %c0_15 = arith.constant 0 : index
    %c0_16 = arith.constant 0 : index
    %16 = vector.load %arg6[%c0_13, %c0_14, %c0_15, %c0_16] : memref<1x1x2x32xf32, #tpu.memory_space<vmem>>, vector<1x1x1x32xf32>
    %17 = vector.shape_cast %16 : vector<1x1x1x32xf32> to vector<32xf32>
    %18 = vector.shape_cast %15 : vector<32xf32> to vector<1x1x1x32xf32>
    tpu.vector_store %arg6[%c0_13, %c0_14, %c0_15, %c0_16], %18 {strides = array<i32>} : memref<1x1x2x32xf32, #tpu.memory_space<vmem>>, vector<1x1x1x32xf32>,
    %19 = arith.mulf %10, %10 : vector<32x32xf32>
    %cst_17 = arith.constant dense<0.000000e+00> : vector<32xf32>
    %20 = vector.multi_reduction <add>, %19, %cst_17 [0] : vector<32x32xf32> to vector<32xf32>
    %c0_18 = arith.constant 0 : index
    %c0_19 = arith.constant 0 : index
    %c1 = arith.constant 1 : index
    %c0_20 = arith.constant 0 : index
    %21 = vector.load %arg6[%c0_18, %c0_19, %c1, %c0_20] : memref<1x1x2x32xf32, #tpu.memory_space<vmem>>, vector<1x1x1x32xf32>
    %22 = vector.shape_cast %21 : vector<1x1x1x32xf32> to vector<32xf32>
    %23 = vector.shape_cast %20 : vector<32xf32> to vector<1x1x1x32xf32>
    tpu.vector_store %arg6[%c0_18, %c0_19, %c1, %c0_20], %23 {strides = array<i32>} : memref<1x1x2x32xf32, #tpu.memory_space<vmem>>, vector<1x1x1x32xf32>,
    return
  }
  func.func @transform_0(%arg0: i32, %arg1: i32) -> (i32, i32, i32, i32) {
    %c0_i32 = arith.constant 0 : i32
    %c0_i32_0 = arith.constant 0 : i32
    %c0_i32_1 = arith.constant 0 : i32
    return %arg0, %arg1, %c0_i32, %c0_i32_0 : i32, i32, i32, i32
  }
  func.func @transform_1(%arg0: i32, %arg1: i32) -> (i32, i32) {
    %c0_i32 = arith.constant 0 : i32
    %c0_i32_0 = arith.constant 0 : i32
    %c0_i32_1 = arith.constant 0 : i32
    return %c0_i32, %c0_i32_0 : i32, i32
  }
  func.func @transform_2(%arg0: i32, %arg1: i32) -> (i32, i32) {
    %c0_i32 = arith.constant 0 : i32
    %c0_i32_0 = arith.constant 0 : i32
    %c0_i32_1 = arith.constant 0 : i32
    return %c0_i32, %c0_i32_0 : i32, i32
  }
  func.func @transform_3(%arg0: i32, %arg1: i32) -> (i32, i32, i32, i32) {
    %c0_i32 = arith.constant 0 : i32
    %c0_i32_0 = arith.constant 0 : i32
    %c0_i32_1 = arith.constant 0 : i32
    return %arg0, %arg1, %c0_i32, %c0_i32_0 : i32, i32, i32, i32
  }
  func.func @transform_4(%arg0: i32, %arg1: i32) -> (i32, i32, i32, i32) {
    %c0_i32 = arith.constant 0 : i32
    %c0_i32_0 = arith.constant 0 : i32
    %c0_i32_1 = arith.constant 0 : i32
    return %arg0, %arg1, %c0_i32, %c0_i32_0 : i32, i32, i32, i32
  }
}

module attributes {stable_mosaic.version = 11 : i64} {
  func.func @kernel(%arg0: i32, %arg1: i32, %arg2: memref<1x4x16x8xf32, #tpu.memory_space<vmem>>, %arg3: memref<1x1x16x8xf32, #tpu.memory_space<vmem>>, %arg4: memref<1x1x16x8xf32, #tpu.memory_space<vmem>>, %arg5: memref<1x4x16x12xf32, #tpu.memory_space<vmem>>, %arg6: memref<1x1x16x12xf32, #tpu.memory_space<vmem>>, %arg7: memref<1x1x16x12xf32, #tpu.memory_space<vmem>>, %arg8: memref<1x8xf32, #tpu.memory_space<vmem>>, %arg9: memref<1x8xf32, #tpu.memory_space<vmem>>, %arg10: memref<3x3x8x16xbf16, #tpu.memory_space<vmem>>, %arg11: memref<3x3x12x16xbf16, #tpu.memory_space<vmem>>, %arg12: memref<1x4x16x16xf32, #tpu.memory_space<vmem>>, %arg13: memref<1x1x2x16xf32, #tpu.memory_space<vmem>>, %arg14: memref<126x8xf32, #tpu.memory_space<vmem>>, %arg15: memref<126x12xf32, #tpu.memory_space<vmem>>) attributes {dimension_semantics = [#tpu.dimension_semantics<parallel>, #tpu.dimension_semantics<parallel>], iteration_bounds = array<i64: 2, 4>, scalar_prefetch = 0 : i64, scratch_operands = 2 : i64, tpu.core_type = #tpu.core_type<tc>, window_params = [{transform_indices = @transform_0, window_bounds = array<i64: 1, 4, 16, 8>}, {transform_indices = @transform_1, window_bounds = array<i64: 1, 1, 16, 8>}, {transform_indices = @transform_2, window_bounds = array<i64: 1, 1, 16, 8>}, {transform_indices = @transform_3, window_bounds = array<i64: 1, 4, 16, 12>}, {transform_indices = @transform_4, window_bounds = array<i64: 1, 1, 16, 12>}, {transform_indices = @transform_5, window_bounds = array<i64: 1, 1, 16, 12>}, {pipeline_mode = #tpu.pipeline_mode<synchronous>, transform_indices = @transform_6, window_bounds = array<i64: 1, 8>}, {pipeline_mode = #tpu.pipeline_mode<synchronous>, transform_indices = @transform_7, window_bounds = array<i64: 1, 8>}, {pipeline_mode = #tpu.pipeline_mode<synchronous>, transform_indices = @transform_8, window_bounds = array<i64: 3, 3, 8, 16>}, {pipeline_mode = #tpu.pipeline_mode<synchronous>, transform_indices = @transform_9, window_bounds = array<i64: 3, 3, 12, 16>}, {transform_indices = @transform_10, window_bounds = array<i64: 1, 4, 16, 16>}, {transform_indices = @transform_11, window_bounds = array<i64: 1, 1, 2, 16>}]} {
    %c0_i32 = arith.constant 0 : i32
    %0 = arith.cmpi sgt, %arg1, %c0_i32 : i32
    %c3_i32 = arith.constant 3 : i32
    %1 = arith.cmpi slt, %arg1, %c3_i32 : i32
    %c0 = arith.constant 0 : index
    %c0_0 = arith.constant 0 : index
    %c0_1 = arith.constant 0 : index
    %c0_2 = arith.constant 0 : index
    %2 = vector.load %arg2[%c0, %c0_0, %c0_1, %c0_2] : memref<1x4x16x8xf32, #tpu.memory_space<vmem>>, vector<1x4x16x8xf32>
    %3 = vector.shape_cast %2 : vector<1x4x16x8xf32> to vector<4x16x8xf32>
    %c0_3 = arith.constant 0 : index
    %c0_4 = arith.constant 0 : index
    %c0_5 = arith.constant 0 : index
    %c0_6 = arith.constant 0 : index
    %4 = vector.load %arg3[%c0_3, %c0_4, %c0_5, %c0_6] : memref<1x1x16x8xf32, #tpu.memory_space<vmem>>, vector<1x1x16x8xf32>
    %5 = vector.shape_cast %4 : vector<1x1x16x8xf32> to vector<16x8xf32>
    %c0_7 = arith.constant 0 : index
    %c0_8 = arith.constant 0 : index
    %c0_9 = arith.constant 0 : index
    %c0_10 = arith.constant 0 : index
    %6 = vector.load %arg4[%c0_7, %c0_8, %c0_9, %c0_10] : memref<1x1x16x8xf32, #tpu.memory_space<vmem>>, vector<1x1x16x8xf32>
    %7 = vector.shape_cast %6 : vector<1x1x16x8xf32> to vector<16x8xf32>
    %c0_11 = arith.constant 0 : index
    %c0_12 = arith.constant 0 : index
    %8 = vector.load %arg8[%c0_11, %c0_12] : memref<1x8xf32, #tpu.memory_space<vmem>>, vector<1x8xf32>
    %9 = vector.shape_cast %8 : vector<1x8xf32> to vector<8xf32>
    %c0_13 = arith.constant 0 : index
    %c0_14 = arith.constant 0 : index
    %10 = vector.load %arg9[%c0_13, %c0_14] : memref<1x8xf32, #tpu.memory_space<vmem>>, vector<1x8xf32>
    %11 = vector.shape_cast %10 : vector<1x8xf32> to vector<8xf32>
    %12 = vector.shape_cast %9 : vector<8xf32> to vector<1x1x8xf32>
    %13 = vector.broadcast %12 : vector<1x1x8xf32> to vector<4x16x8xf32>
    %14 = arith.mulf %3, %13 : vector<4x16x8xf32>
    %15 = vector.shape_cast %11 : vector<8xf32> to vector<1x1x8xf32>
    %16 = vector.broadcast %15 : vector<1x1x8xf32> to vector<4x16x8xf32>
    %17 = arith.addf %14, %16 : vector<4x16x8xf32>
    %cst = arith.constant 0.000000e+00 : f32
    %18 = vector.broadcast %cst : f32 to vector<4x16x8xf32>
    %19 = arith.maximumf %17, %18 : vector<4x16x8xf32>
    %20 = vector.shape_cast %9 : vector<8xf32> to vector<1x8xf32>
    %21 = vector.broadcast %20 : vector<1x8xf32> to vector<16x8xf32>
    %22 = arith.mulf %5, %21 : vector<16x8xf32>
    %23 = vector.shape_cast %11 : vector<8xf32> to vector<1x8xf32>
    %24 = vector.broadcast %23 : vector<1x8xf32> to vector<16x8xf32>
    %25 = arith.addf %22, %24 : vector<16x8xf32>
    %cst_15 = arith.constant 0.000000e+00 : f32
    %26 = vector.broadcast %cst_15 : f32 to vector<16x8xf32>
    %27 = arith.maximumf %25, %26 : vector<16x8xf32>
    %28 = vector.shape_cast %9 : vector<8xf32> to vector<1x8xf32>
    %29 = vector.broadcast %28 : vector<1x8xf32> to vector<16x8xf32>
    %30 = arith.mulf %7, %29 : vector<16x8xf32>
    %31 = vector.shape_cast %11 : vector<8xf32> to vector<1x8xf32>
    %32 = vector.broadcast %31 : vector<1x8xf32> to vector<16x8xf32>
    %33 = arith.addf %30, %32 : vector<16x8xf32>
    %cst_16 = arith.constant 0.000000e+00 : f32
    %34 = vector.broadcast %cst_16 : f32 to vector<16x8xf32>
    %35 = arith.maximumf %33, %34 : vector<16x8xf32>
    %cst_17 = arith.constant 0.000000e+00 : f32
    %36 = vector.broadcast %cst_17 : f32 to vector<16x8xf32>
    %37 = arith.select %0, %27, %36 : vector<16x8xf32>
    %cst_18 = arith.constant 0.000000e+00 : f32
    %38 = vector.broadcast %cst_18 : f32 to vector<16x8xf32>
    %39 = arith.select %1, %35, %38 : vector<16x8xf32>
    %cst_19 = arith.constant 0.000000e+00 : f32
    %40 = vector.broadcast %cst_19 : f32 to vector<1x16x8xf32>
    %41 = vector.shape_cast %37 : vector<16x8xf32> to vector<1x16x8xf32>
    %42 = vector.shape_cast %39 : vector<16x8xf32> to vector<1x16x8xf32>
    %43 = tpu.concatenate %41, %19, %42, %40 in 0 : vector<1x16x8xf32>, vector<4x16x8xf32>, vector<1x16x8xf32>, vector<1x16x8xf32> -> vector<7x16x8xf32>
    %cst_20 = arith.constant 0.000000e+00 : f32
    %44 = vector.broadcast %cst_20 : f32 to vector<7x1x8xf32>
    %45 = tpu.concatenate %44, %43, %44 in 1 : vector<7x1x8xf32>, vector<7x16x8xf32>, vector<7x1x8xf32> -> vector<7x18x8xf32>
    %46 = vector.shape_cast %45 : vector<7x18x8xf32> to vector<126x8xf32>
    %c0_21 = arith.constant 0 : index
    %c0_22 = arith.constant 0 : index
    %47 = vector.load %arg14[%c0_21, %c0_22] : memref<126x8xf32, #tpu.memory_space<vmem>>, vector<126x8xf32>
    tpu.vector_store %arg14[%c0_21, %c0_22], %46 {strides = array<i32>} : memref<126x8xf32, #tpu.memory_space<vmem>>, vector<126x8xf32>,
    %c0_23 = arith.constant 0 : index
    %c0_24 = arith.constant 0 : index
    %c0_25 = arith.constant 0 : index
    %c0_26 = arith.constant 0 : index
    %48 = vector.load %arg5[%c0_23, %c0_24, %c0_25, %c0_26] : memref<1x4x16x12xf32, #tpu.memory_space<vmem>>, vector<1x4x16x12xf32>
    %49 = vector.shape_cast %48 : vector<1x4x16x12xf32> to vector<4x16x12xf32>
    %c0_27 = arith.constant 0 : index
    %c0_28 = arith.constant 0 : index
    %c0_29 = arith.constant 0 : index
    %c0_30 = arith.constant 0 : index
    %50 = vector.load %arg6[%c0_27, %c0_28, %c0_29, %c0_30] : memref<1x1x16x12xf32, #tpu.memory_space<vmem>>, vector<1x1x16x12xf32>
    %51 = vector.shape_cast %50 : vector<1x1x16x12xf32> to vector<16x12xf32>
    %c0_31 = arith.constant 0 : index
    %c0_32 = arith.constant 0 : index
    %c0_33 = arith.constant 0 : index
    %c0_34 = arith.constant 0 : index
    %52 = vector.load %arg7[%c0_31, %c0_32, %c0_33, %c0_34] : memref<1x1x16x12xf32, #tpu.memory_space<vmem>>, vector<1x1x16x12xf32>
    %53 = vector.shape_cast %52 : vector<1x1x16x12xf32> to vector<16x12xf32>
    %cst_35 = arith.constant 0.000000e+00 : f32
    %54 = vector.broadcast %cst_35 : f32 to vector<16x12xf32>
    %55 = arith.select %0, %51, %54 : vector<16x12xf32>
    %cst_36 = arith.constant 0.000000e+00 : f32
    %56 = vector.broadcast %cst_36 : f32 to vector<16x12xf32>
    %57 = arith.select %1, %53, %56 : vector<16x12xf32>
    %cst_37 = arith.constant 0.000000e+00 : f32
    %58 = vector.broadcast %cst_37 : f32 to vector<1x16x12xf32>
    %59 = vector.shape_cast %55 : vector<16x12xf32> to vector<1x16x12xf32>
    %60 = vector.shape_cast %57 : vector<16x12xf32> to vector<1x16x12xf32>
    %61 = tpu.concatenate %59, %49, %60, %58 in 0 : vector<1x16x12xf32>, vector<4x16x12xf32>, vector<1x16x12xf32>, vector<1x16x12xf32> -> vector<7x16x12xf32>
    %cst_38 = arith.constant 0.000000e+00 : f32
    %62 = vector.broadcast %cst_38 : f32 to vector<7x1x12xf32>
    %63 = tpu.concatenate %62, %61, %62 in 1 : vector<7x1x12xf32>, vector<7x16x12xf32>, vector<7x1x12xf32> -> vector<7x18x12xf32>
    %64 = vector.shape_cast %63 : vector<7x18x12xf32> to vector<126x12xf32>
    %c0_39 = arith.constant 0 : index
    %c0_40 = arith.constant 0 : index
    %65 = vector.load %arg15[%c0_39, %c0_40] : memref<126x12xf32, #tpu.memory_space<vmem>>, vector<126x12xf32>
    tpu.vector_store %arg15[%c0_39, %c0_40], %64 {strides = array<i32>} : memref<126x12xf32, #tpu.memory_space<vmem>>, vector<126x12xf32>,
    %cst_41 = arith.constant 0.000000e+00 : f32
    %66 = vector.broadcast %cst_41 : f32 to vector<72x16xf32>
    %c0_42 = arith.constant 0 : index
    %c0_43 = arith.constant 0 : index
    %67 = vector.load %arg14[%c0_42, %c0_43] : memref<126x8xf32, #tpu.memory_space<vmem>>, vector<72x8xf32>
    %68 = arith.truncf %67 : vector<72x8xf32> to vector<72x8xbf16>
    %c0_44 = arith.constant 0 : index
    %c0_45 = arith.constant 0 : index
    %c0_46 = arith.constant 0 : index
    %c0_47 = arith.constant 0 : index
    %69 = vector.load %arg10[%c0_44, %c0_45, %c0_46, %c0_47] : memref<3x3x8x16xbf16, #tpu.memory_space<vmem>>, vector<1x1x8x16xbf16>
    %70 = vector.shape_cast %69 : vector<1x1x8x16xbf16> to vector<8x16xbf16>
    %cst_48 = arith.constant dense<0.000000e+00> : vector<72x16xf32>
    %71 = tpu.matmul %68, %70, %cst_48 {dimension_numbers = #tpu.dot_dimension_numbers<[1], [0], [0], [1], [0, 0, 1, 1], [], []>} : vector<72x8xbf16>, vector<8x16xbf16>, vector<72x16xf32> -> vector<72x16xf32>
    %72 = arith.addf %66, %71 : vector<72x16xf32>
    %c0_49 = arith.constant 0 : index
    %c0_50 = arith.constant 0 : index
    %73 = vector.load %arg15[%c0_49, %c0_50] : memref<126x12xf32, #tpu.memory_space<vmem>>, vector<72x12xf32>
    %74 = arith.truncf %73 : vector<72x12xf32> to vector<72x12xbf16>
    %c0_51 = arith.constant 0 : index
    %c0_52 = arith.constant 0 : index
    %c0_53 = arith.constant 0 : index
    %c0_54 = arith.constant 0 : index
    %75 = vector.load %arg11[%c0_51, %c0_52, %c0_53, %c0_54] : memref<3x3x12x16xbf16, #tpu.memory_space<vmem>>, vector<1x1x12x16xbf16>
    %76 = vector.shape_cast %75 : vector<1x1x12x16xbf16> to vector<12x16xbf16>
    %cst_55 = arith.constant dense<0.000000e+00> : vector<72x16xf32>
    %77 = tpu.matmul %74, %76, %cst_55 {dimension_numbers = #tpu.dot_dimension_numbers<[1], [0], [0], [1], [0, 0, 1, 1], [], []>} : vector<72x12xbf16>, vector<12x16xbf16>, vector<72x16xf32> -> vector<72x16xf32>
    %78 = arith.addf %72, %77 : vector<72x16xf32>
    %c1 = arith.constant 1 : index
    %c0_56 = arith.constant 0 : index
    %79 = vector.load %arg14[%c1, %c0_56] : memref<126x8xf32, #tpu.memory_space<vmem>>, vector<72x8xf32>
    %80 = arith.truncf %79 : vector<72x8xf32> to vector<72x8xbf16>
    %c0_57 = arith.constant 0 : index
    %c1_58 = arith.constant 1 : index
    %c0_59 = arith.constant 0 : index
    %c0_60 = arith.constant 0 : index
    %81 = vector.load %arg10[%c0_57, %c1_58, %c0_59, %c0_60] : memref<3x3x8x16xbf16, #tpu.memory_space<vmem>>, vector<1x1x8x16xbf16>
    %82 = vector.shape_cast %81 : vector<1x1x8x16xbf16> to vector<8x16xbf16>
    %cst_61 = arith.constant dense<0.000000e+00> : vector<72x16xf32>
    %83 = tpu.matmul %80, %82, %cst_61 {dimension_numbers = #tpu.dot_dimension_numbers<[1], [0], [0], [1], [0, 0, 1, 1], [], []>} : vector<72x8xbf16>, vector<8x16xbf16>, vector<72x16xf32> -> vector<72x16xf32>
    %84 = arith.addf %78, %83 : vector<72x16xf32>
    %c1_62 = arith.constant 1 : index
    %c0_63 = arith.constant 0 : index
    %85 = vector.load %arg15[%c1_62, %c0_63] : memref<126x12xf32, #tpu.memory_space<vmem>>, vector<72x12xf32>
    %86 = arith.truncf %85 : vector<72x12xf32> to vector<72x12xbf16>
    %c0_64 = arith.constant 0 : index
    %c1_65 = arith.constant 1 : index
    %c0_66 = arith.constant 0 : index
    %c0_67 = arith.constant 0 : index
    %87 = vector.load %arg11[%c0_64, %c1_65, %c0_66, %c0_67] : memref<3x3x12x16xbf16, #tpu.memory_space<vmem>>, vector<1x1x12x16xbf16>
    %88 = vector.shape_cast %87 : vector<1x1x12x16xbf16> to vector<12x16xbf16>
    %cst_68 = arith.constant dense<0.000000e+00> : vector<72x16xf32>
    %89 = tpu.matmul %86, %88, %cst_68 {dimension_numbers = #tpu.dot_dimension_numbers<[1], [0], [0], [1], [0, 0, 1, 1], [], []>} : vector<72x12xbf16>, vector<12x16xbf16>, vector<72x16xf32> -> vector<72x16xf32>
    %90 = arith.addf %84, %89 : vector<72x16xf32>
    %c2 = arith.constant 2 : index
    %c0_69 = arith.constant 0 : index
    %91 = vector.load %arg14[%c2, %c0_69] : memref<126x8xf32, #tpu.memory_space<vmem>>, vector<72x8xf32>
    %92 = arith.truncf %91 : vector<72x8xf32> to vector<72x8xbf16>
    %c0_70 = arith.constant 0 : index
    %c2_71 = arith.constant 2 : index
    %c0_72 = arith.constant 0 : index
    %c0_73 = arith.constant 0 : index
    %93 = vector.load %arg10[%c0_70, %c2_71, %c0_72, %c0_73] : memref<3x3x8x16xbf16, #tpu.memory_space<vmem>>, vector<1x1x8x16xbf16>
    %94 = vector.shape_cast %93 : vector<1x1x8x16xbf16> to vector<8x16xbf16>
    %cst_74 = arith.constant dense<0.000000e+00> : vector<72x16xf32>
    %95 = tpu.matmul %92, %94, %cst_74 {dimension_numbers = #tpu.dot_dimension_numbers<[1], [0], [0], [1], [0, 0, 1, 1], [], []>} : vector<72x8xbf16>, vector<8x16xbf16>, vector<72x16xf32> -> vector<72x16xf32>
    %96 = arith.addf %90, %95 : vector<72x16xf32>
    %c2_75 = arith.constant 2 : index
    %c0_76 = arith.constant 0 : index
    %97 = vector.load %arg15[%c2_75, %c0_76] : memref<126x12xf32, #tpu.memory_space<vmem>>, vector<72x12xf32>
    %98 = arith.truncf %97 : vector<72x12xf32> to vector<72x12xbf16>
    %c0_77 = arith.constant 0 : index
    %c2_78 = arith.constant 2 : index
    %c0_79 = arith.constant 0 : index
    %c0_80 = arith.constant 0 : index
    %99 = vector.load %arg11[%c0_77, %c2_78, %c0_79, %c0_80] : memref<3x3x12x16xbf16, #tpu.memory_space<vmem>>, vector<1x1x12x16xbf16>
    %100 = vector.shape_cast %99 : vector<1x1x12x16xbf16> to vector<12x16xbf16>
    %cst_81 = arith.constant dense<0.000000e+00> : vector<72x16xf32>
    %101 = tpu.matmul %98, %100, %cst_81 {dimension_numbers = #tpu.dot_dimension_numbers<[1], [0], [0], [1], [0, 0, 1, 1], [], []>} : vector<72x12xbf16>, vector<12x16xbf16>, vector<72x16xf32> -> vector<72x16xf32>
    %102 = arith.addf %96, %101 : vector<72x16xf32>
    %c18 = arith.constant 18 : index
    %c0_82 = arith.constant 0 : index
    %103 = vector.load %arg14[%c18, %c0_82] : memref<126x8xf32, #tpu.memory_space<vmem>>, vector<72x8xf32>
    %104 = arith.truncf %103 : vector<72x8xf32> to vector<72x8xbf16>
    %c1_83 = arith.constant 1 : index
    %c0_84 = arith.constant 0 : index
    %c0_85 = arith.constant 0 : index
    %c0_86 = arith.constant 0 : index
    %105 = vector.load %arg10[%c1_83, %c0_84, %c0_85, %c0_86] : memref<3x3x8x16xbf16, #tpu.memory_space<vmem>>, vector<1x1x8x16xbf16>
    %106 = vector.shape_cast %105 : vector<1x1x8x16xbf16> to vector<8x16xbf16>
    %cst_87 = arith.constant dense<0.000000e+00> : vector<72x16xf32>
    %107 = tpu.matmul %104, %106, %cst_87 {dimension_numbers = #tpu.dot_dimension_numbers<[1], [0], [0], [1], [0, 0, 1, 1], [], []>} : vector<72x8xbf16>, vector<8x16xbf16>, vector<72x16xf32> -> vector<72x16xf32>
    %108 = arith.addf %102, %107 : vector<72x16xf32>
    %c18_88 = arith.constant 18 : index
    %c0_89 = arith.constant 0 : index
    %109 = vector.load %arg15[%c18_88, %c0_89] : memref<126x12xf32, #tpu.memory_space<vmem>>, vector<72x12xf32>
    %110 = arith.truncf %109 : vector<72x12xf32> to vector<72x12xbf16>
    %c1_90 = arith.constant 1 : index
    %c0_91 = arith.constant 0 : index
    %c0_92 = arith.constant 0 : index
    %c0_93 = arith.constant 0 : index
    %111 = vector.load %arg11[%c1_90, %c0_91, %c0_92, %c0_93] : memref<3x3x12x16xbf16, #tpu.memory_space<vmem>>, vector<1x1x12x16xbf16>
    %112 = vector.shape_cast %111 : vector<1x1x12x16xbf16> to vector<12x16xbf16>
    %cst_94 = arith.constant dense<0.000000e+00> : vector<72x16xf32>
    %113 = tpu.matmul %110, %112, %cst_94 {dimension_numbers = #tpu.dot_dimension_numbers<[1], [0], [0], [1], [0, 0, 1, 1], [], []>} : vector<72x12xbf16>, vector<12x16xbf16>, vector<72x16xf32> -> vector<72x16xf32>
    %114 = arith.addf %108, %113 : vector<72x16xf32>
    %c19 = arith.constant 19 : index
    %c0_95 = arith.constant 0 : index
    %115 = vector.load %arg14[%c19, %c0_95] : memref<126x8xf32, #tpu.memory_space<vmem>>, vector<72x8xf32>
    %116 = arith.truncf %115 : vector<72x8xf32> to vector<72x8xbf16>
    %c1_96 = arith.constant 1 : index
    %c1_97 = arith.constant 1 : index
    %c0_98 = arith.constant 0 : index
    %c0_99 = arith.constant 0 : index
    %117 = vector.load %arg10[%c1_96, %c1_97, %c0_98, %c0_99] : memref<3x3x8x16xbf16, #tpu.memory_space<vmem>>, vector<1x1x8x16xbf16>
    %118 = vector.shape_cast %117 : vector<1x1x8x16xbf16> to vector<8x16xbf16>
    %cst_100 = arith.constant dense<0.000000e+00> : vector<72x16xf32>
    %119 = tpu.matmul %116, %118, %cst_100 {dimension_numbers = #tpu.dot_dimension_numbers<[1], [0], [0], [1], [0, 0, 1, 1], [], []>} : vector<72x8xbf16>, vector<8x16xbf16>, vector<72x16xf32> -> vector<72x16xf32>
    %120 = arith.addf %114, %119 : vector<72x16xf32>
    %c19_101 = arith.constant 19 : index
    %c0_102 = arith.constant 0 : index
    %121 = vector.load %arg15[%c19_101, %c0_102] : memref<126x12xf32, #tpu.memory_space<vmem>>, vector<72x12xf32>
    %122 = arith.truncf %121 : vector<72x12xf32> to vector<72x12xbf16>
    %c1_103 = arith.constant 1 : index
    %c1_104 = arith.constant 1 : index
    %c0_105 = arith.constant 0 : index
    %c0_106 = arith.constant 0 : index
    %123 = vector.load %arg11[%c1_103, %c1_104, %c0_105, %c0_106] : memref<3x3x12x16xbf16, #tpu.memory_space<vmem>>, vector<1x1x12x16xbf16>
    %124 = vector.shape_cast %123 : vector<1x1x12x16xbf16> to vector<12x16xbf16>
    %cst_107 = arith.constant dense<0.000000e+00> : vector<72x16xf32>
    %125 = tpu.matmul %122, %124, %cst_107 {dimension_numbers = #tpu.dot_dimension_numbers<[1], [0], [0], [1], [0, 0, 1, 1], [], []>} : vector<72x12xbf16>, vector<12x16xbf16>, vector<72x16xf32> -> vector<72x16xf32>
    %126 = arith.addf %120, %125 : vector<72x16xf32>
    %c20 = arith.constant 20 : index
    %c0_108 = arith.constant 0 : index
    %127 = vector.load %arg14[%c20, %c0_108] : memref<126x8xf32, #tpu.memory_space<vmem>>, vector<72x8xf32>
    %128 = arith.truncf %127 : vector<72x8xf32> to vector<72x8xbf16>
    %c1_109 = arith.constant 1 : index
    %c2_110 = arith.constant 2 : index
    %c0_111 = arith.constant 0 : index
    %c0_112 = arith.constant 0 : index
    %129 = vector.load %arg10[%c1_109, %c2_110, %c0_111, %c0_112] : memref<3x3x8x16xbf16, #tpu.memory_space<vmem>>, vector<1x1x8x16xbf16>
    %130 = vector.shape_cast %129 : vector<1x1x8x16xbf16> to vector<8x16xbf16>
    %cst_113 = arith.constant dense<0.000000e+00> : vector<72x16xf32>
    %131 = tpu.matmul %128, %130, %cst_113 {dimension_numbers = #tpu.dot_dimension_numbers<[1], [0], [0], [1], [0, 0, 1, 1], [], []>} : vector<72x8xbf16>, vector<8x16xbf16>, vector<72x16xf32> -> vector<72x16xf32>
    %132 = arith.addf %126, %131 : vector<72x16xf32>
    %c20_114 = arith.constant 20 : index
    %c0_115 = arith.constant 0 : index
    %133 = vector.load %arg15[%c20_114, %c0_115] : memref<126x12xf32, #tpu.memory_space<vmem>>, vector<72x12xf32>
    %134 = arith.truncf %133 : vector<72x12xf32> to vector<72x12xbf16>
    %c1_116 = arith.constant 1 : index
    %c2_117 = arith.constant 2 : index
    %c0_118 = arith.constant 0 : index
    %c0_119 = arith.constant 0 : index
    %135 = vector.load %arg11[%c1_116, %c2_117, %c0_118, %c0_119] : memref<3x3x12x16xbf16, #tpu.memory_space<vmem>>, vector<1x1x12x16xbf16>
    %136 = vector.shape_cast %135 : vector<1x1x12x16xbf16> to vector<12x16xbf16>
    %cst_120 = arith.constant dense<0.000000e+00> : vector<72x16xf32>
    %137 = tpu.matmul %134, %136, %cst_120 {dimension_numbers = #tpu.dot_dimension_numbers<[1], [0], [0], [1], [0, 0, 1, 1], [], []>} : vector<72x12xbf16>, vector<12x16xbf16>, vector<72x16xf32> -> vector<72x16xf32>
    %138 = arith.addf %132, %137 : vector<72x16xf32>
    %c36 = arith.constant 36 : index
    %c0_121 = arith.constant 0 : index
    %139 = vector.load %arg14[%c36, %c0_121] : memref<126x8xf32, #tpu.memory_space<vmem>>, vector<72x8xf32>
    %140 = arith.truncf %139 : vector<72x8xf32> to vector<72x8xbf16>
    %c2_122 = arith.constant 2 : index
    %c0_123 = arith.constant 0 : index
    %c0_124 = arith.constant 0 : index
    %c0_125 = arith.constant 0 : index
    %141 = vector.load %arg10[%c2_122, %c0_123, %c0_124, %c0_125] : memref<3x3x8x16xbf16, #tpu.memory_space<vmem>>, vector<1x1x8x16xbf16>
    %142 = vector.shape_cast %141 : vector<1x1x8x16xbf16> to vector<8x16xbf16>
    %cst_126 = arith.constant dense<0.000000e+00> : vector<72x16xf32>
    %143 = tpu.matmul %140, %142, %cst_126 {dimension_numbers = #tpu.dot_dimension_numbers<[1], [0], [0], [1], [0, 0, 1, 1], [], []>} : vector<72x8xbf16>, vector<8x16xbf16>, vector<72x16xf32> -> vector<72x16xf32>
    %144 = arith.addf %138, %143 : vector<72x16xf32>
    %c36_127 = arith.constant 36 : index
    %c0_128 = arith.constant 0 : index
    %145 = vector.load %arg15[%c36_127, %c0_128] : memref<126x12xf32, #tpu.memory_space<vmem>>, vector<72x12xf32>
    %146 = arith.truncf %145 : vector<72x12xf32> to vector<72x12xbf16>
    %c2_129 = arith.constant 2 : index
    %c0_130 = arith.constant 0 : index
    %c0_131 = arith.constant 0 : index
    %c0_132 = arith.constant 0 : index
    %147 = vector.load %arg11[%c2_129, %c0_130, %c0_131, %c0_132] : memref<3x3x12x16xbf16, #tpu.memory_space<vmem>>, vector<1x1x12x16xbf16>
    %148 = vector.shape_cast %147 : vector<1x1x12x16xbf16> to vector<12x16xbf16>
    %cst_133 = arith.constant dense<0.000000e+00> : vector<72x16xf32>
    %149 = tpu.matmul %146, %148, %cst_133 {dimension_numbers = #tpu.dot_dimension_numbers<[1], [0], [0], [1], [0, 0, 1, 1], [], []>} : vector<72x12xbf16>, vector<12x16xbf16>, vector<72x16xf32> -> vector<72x16xf32>
    %150 = arith.addf %144, %149 : vector<72x16xf32>
    %c37 = arith.constant 37 : index
    %c0_134 = arith.constant 0 : index
    %151 = vector.load %arg14[%c37, %c0_134] : memref<126x8xf32, #tpu.memory_space<vmem>>, vector<72x8xf32>
    %152 = arith.truncf %151 : vector<72x8xf32> to vector<72x8xbf16>
    %c2_135 = arith.constant 2 : index
    %c1_136 = arith.constant 1 : index
    %c0_137 = arith.constant 0 : index
    %c0_138 = arith.constant 0 : index
    %153 = vector.load %arg10[%c2_135, %c1_136, %c0_137, %c0_138] : memref<3x3x8x16xbf16, #tpu.memory_space<vmem>>, vector<1x1x8x16xbf16>
    %154 = vector.shape_cast %153 : vector<1x1x8x16xbf16> to vector<8x16xbf16>
    %cst_139 = arith.constant dense<0.000000e+00> : vector<72x16xf32>
    %155 = tpu.matmul %152, %154, %cst_139 {dimension_numbers = #tpu.dot_dimension_numbers<[1], [0], [0], [1], [0, 0, 1, 1], [], []>} : vector<72x8xbf16>, vector<8x16xbf16>, vector<72x16xf32> -> vector<72x16xf32>
    %156 = arith.addf %150, %155 : vector<72x16xf32>
    %c37_140 = arith.constant 37 : index
    %c0_141 = arith.constant 0 : index
    %157 = vector.load %arg15[%c37_140, %c0_141] : memref<126x12xf32, #tpu.memory_space<vmem>>, vector<72x12xf32>
    %158 = arith.truncf %157 : vector<72x12xf32> to vector<72x12xbf16>
    %c2_142 = arith.constant 2 : index
    %c1_143 = arith.constant 1 : index
    %c0_144 = arith.constant 0 : index
    %c0_145 = arith.constant 0 : index
    %159 = vector.load %arg11[%c2_142, %c1_143, %c0_144, %c0_145] : memref<3x3x12x16xbf16, #tpu.memory_space<vmem>>, vector<1x1x12x16xbf16>
    %160 = vector.shape_cast %159 : vector<1x1x12x16xbf16> to vector<12x16xbf16>
    %cst_146 = arith.constant dense<0.000000e+00> : vector<72x16xf32>
    %161 = tpu.matmul %158, %160, %cst_146 {dimension_numbers = #tpu.dot_dimension_numbers<[1], [0], [0], [1], [0, 0, 1, 1], [], []>} : vector<72x12xbf16>, vector<12x16xbf16>, vector<72x16xf32> -> vector<72x16xf32>
    %162 = arith.addf %156, %161 : vector<72x16xf32>
    %c38 = arith.constant 38 : index
    %c0_147 = arith.constant 0 : index
    %163 = vector.load %arg14[%c38, %c0_147] : memref<126x8xf32, #tpu.memory_space<vmem>>, vector<72x8xf32>
    %164 = arith.truncf %163 : vector<72x8xf32> to vector<72x8xbf16>
    %c2_148 = arith.constant 2 : index
    %c2_149 = arith.constant 2 : index
    %c0_150 = arith.constant 0 : index
    %c0_151 = arith.constant 0 : index
    %165 = vector.load %arg10[%c2_148, %c2_149, %c0_150, %c0_151] : memref<3x3x8x16xbf16, #tpu.memory_space<vmem>>, vector<1x1x8x16xbf16>
    %166 = vector.shape_cast %165 : vector<1x1x8x16xbf16> to vector<8x16xbf16>
    %cst_152 = arith.constant dense<0.000000e+00> : vector<72x16xf32>
    %167 = tpu.matmul %164, %166, %cst_152 {dimension_numbers = #tpu.dot_dimension_numbers<[1], [0], [0], [1], [0, 0, 1, 1], [], []>} : vector<72x8xbf16>, vector<8x16xbf16>, vector<72x16xf32> -> vector<72x16xf32>
    %168 = arith.addf %162, %167 : vector<72x16xf32>
    %c38_153 = arith.constant 38 : index
    %c0_154 = arith.constant 0 : index
    %169 = vector.load %arg15[%c38_153, %c0_154] : memref<126x12xf32, #tpu.memory_space<vmem>>, vector<72x12xf32>
    %170 = arith.truncf %169 : vector<72x12xf32> to vector<72x12xbf16>
    %c2_155 = arith.constant 2 : index
    %c2_156 = arith.constant 2 : index
    %c0_157 = arith.constant 0 : index
    %c0_158 = arith.constant 0 : index
    %171 = vector.load %arg11[%c2_155, %c2_156, %c0_157, %c0_158] : memref<3x3x12x16xbf16, #tpu.memory_space<vmem>>, vector<1x1x12x16xbf16>
    %172 = vector.shape_cast %171 : vector<1x1x12x16xbf16> to vector<12x16xbf16>
    %cst_159 = arith.constant dense<0.000000e+00> : vector<72x16xf32>
    %173 = tpu.matmul %170, %172, %cst_159 {dimension_numbers = #tpu.dot_dimension_numbers<[1], [0], [0], [1], [0, 0, 1, 1], [], []>} : vector<72x12xbf16>, vector<12x16xbf16>, vector<72x16xf32> -> vector<72x16xf32>
    %174 = arith.addf %168, %173 : vector<72x16xf32>
    %175 = vector.shape_cast %174 : vector<72x16xf32> to vector<4x18x16xf32>
    %176 = vector.extract_strided_slice %175 {offsets = [0, 0, 0], sizes = [4, 16, 16], strides = [1, 1, 1]} : vector<4x18x16xf32> to vector<4x16x16xf32>
    %c0_160 = arith.constant 0 : index
    %c0_161 = arith.constant 0 : index
    %c0_162 = arith.constant 0 : index
    %c0_163 = arith.constant 0 : index
    %177 = vector.load %arg12[%c0_160, %c0_161, %c0_162, %c0_163] : memref<1x4x16x16xf32, #tpu.memory_space<vmem>>, vector<1x4x16x16xf32>
    %178 = vector.shape_cast %177 : vector<1x4x16x16xf32> to vector<4x16x16xf32>
    %179 = vector.shape_cast %176 : vector<4x16x16xf32> to vector<1x4x16x16xf32>
    tpu.vector_store %arg12[%c0_160, %c0_161, %c0_162, %c0_163], %179 {strides = array<i32>} : memref<1x4x16x16xf32, #tpu.memory_space<vmem>>, vector<1x4x16x16xf32>,
    %cst_164 = arith.constant dense<0.000000e+00> : vector<16xf32>
    %180 = vector.multi_reduction <add>, %176, %cst_164 [0, 1] : vector<4x16x16xf32> to vector<16xf32>
    %c0_165 = arith.constant 0 : index
    %c0_166 = arith.constant 0 : index
    %c0_167 = arith.constant 0 : index
    %c0_168 = arith.constant 0 : index
    %181 = vector.load %arg13[%c0_165, %c0_166, %c0_167, %c0_168] : memref<1x1x2x16xf32, #tpu.memory_space<vmem>>, vector<1x1x1x16xf32>
    %182 = vector.shape_cast %181 : vector<1x1x1x16xf32> to vector<16xf32>
    %183 = vector.shape_cast %180 : vector<16xf32> to vector<1x1x1x16xf32>
    tpu.vector_store %arg13[%c0_165, %c0_166, %c0_167, %c0_168], %183 {strides = array<i32>} : memref<1x1x2x16xf32, #tpu.memory_space<vmem>>, vector<1x1x1x16xf32>,
    %184 = arith.mulf %176, %176 : vector<4x16x16xf32>
    %cst_169 = arith.constant dense<0.000000e+00> : vector<16xf32>
    %185 = vector.multi_reduction <add>, %184, %cst_169 [0, 1] : vector<4x16x16xf32> to vector<16xf32>
    %c0_170 = arith.constant 0 : index
    %c0_171 = arith.constant 0 : index
    %c1_172 = arith.constant 1 : index
    %c0_173 = arith.constant 0 : index
    %186 = vector.load %arg13[%c0_170, %c0_171, %c1_172, %c0_173] : memref<1x1x2x16xf32, #tpu.memory_space<vmem>>, vector<1x1x1x16xf32>
    %187 = vector.shape_cast %186 : vector<1x1x1x16xf32> to vector<16xf32>
    %188 = vector.shape_cast %185 : vector<16xf32> to vector<1x1x1x16xf32>
    tpu.vector_store %arg13[%c0_170, %c0_171, %c1_172, %c0_173], %188 {strides = array<i32>} : memref<1x1x2x16xf32, #tpu.memory_space<vmem>>, vector<1x1x1x16xf32>,
    return
  }
  func.func @transform_0(%arg0: i32, %arg1: i32) -> (i32, i32, i32, i32) {
    %c0_i32 = arith.constant 0 : i32
    %c0_i32_0 = arith.constant 0 : i32
    %c0_i32_1 = arith.constant 0 : i32
    return %arg0, %arg1, %c0_i32, %c0_i32_0 : i32, i32, i32, i32
  }
  func.func @transform_1(%arg0: i32, %arg1: i32) -> (i32, i32, i32, i32) {
    %c4_i32 = arith.constant 4 : i32
    %0 = arith.muli %arg1, %c4_i32 : i32
    %c1_i32 = arith.constant 1 : i32
    %1 = arith.subi %0, %c1_i32 : i32
    %c0_i32 = arith.constant 0 : i32
    %2 = arith.maxsi %1, %c0_i32 : i32
    %c0_i32_0 = arith.constant 0 : i32
    %c0_i32_1 = arith.constant 0 : i32
    %c0_i32_2 = arith.constant 0 : i32
    return %arg0, %2, %c0_i32_0, %c0_i32_1 : i32, i32, i32, i32
  }
  func.func @transform_2(%arg0: i32, %arg1: i32) -> (i32, i32, i32, i32) {
    %c4_i32 = arith.constant 4 : i32
    %0 = arith.muli %arg1, %c4_i32 : i32
    %c4_i32_0 = arith.constant 4 : i32
    %1 = arith.addi %0, %c4_i32_0 : i32
    %c15_i32 = arith.constant 15 : i32
    %2 = arith.minsi %1, %c15_i32 : i32
    %c0_i32 = arith.constant 0 : i32
    %c0_i32_1 = arith.constant 0 : i32
    %c0_i32_2 = arith.constant 0 : i32
    return %arg0, %2, %c0_i32, %c0_i32_1 : i32, i32, i32, i32
  }
  func.func @transform_3(%arg0: i32, %arg1: i32) -> (i32, i32, i32, i32) {
    %c0_i32 = arith.constant 0 : i32
    %c0_i32_0 = arith.constant 0 : i32
    %c0_i32_1 = arith.constant 0 : i32
    return %arg0, %arg1, %c0_i32, %c0_i32_0 : i32, i32, i32, i32
  }
  func.func @transform_4(%arg0: i32, %arg1: i32) -> (i32, i32, i32, i32) {
    %c4_i32 = arith.constant 4 : i32
    %0 = arith.muli %arg1, %c4_i32 : i32
    %c1_i32 = arith.constant 1 : i32
    %1 = arith.subi %0, %c1_i32 : i32
    %c0_i32 = arith.constant 0 : i32
    %2 = arith.maxsi %1, %c0_i32 : i32
    %c0_i32_0 = arith.constant 0 : i32
    %c0_i32_1 = arith.constant 0 : i32
    %c0_i32_2 = arith.constant 0 : i32
    return %arg0, %2, %c0_i32_0, %c0_i32_1 : i32, i32, i32, i32
  }
  func.func @transform_5(%arg0: i32, %arg1: i32) -> (i32, i32, i32, i32) {
    %c4_i32 = arith.constant 4 : i32
    %0 = arith.muli %arg1, %c4_i32 : i32
    %c4_i32_0 = arith.constant 4 : i32
    %1 = arith.addi %0, %c4_i32_0 : i32
    %c15_i32 = arith.constant 15 : i32
    %2 = arith.minsi %1, %c15_i32 : i32
    %c0_i32 = arith.constant 0 : i32
    %c0_i32_1 = arith.constant 0 : i32
    %c0_i32_2 = arith.constant 0 : i32
    return %arg0, %2, %c0_i32, %c0_i32_1 : i32, i32, i32, i32
  }
  func.func @transform_6(%arg0: i32, %arg1: i32) -> (i32, i32) {
    %c0_i32 = arith.constant 0 : i32
    %c0_i32_0 = arith.constant 0 : i32
    %c0_i32_1 = arith.constant 0 : i32
    return %c0_i32, %c0_i32_0 : i32, i32
  }
  func.func @transform_7(%arg0: i32, %arg1: i32) -> (i32, i32) {
    %c0_i32 = arith.constant 0 : i32
    %c0_i32_0 = arith.constant 0 : i32
    %c0_i32_1 = arith.constant 0 : i32
    return %c0_i32, %c0_i32_0 : i32, i32
  }
  func.func @transform_8(%arg0: i32, %arg1: i32) -> (i32, i32, i32, i32) {
    %c0_i32 = arith.constant 0 : i32
    %c0_i32_0 = arith.constant 0 : i32
    %c0_i32_1 = arith.constant 0 : i32
    %c0_i32_2 = arith.constant 0 : i32
    %c0_i32_3 = arith.constant 0 : i32
    return %c0_i32, %c0_i32_0, %c0_i32_1, %c0_i32_2 : i32, i32, i32, i32
  }
  func.func @transform_9(%arg0: i32, %arg1: i32) -> (i32, i32, i32, i32) {
    %c0_i32 = arith.constant 0 : i32
    %c0_i32_0 = arith.constant 0 : i32
    %c0_i32_1 = arith.constant 0 : i32
    %c0_i32_2 = arith.constant 0 : i32
    %c0_i32_3 = arith.constant 0 : i32
    return %c0_i32, %c0_i32_0, %c0_i32_1, %c0_i32_2 : i32, i32, i32, i32
  }
  func.func @transform_10(%arg0: i32, %arg1: i32) -> (i32, i32, i32, i32) {
    %c0_i32 = arith.constant 0 : i32
    %c0_i32_0 = arith.constant 0 : i32
    %c0_i32_1 = arith.constant 0 : i32
    return %arg0, %arg1, %c0_i32, %c0_i32_0 : i32, i32, i32, i32
  }
  func.func @transform_11(%arg0: i32, %arg1: i32) -> (i32, i32, i32, i32) {
    %c0_i32 = arith.constant 0 : i32
    %c0_i32_0 = arith.constant 0 : i32
    %c0_i32_1 = arith.constant 0 : i32
    return %arg0, %arg1, %c0_i32, %c0_i32_0 : i32, i32, i32, i32
  }
}

module attributes {stable_mosaic.version = 11 : i64} {
  func.func @kernel(%arg0: i32, %arg1: i32, %arg2: memref<1x4x16x16xf32, #tpu.memory_space<vmem>>, %arg3: memref<1x1x16x16xf32, #tpu.memory_space<vmem>>, %arg4: memref<1x1x16x16xf32, #tpu.memory_space<vmem>>, %arg5: memref<1x16xf32, #tpu.memory_space<vmem>>, %arg6: memref<1x16xf32, #tpu.memory_space<vmem>>, %arg7: memref<3x3x16x16xbf16, #tpu.memory_space<vmem>>, %arg8: memref<1x4x16x16xf32, #tpu.memory_space<vmem>>, %arg9: memref<1x1x2x16xf32, #tpu.memory_space<vmem>>, %arg10: memref<126x16xf32, #tpu.memory_space<vmem>>) attributes {dimension_semantics = [#tpu.dimension_semantics<parallel>, #tpu.dimension_semantics<parallel>], iteration_bounds = array<i64: 2, 4>, scalar_prefetch = 0 : i64, scratch_operands = 1 : i64, tpu.core_type = #tpu.core_type<tc>, window_params = [{transform_indices = @transform_0, window_bounds = array<i64: 1, 4, 16, 16>}, {transform_indices = @transform_1, window_bounds = array<i64: 1, 1, 16, 16>}, {transform_indices = @transform_2, window_bounds = array<i64: 1, 1, 16, 16>}, {pipeline_mode = #tpu.pipeline_mode<synchronous>, transform_indices = @transform_3, window_bounds = array<i64: 1, 16>}, {pipeline_mode = #tpu.pipeline_mode<synchronous>, transform_indices = @transform_4, window_bounds = array<i64: 1, 16>}, {pipeline_mode = #tpu.pipeline_mode<synchronous>, transform_indices = @transform_5, window_bounds = array<i64: 3, 3, 16, 16>}, {transform_indices = @transform_6, window_bounds = array<i64: 1, 4, 16, 16>}, {transform_indices = @transform_7, window_bounds = array<i64: 1, 1, 2, 16>}]} {
    %c0_i32 = arith.constant 0 : i32
    %0 = arith.cmpi sgt, %arg1, %c0_i32 : i32
    %c3_i32 = arith.constant 3 : i32
    %1 = arith.cmpi slt, %arg1, %c3_i32 : i32
    %c0 = arith.constant 0 : index
    %c0_0 = arith.constant 0 : index
    %c0_1 = arith.constant 0 : index
    %c0_2 = arith.constant 0 : index
    %2 = vector.load %arg2[%c0, %c0_0, %c0_1, %c0_2] : memref<1x4x16x16xf32, #tpu.memory_space<vmem>>, vector<1x4x16x16xf32>
    %3 = vector.shape_cast %2 : vector<1x4x16x16xf32> to vector<4x16x16xf32>
    %c0_3 = arith.constant 0 : index
    %c0_4 = arith.constant 0 : index
    %c0_5 = arith.constant 0 : index
    %c0_6 = arith.constant 0 : index
    %4 = vector.load %arg3[%c0_3, %c0_4, %c0_5, %c0_6] : memref<1x1x16x16xf32, #tpu.memory_space<vmem>>, vector<1x1x16x16xf32>
    %5 = vector.shape_cast %4 : vector<1x1x16x16xf32> to vector<16x16xf32>
    %c0_7 = arith.constant 0 : index
    %c0_8 = arith.constant 0 : index
    %c0_9 = arith.constant 0 : index
    %c0_10 = arith.constant 0 : index
    %6 = vector.load %arg4[%c0_7, %c0_8, %c0_9, %c0_10] : memref<1x1x16x16xf32, #tpu.memory_space<vmem>>, vector<1x1x16x16xf32>
    %7 = vector.shape_cast %6 : vector<1x1x16x16xf32> to vector<16x16xf32>
    %c0_11 = arith.constant 0 : index
    %c0_12 = arith.constant 0 : index
    %8 = vector.load %arg5[%c0_11, %c0_12] : memref<1x16xf32, #tpu.memory_space<vmem>>, vector<1x16xf32>
    %9 = vector.shape_cast %8 : vector<1x16xf32> to vector<16xf32>
    %c0_13 = arith.constant 0 : index
    %c0_14 = arith.constant 0 : index
    %10 = vector.load %arg6[%c0_13, %c0_14] : memref<1x16xf32, #tpu.memory_space<vmem>>, vector<1x16xf32>
    %11 = vector.shape_cast %10 : vector<1x16xf32> to vector<16xf32>
    %12 = vector.shape_cast %9 : vector<16xf32> to vector<1x1x16xf32>
    %13 = vector.broadcast %12 : vector<1x1x16xf32> to vector<4x16x16xf32>
    %14 = arith.mulf %3, %13 : vector<4x16x16xf32>
    %15 = vector.shape_cast %11 : vector<16xf32> to vector<1x1x16xf32>
    %16 = vector.broadcast %15 : vector<1x1x16xf32> to vector<4x16x16xf32>
    %17 = arith.addf %14, %16 : vector<4x16x16xf32>
    %cst = arith.constant 0.000000e+00 : f32
    %18 = vector.broadcast %cst : f32 to vector<4x16x16xf32>
    %19 = arith.maximumf %17, %18 : vector<4x16x16xf32>
    %20 = vector.shape_cast %9 : vector<16xf32> to vector<1x16xf32>
    %21 = vector.broadcast %20 : vector<1x16xf32> to vector<16x16xf32>
    %22 = arith.mulf %5, %21 : vector<16x16xf32>
    %23 = vector.shape_cast %11 : vector<16xf32> to vector<1x16xf32>
    %24 = vector.broadcast %23 : vector<1x16xf32> to vector<16x16xf32>
    %25 = arith.addf %22, %24 : vector<16x16xf32>
    %cst_15 = arith.constant 0.000000e+00 : f32
    %26 = vector.broadcast %cst_15 : f32 to vector<16x16xf32>
    %27 = arith.maximumf %25, %26 : vector<16x16xf32>
    %28 = vector.shape_cast %9 : vector<16xf32> to vector<1x16xf32>
    %29 = vector.broadcast %28 : vector<1x16xf32> to vector<16x16xf32>
    %30 = arith.mulf %7, %29 : vector<16x16xf32>
    %31 = vector.shape_cast %11 : vector<16xf32> to vector<1x16xf32>
    %32 = vector.broadcast %31 : vector<1x16xf32> to vector<16x16xf32>
    %33 = arith.addf %30, %32 : vector<16x16xf32>
    %cst_16 = arith.constant 0.000000e+00 : f32
    %34 = vector.broadcast %cst_16 : f32 to vector<16x16xf32>
    %35 = arith.maximumf %33, %34 : vector<16x16xf32>
    %cst_17 = arith.constant 0.000000e+00 : f32
    %36 = vector.broadcast %cst_17 : f32 to vector<16x16xf32>
    %37 = arith.select %0, %27, %36 : vector<16x16xf32>
    %cst_18 = arith.constant 0.000000e+00 : f32
    %38 = vector.broadcast %cst_18 : f32 to vector<16x16xf32>
    %39 = arith.select %1, %35, %38 : vector<16x16xf32>
    %cst_19 = arith.constant 0.000000e+00 : f32
    %40 = vector.broadcast %cst_19 : f32 to vector<1x16x16xf32>
    %41 = vector.shape_cast %37 : vector<16x16xf32> to vector<1x16x16xf32>
    %42 = vector.shape_cast %39 : vector<16x16xf32> to vector<1x16x16xf32>
    %43 = tpu.concatenate %41, %19, %42, %40 in 0 : vector<1x16x16xf32>, vector<4x16x16xf32>, vector<1x16x16xf32>, vector<1x16x16xf32> -> vector<7x16x16xf32>
    %cst_20 = arith.constant 0.000000e+00 : f32
    %44 = vector.broadcast %cst_20 : f32 to vector<7x1x16xf32>
    %45 = tpu.concatenate %44, %43, %44 in 1 : vector<7x1x16xf32>, vector<7x16x16xf32>, vector<7x1x16xf32> -> vector<7x18x16xf32>
    %46 = vector.shape_cast %45 : vector<7x18x16xf32> to vector<126x16xf32>
    %c0_21 = arith.constant 0 : index
    %c0_22 = arith.constant 0 : index
    %47 = vector.load %arg10[%c0_21, %c0_22] : memref<126x16xf32, #tpu.memory_space<vmem>>, vector<126x16xf32>
    tpu.vector_store %arg10[%c0_21, %c0_22], %46 {strides = array<i32>} : memref<126x16xf32, #tpu.memory_space<vmem>>, vector<126x16xf32>,
    %cst_23 = arith.constant 0.000000e+00 : f32
    %48 = vector.broadcast %cst_23 : f32 to vector<72x16xf32>
    %c0_24 = arith.constant 0 : index
    %c0_25 = arith.constant 0 : index
    %49 = vector.load %arg10[%c0_24, %c0_25] : memref<126x16xf32, #tpu.memory_space<vmem>>, vector<72x16xf32>
    %50 = arith.truncf %49 : vector<72x16xf32> to vector<72x16xbf16>
    %c0_26 = arith.constant 0 : index
    %c0_27 = arith.constant 0 : index
    %c0_28 = arith.constant 0 : index
    %c0_29 = arith.constant 0 : index
    %51 = vector.load %arg7[%c0_26, %c0_27, %c0_28, %c0_29] : memref<3x3x16x16xbf16, #tpu.memory_space<vmem>>, vector<1x1x16x16xbf16>
    %52 = vector.shape_cast %51 : vector<1x1x16x16xbf16> to vector<16x16xbf16>
    %cst_30 = arith.constant dense<0.000000e+00> : vector<72x16xf32>
    %53 = tpu.matmul %50, %52, %cst_30 {dimension_numbers = #tpu.dot_dimension_numbers<[1], [0], [0], [1], [0, 0, 1, 1], [], []>} : vector<72x16xbf16>, vector<16x16xbf16>, vector<72x16xf32> -> vector<72x16xf32>
    %54 = arith.addf %48, %53 : vector<72x16xf32>
    %c1 = arith.constant 1 : index
    %c0_31 = arith.constant 0 : index
    %55 = vector.load %arg10[%c1, %c0_31] : memref<126x16xf32, #tpu.memory_space<vmem>>, vector<72x16xf32>
    %56 = arith.truncf %55 : vector<72x16xf32> to vector<72x16xbf16>
    %c0_32 = arith.constant 0 : index
    %c1_33 = arith.constant 1 : index
    %c0_34 = arith.constant 0 : index
    %c0_35 = arith.constant 0 : index
    %57 = vector.load %arg7[%c0_32, %c1_33, %c0_34, %c0_35] : memref<3x3x16x16xbf16, #tpu.memory_space<vmem>>, vector<1x1x16x16xbf16>
    %58 = vector.shape_cast %57 : vector<1x1x16x16xbf16> to vector<16x16xbf16>
    %cst_36 = arith.constant dense<0.000000e+00> : vector<72x16xf32>
    %59 = tpu.matmul %56, %58, %cst_36 {dimension_numbers = #tpu.dot_dimension_numbers<[1], [0], [0], [1], [0, 0, 1, 1], [], []>} : vector<72x16xbf16>, vector<16x16xbf16>, vector<72x16xf32> -> vector<72x16xf32>
    %60 = arith.addf %54, %59 : vector<72x16xf32>
    %c2 = arith.constant 2 : index
    %c0_37 = arith.constant 0 : index
    %61 = vector.load %arg10[%c2, %c0_37] : memref<126x16xf32, #tpu.memory_space<vmem>>, vector<72x16xf32>
    %62 = arith.truncf %61 : vector<72x16xf32> to vector<72x16xbf16>
    %c0_38 = arith.constant 0 : index
    %c2_39 = arith.constant 2 : index
    %c0_40 = arith.constant 0 : index
    %c0_41 = arith.constant 0 : index
    %63 = vector.load %arg7[%c0_38, %c2_39, %c0_40, %c0_41] : memref<3x3x16x16xbf16, #tpu.memory_space<vmem>>, vector<1x1x16x16xbf16>
    %64 = vector.shape_cast %63 : vector<1x1x16x16xbf16> to vector<16x16xbf16>
    %cst_42 = arith.constant dense<0.000000e+00> : vector<72x16xf32>
    %65 = tpu.matmul %62, %64, %cst_42 {dimension_numbers = #tpu.dot_dimension_numbers<[1], [0], [0], [1], [0, 0, 1, 1], [], []>} : vector<72x16xbf16>, vector<16x16xbf16>, vector<72x16xf32> -> vector<72x16xf32>
    %66 = arith.addf %60, %65 : vector<72x16xf32>
    %c18 = arith.constant 18 : index
    %c0_43 = arith.constant 0 : index
    %67 = vector.load %arg10[%c18, %c0_43] : memref<126x16xf32, #tpu.memory_space<vmem>>, vector<72x16xf32>
    %68 = arith.truncf %67 : vector<72x16xf32> to vector<72x16xbf16>
    %c1_44 = arith.constant 1 : index
    %c0_45 = arith.constant 0 : index
    %c0_46 = arith.constant 0 : index
    %c0_47 = arith.constant 0 : index
    %69 = vector.load %arg7[%c1_44, %c0_45, %c0_46, %c0_47] : memref<3x3x16x16xbf16, #tpu.memory_space<vmem>>, vector<1x1x16x16xbf16>
    %70 = vector.shape_cast %69 : vector<1x1x16x16xbf16> to vector<16x16xbf16>
    %cst_48 = arith.constant dense<0.000000e+00> : vector<72x16xf32>
    %71 = tpu.matmul %68, %70, %cst_48 {dimension_numbers = #tpu.dot_dimension_numbers<[1], [0], [0], [1], [0, 0, 1, 1], [], []>} : vector<72x16xbf16>, vector<16x16xbf16>, vector<72x16xf32> -> vector<72x16xf32>
    %72 = arith.addf %66, %71 : vector<72x16xf32>
    %c19 = arith.constant 19 : index
    %c0_49 = arith.constant 0 : index
    %73 = vector.load %arg10[%c19, %c0_49] : memref<126x16xf32, #tpu.memory_space<vmem>>, vector<72x16xf32>
    %74 = arith.truncf %73 : vector<72x16xf32> to vector<72x16xbf16>
    %c1_50 = arith.constant 1 : index
    %c1_51 = arith.constant 1 : index
    %c0_52 = arith.constant 0 : index
    %c0_53 = arith.constant 0 : index
    %75 = vector.load %arg7[%c1_50, %c1_51, %c0_52, %c0_53] : memref<3x3x16x16xbf16, #tpu.memory_space<vmem>>, vector<1x1x16x16xbf16>
    %76 = vector.shape_cast %75 : vector<1x1x16x16xbf16> to vector<16x16xbf16>
    %cst_54 = arith.constant dense<0.000000e+00> : vector<72x16xf32>
    %77 = tpu.matmul %74, %76, %cst_54 {dimension_numbers = #tpu.dot_dimension_numbers<[1], [0], [0], [1], [0, 0, 1, 1], [], []>} : vector<72x16xbf16>, vector<16x16xbf16>, vector<72x16xf32> -> vector<72x16xf32>
    %78 = arith.addf %72, %77 : vector<72x16xf32>
    %c20 = arith.constant 20 : index
    %c0_55 = arith.constant 0 : index
    %79 = vector.load %arg10[%c20, %c0_55] : memref<126x16xf32, #tpu.memory_space<vmem>>, vector<72x16xf32>
    %80 = arith.truncf %79 : vector<72x16xf32> to vector<72x16xbf16>
    %c1_56 = arith.constant 1 : index
    %c2_57 = arith.constant 2 : index
    %c0_58 = arith.constant 0 : index
    %c0_59 = arith.constant 0 : index
    %81 = vector.load %arg7[%c1_56, %c2_57, %c0_58, %c0_59] : memref<3x3x16x16xbf16, #tpu.memory_space<vmem>>, vector<1x1x16x16xbf16>
    %82 = vector.shape_cast %81 : vector<1x1x16x16xbf16> to vector<16x16xbf16>
    %cst_60 = arith.constant dense<0.000000e+00> : vector<72x16xf32>
    %83 = tpu.matmul %80, %82, %cst_60 {dimension_numbers = #tpu.dot_dimension_numbers<[1], [0], [0], [1], [0, 0, 1, 1], [], []>} : vector<72x16xbf16>, vector<16x16xbf16>, vector<72x16xf32> -> vector<72x16xf32>
    %84 = arith.addf %78, %83 : vector<72x16xf32>
    %c36 = arith.constant 36 : index
    %c0_61 = arith.constant 0 : index
    %85 = vector.load %arg10[%c36, %c0_61] : memref<126x16xf32, #tpu.memory_space<vmem>>, vector<72x16xf32>
    %86 = arith.truncf %85 : vector<72x16xf32> to vector<72x16xbf16>
    %c2_62 = arith.constant 2 : index
    %c0_63 = arith.constant 0 : index
    %c0_64 = arith.constant 0 : index
    %c0_65 = arith.constant 0 : index
    %87 = vector.load %arg7[%c2_62, %c0_63, %c0_64, %c0_65] : memref<3x3x16x16xbf16, #tpu.memory_space<vmem>>, vector<1x1x16x16xbf16>
    %88 = vector.shape_cast %87 : vector<1x1x16x16xbf16> to vector<16x16xbf16>
    %cst_66 = arith.constant dense<0.000000e+00> : vector<72x16xf32>
    %89 = tpu.matmul %86, %88, %cst_66 {dimension_numbers = #tpu.dot_dimension_numbers<[1], [0], [0], [1], [0, 0, 1, 1], [], []>} : vector<72x16xbf16>, vector<16x16xbf16>, vector<72x16xf32> -> vector<72x16xf32>
    %90 = arith.addf %84, %89 : vector<72x16xf32>
    %c37 = arith.constant 37 : index
    %c0_67 = arith.constant 0 : index
    %91 = vector.load %arg10[%c37, %c0_67] : memref<126x16xf32, #tpu.memory_space<vmem>>, vector<72x16xf32>
    %92 = arith.truncf %91 : vector<72x16xf32> to vector<72x16xbf16>
    %c2_68 = arith.constant 2 : index
    %c1_69 = arith.constant 1 : index
    %c0_70 = arith.constant 0 : index
    %c0_71 = arith.constant 0 : index
    %93 = vector.load %arg7[%c2_68, %c1_69, %c0_70, %c0_71] : memref<3x3x16x16xbf16, #tpu.memory_space<vmem>>, vector<1x1x16x16xbf16>
    %94 = vector.shape_cast %93 : vector<1x1x16x16xbf16> to vector<16x16xbf16>
    %cst_72 = arith.constant dense<0.000000e+00> : vector<72x16xf32>
    %95 = tpu.matmul %92, %94, %cst_72 {dimension_numbers = #tpu.dot_dimension_numbers<[1], [0], [0], [1], [0, 0, 1, 1], [], []>} : vector<72x16xbf16>, vector<16x16xbf16>, vector<72x16xf32> -> vector<72x16xf32>
    %96 = arith.addf %90, %95 : vector<72x16xf32>
    %c38 = arith.constant 38 : index
    %c0_73 = arith.constant 0 : index
    %97 = vector.load %arg10[%c38, %c0_73] : memref<126x16xf32, #tpu.memory_space<vmem>>, vector<72x16xf32>
    %98 = arith.truncf %97 : vector<72x16xf32> to vector<72x16xbf16>
    %c2_74 = arith.constant 2 : index
    %c2_75 = arith.constant 2 : index
    %c0_76 = arith.constant 0 : index
    %c0_77 = arith.constant 0 : index
    %99 = vector.load %arg7[%c2_74, %c2_75, %c0_76, %c0_77] : memref<3x3x16x16xbf16, #tpu.memory_space<vmem>>, vector<1x1x16x16xbf16>
    %100 = vector.shape_cast %99 : vector<1x1x16x16xbf16> to vector<16x16xbf16>
    %cst_78 = arith.constant dense<0.000000e+00> : vector<72x16xf32>
    %101 = tpu.matmul %98, %100, %cst_78 {dimension_numbers = #tpu.dot_dimension_numbers<[1], [0], [0], [1], [0, 0, 1, 1], [], []>} : vector<72x16xbf16>, vector<16x16xbf16>, vector<72x16xf32> -> vector<72x16xf32>
    %102 = arith.addf %96, %101 : vector<72x16xf32>
    %103 = vector.shape_cast %102 : vector<72x16xf32> to vector<4x18x16xf32>
    %104 = vector.extract_strided_slice %103 {offsets = [0, 0, 0], sizes = [4, 16, 16], strides = [1, 1, 1]} : vector<4x18x16xf32> to vector<4x16x16xf32>
    %c0_79 = arith.constant 0 : index
    %c0_80 = arith.constant 0 : index
    %c0_81 = arith.constant 0 : index
    %c0_82 = arith.constant 0 : index
    %105 = vector.load %arg8[%c0_79, %c0_80, %c0_81, %c0_82] : memref<1x4x16x16xf32, #tpu.memory_space<vmem>>, vector<1x4x16x16xf32>
    %106 = vector.shape_cast %105 : vector<1x4x16x16xf32> to vector<4x16x16xf32>
    %107 = vector.shape_cast %104 : vector<4x16x16xf32> to vector<1x4x16x16xf32>
    tpu.vector_store %arg8[%c0_79, %c0_80, %c0_81, %c0_82], %107 {strides = array<i32>} : memref<1x4x16x16xf32, #tpu.memory_space<vmem>>, vector<1x4x16x16xf32>,
    %cst_83 = arith.constant dense<0.000000e+00> : vector<16xf32>
    %108 = vector.multi_reduction <add>, %104, %cst_83 [0, 1] : vector<4x16x16xf32> to vector<16xf32>
    %c0_84 = arith.constant 0 : index
    %c0_85 = arith.constant 0 : index
    %c0_86 = arith.constant 0 : index
    %c0_87 = arith.constant 0 : index
    %109 = vector.load %arg9[%c0_84, %c0_85, %c0_86, %c0_87] : memref<1x1x2x16xf32, #tpu.memory_space<vmem>>, vector<1x1x1x16xf32>
    %110 = vector.shape_cast %109 : vector<1x1x1x16xf32> to vector<16xf32>
    %111 = vector.shape_cast %108 : vector<16xf32> to vector<1x1x1x16xf32>
    tpu.vector_store %arg9[%c0_84, %c0_85, %c0_86, %c0_87], %111 {strides = array<i32>} : memref<1x1x2x16xf32, #tpu.memory_space<vmem>>, vector<1x1x1x16xf32>,
    %112 = arith.mulf %104, %104 : vector<4x16x16xf32>
    %cst_88 = arith.constant dense<0.000000e+00> : vector<16xf32>
    %113 = vector.multi_reduction <add>, %112, %cst_88 [0, 1] : vector<4x16x16xf32> to vector<16xf32>
    %c0_89 = arith.constant 0 : index
    %c0_90 = arith.constant 0 : index
    %c1_91 = arith.constant 1 : index
    %c0_92 = arith.constant 0 : index
    %114 = vector.load %arg9[%c0_89, %c0_90, %c1_91, %c0_92] : memref<1x1x2x16xf32, #tpu.memory_space<vmem>>, vector<1x1x1x16xf32>
    %115 = vector.shape_cast %114 : vector<1x1x1x16xf32> to vector<16xf32>
    %116 = vector.shape_cast %113 : vector<16xf32> to vector<1x1x1x16xf32>
    tpu.vector_store %arg9[%c0_89, %c0_90, %c1_91, %c0_92], %116 {strides = array<i32>} : memref<1x1x2x16xf32, #tpu.memory_space<vmem>>, vector<1x1x1x16xf32>,
    return
  }
  func.func @transform_0(%arg0: i32, %arg1: i32) -> (i32, i32, i32, i32) {
    %c0_i32 = arith.constant 0 : i32
    %c0_i32_0 = arith.constant 0 : i32
    %c0_i32_1 = arith.constant 0 : i32
    return %arg0, %arg1, %c0_i32, %c0_i32_0 : i32, i32, i32, i32
  }
  func.func @transform_1(%arg0: i32, %arg1: i32) -> (i32, i32, i32, i32) {
    %c4_i32 = arith.constant 4 : i32
    %0 = arith.muli %arg1, %c4_i32 : i32
    %c1_i32 = arith.constant 1 : i32
    %1 = arith.subi %0, %c1_i32 : i32
    %c0_i32 = arith.constant 0 : i32
    %2 = arith.maxsi %1, %c0_i32 : i32
    %c0_i32_0 = arith.constant 0 : i32
    %c0_i32_1 = arith.constant 0 : i32
    %c0_i32_2 = arith.constant 0 : i32
    return %arg0, %2, %c0_i32_0, %c0_i32_1 : i32, i32, i32, i32
  }
  func.func @transform_2(%arg0: i32, %arg1: i32) -> (i32, i32, i32, i32) {
    %c4_i32 = arith.constant 4 : i32
    %0 = arith.muli %arg1, %c4_i32 : i32
    %c4_i32_0 = arith.constant 4 : i32
    %1 = arith.addi %0, %c4_i32_0 : i32
    %c15_i32 = arith.constant 15 : i32
    %2 = arith.minsi %1, %c15_i32 : i32
    %c0_i32 = arith.constant 0 : i32
    %c0_i32_1 = arith.constant 0 : i32
    %c0_i32_2 = arith.constant 0 : i32
    return %arg0, %2, %c0_i32, %c0_i32_1 : i32, i32, i32, i32
  }
  func.func @transform_3(%arg0: i32, %arg1: i32) -> (i32, i32) {
    %c0_i32 = arith.constant 0 : i32
    %c0_i32_0 = arith.constant 0 : i32
    %c0_i32_1 = arith.constant 0 : i32
    return %c0_i32, %c0_i32_0 : i32, i32
  }
  func.func @transform_4(%arg0: i32, %arg1: i32) -> (i32, i32) {
    %c0_i32 = arith.constant 0 : i32
    %c0_i32_0 = arith.constant 0 : i32
    %c0_i32_1 = arith.constant 0 : i32
    return %c0_i32, %c0_i32_0 : i32, i32
  }
  func.func @transform_5(%arg0: i32, %arg1: i32) -> (i32, i32, i32, i32) {
    %c0_i32 = arith.constant 0 : i32
    %c0_i32_0 = arith.constant 0 : i32
    %c0_i32_1 = arith.constant 0 : i32
    %c0_i32_2 = arith.constant 0 : i32
    %c0_i32_3 = arith.constant 0 : i32
    return %c0_i32, %c0_i32_0, %c0_i32_1, %c0_i32_2 : i32, i32, i32, i32
  }
  func.func @transform_6(%arg0: i32, %arg1: i32) -> (i32, i32, i32, i32) {
    %c0_i32 = arith.constant 0 : i32
    %c0_i32_0 = arith.constant 0 : i32
    %c0_i32_1 = arith.constant 0 : i32
    return %arg0, %arg1, %c0_i32, %c0_i32_0 : i32, i32, i32, i32
  }
  func.func @transform_7(%arg0: i32, %arg1: i32) -> (i32, i32, i32, i32) {
    %c0_i32 = arith.constant 0 : i32
    %c0_i32_0 = arith.constant 0 : i32
    %c0_i32_1 = arith.constant 0 : i32
    return %arg0, %arg1, %c0_i32, %c0_i32_0 : i32, i32, i32, i32
  }
}

</mosaic_0001>

<bundles_post_ra>
// kernel: squeeze.6
= control target key start
LH: loop header
LB: loop body
LE: loop exit
PB: predicated region body
PF: predicated region fallthrough
CT: control target
= control target key end

     0   :  { %s66_s8 = smov 116   ;;  %vm7_vm0 = vcmask 31744   ;;  %s67_s11 = smov 120   ;;  %s117_s0 = inlined_call_operand.vmem [shape: f32[32], index: 0, kind: input, shape index: {}]   ;;  %s118_s1 = inlined_call_operand.vmem [shape: f32[8,4], index: 1, kind: output, shape index: {}]  }
   0x1   :  { %v4_v0 = vld [vmem:[%s117_s0] sm:$0x1]  ;;  %s65_s0 = smov 124   ;;  %s68_s12 = smov 112  }
   0x2   :  { %5 = vst [vmem:[#allocation0] sm:$0x1] %v4_v0  ;;  %s69_s13 = smov 108   ;;  %s70_s14 = smov 104  }
   0x3   :  { %s71_s15 = smov 100  }
   0x9   :  { %v9_v1 = vld [vmem:[#allocation0] sm:$0x1]  }
   0xa   :  { %v21_v2 = vld [vmem:[#allocation0] sm:$0x1]   ;;  %10 = vrot.lane.b32.xlu0 %v9_v1, %s65_s0 }
   0xb   :  { %22 = vrot.lane.b32.xlu1 %v21_v2, %s66_s8  ;;  %v15_v3 = vld [vmem:[#allocation0] sm:$0x1]  }
   0xc   :  { %v27_v4 = vld [vmem:[#allocation0] sm:$0x1]  }
   0xd   :  { %v6_v5 = vld [vmem:[#allocation0] sm:$0x1]  }
   0xe   :  { %8 = vst.msk [vmem:[%s118_s1] sm:$0x1] %vm7_vm0, %v6_v5   ;;  %16 = vrot.lane.b32.xlu0 %v15_v3, %s67_s11  ;;  %v33_v6 = vld [vmem:[#allocation0] sm:$0x1]  }
   0xf   :  { %28 = vrot.lane.b32.xlu1 %v27_v4, %s68_s12  ;;  %v39_v7 = vld [vmem:[#allocation0] sm:$0x1]  }
  0x10   :  { %v45_v8 = vld [vmem:[#allocation0] sm:$0x1]  }
  0x12   :  { %34 = vrot.lane.b32.xlu0 %v33_v6, %s69_s13 }
  0x13   :  { %40 = vrot.lane.b32.xlu1 %v39_v7, %s70_s14 }
  0x16   :  { %46 = vrot.lane.b32.xlu0 %v45_v8, %s71_s15 }
  0x7c   :  { %v11_v9 = vpop.permute.xlu0 %10  }
  0x7d   :  { %v23_v10 = vpop.permute.xlu1 %22   ;;  %51 = vst.msk [vmem:[%s118_s1 + $0x1] sm:$0x1] %vm7_vm0, %v11_v9  }
  0x7e   :  { %53 = vst.msk [vmem:[%s118_s1 + $0x3] sm:$0x1] %vm7_vm0, %v23_v10  }
  0x80   :  { %v17_v11 = vpop.permute.xlu0 %16  }
  0x81   :  { %v29_v12 = vpop.permute.xlu1 %28   ;;  %52 = vst.msk [vmem:[%s118_s1 + $0x2] sm:$0x1] %vm7_vm0, %v17_v11  }
  0x82   :  { %54 = vst.msk [vmem:[%s118_s1 + $0x4] sm:$0x1] %vm7_vm0, %v29_v12  }
  0x84   :  { %v35_v13 = vpop.permute.xlu0 %34  }
  0x85   :  { %v41_v14 = vpop.permute.xlu1 %40   ;;  %55 = vst.msk [vmem:[%s118_s1 + $0x5] sm:$0x1] %vm7_vm0, %v35_v13  }
  0x86   :  { %56 = vst.msk [vmem:[%s118_s1 + $0x6] sm:$0x1] %vm7_vm0, %v41_v14  }
  0x88   :  { %v47_v15 = vpop.permute.xlu0 %46  }
  0x89   :  { %57 = vst.msk [vmem:[%s118_s1 + $0x7] sm:$0x1] %vm7_vm0, %v47_v15  }

// kernel: unet_block_pallas.3
= control target key start
LH: loop header
LB: loop body
LE: loop exit
PB: predicated region body
PF: predicated region fallthrough
CT: control target
= control target key end

     0   :  { %10 = vsyncpa [#allocation3], 0  ;;  %s941_s0 = inlined_call_operand.hbm [shape: f32[2,8,8,16], index: 0, kind: input, shape index: {}]   ;;  %s942_s1 = inlined_call_operand.vmem [shape: bf16[16,32], index: 1, kind: input, shape index: {}]   ;;  %s943_s2 = inlined_call_operand.vmem [shape: f32[1,32], index: 2, kind: input, shape index: {}]   ;;  %s944_s3 = inlined_call_operand.vmem [shape: f32[2,8,8,32], index: 3, kind: output, shape index: {0}]   ;;  %s945_s4 = inlined_call_operand.vmem [shape: f32[2,2,2,32], index: 4, kind: output, shape index: {1}]  }
   0x1   :  { %12 = vsyncpa [#allocation3 + $0x1], 0  ;;  %s762_s15 = smov 0   ;;  %s764_s16 = smov 0  }
   0x2   :  { %s766_s17 = smov 0   ;;  %s768_s18 = smov 0  }
   0x3   :  { %s770_s19 = smov 0   ;;  %s772_s20 = smov 0  }
   0x4   :  { %s774_s21 = smov 0   ;;  %s776_s22 = smov 0  }
   0x5 LB: > { %s532_s23 = sadd.s32 4294967295, %s732_s22   ;;  %s27_s24 = sadd.s32 1, %s724_s20  ;;  %s732_s22 = sphi %s776_s22, %s18_s22   ;;  %s728_s21 = sphi %s774_s21, %s959_s21   ;;  %s724_s20 = sphi %s772_s20, %s958_s20   ;;  %s720_s19 = sphi %s770_s19, %s957_s19   ;;  %s716_s18 = sphi %s768_s18, %s956_s18   ;;  %s712_s17 = sphi %s766_s17, %s955_s17   ;;  %s708_s16 = sphi %s764_s16, %s954_s16   ;;  %s704_s15 = sphi %s762_s15, %s953_s15  }
   0x6   : > { %p28_p0 = scmp.ge.s32.totalorder %s27_s24, 2  ;;  %s30_s25 = sadd.s32 1, %s728_s21 }
   0x7   : > { %s39_s26 = sadd.s32 1, %s712_s17  ;;  %p46_p1 = scmp.ne.s32.totalorder %s712_s17, %s708_s16 }
   0x8   : > { %s961_s24 = smov (%p28_p0, %s27_s24), 0  ;;  %s963_s25 = smov (!%p28_p0, %s30_s25), %s728_s21 }
   0x9   : > { %s35_s27 = ssub.s32 %s724_s20, %s961_s24  ;;  %p47_p2 = scmp.eq.s32.totalorder %s732_s22, 0 }
   0xa   : > { %p32_p3 = scmp.ge.s32.totalorder %s963_s25, 2  ;;  %p52_p4 = scmp.ne.s32.totalorder %s708_s16, %s704_s15 }
   0xb   : > { %p813_p5 = por %p47_p2, %p46_p1  ;;  %p53_p6 = scmp.eq.s32.totalorder %s532_s23, 0 }
   0xc   : > { %s965_s25 = smov (%p32_p3, %s963_s25), 0  ;;  %p568_p8 = scmp.lt.s32.totalorder %s732_s22, 4 }
   0xd   : > { %948 = sst [smem:[#allocation5_spill]] %s965_s25  ;;  %p819_p7 = por %p53_p6, %p52_p4 }
   0xe   : > { %s34_s30 = ssub.s32 %s728_s21, %s965_s25  ;;  %s180_s6 = sand.u32 1, %s712_s17  }
   0xf   : > { %s36_s5 = sor.u32 %s35_s27, %s34_s30  ;;  %s536_s7 = sshll.u32 %s180_s6, 5 }
  0x10   : > { %p37_p9 = scmp.eq.s32.totalorder %s36_s5, 0  ;;  %s537_s8 = sshll.u32 %s724_s20, 2 }
  0x11   : > { %s538_s10 = sshll.u32 %s728_s21, 3  ;;  %s184_s12 = scalar_lea.vmem [#allocation2], %s536_s7 }
  0x12   : > { %s829_s9 = scalar_select %p37_p9, %s712_s17, %s39_s26  }
  0x13   : > { %s190_s11 = sadd.s32 %s538_s10, %s537_s8  ;;  %s193_s13 = sshll.u32 %s184_s12, 4  ;;  %s832_s13 = int_to_ptr.vmem [resolvable:$true] %s193_s13 }
  0x14   : > { %s539_s14 = sshll.u32 %s190_s11, 7  ;;  %p843_p10 = pnand %p568_p8, %p813_p5 }
  0x15   : > { %s837_s25 = scalar_lea.hbm %s941_s0, %s539_s14  ;;  %s848_s27 = scalar_lea.sflag [#allocation3], %s180_s6 }
  0x16   : > { %s636_s30 = scalar_lea.hbm %s837_s25, 512  ;;  %p638_p13 = pneg %p843_p10 }
  0x17   : > { %p637_p12 = scmp.ne.s32.totalorder %s837_s25, %s636_s30  ;;  %s641_s7 = scalar_lea.hbm %s941_s0, 2048 }
  0x18   : > { %p642_p2 = scmp.lt.u32.totalorder %s837_s25, %s941_s0  ;;  %p643_p3 = scmp.lt.u32.totalorder %s641_s7, %s636_s30 }
  0x19   : > { %p639_p0 = pnand %p638_p13, %p637_p12  ;;  %p645_p5 = scmp.lt.u32.totalorder %s636_s30, %s837_s25 }
  0x1a   : > { %p644_p4 = por %p643_p3, %p642_p2 }
  0x1b   : > { %p640_p1 = pneg %p639_p0 }
  0x1c   : > { %p646_p6 = por %p645_p5, %p644_p4 }
  0x1e   : > { %p647_p8 = pnand %p646_p6, %p640_p1 }
  0x20   : > { %650 = shalt.err (!%p647_p8)
}
  0x21   : > { %s651_s6 = scalar_lea.vmem %s832_s13, 512  ;;  %s734_s11 = smov [#allocation2]  }
  0x22   : > { %p652_p9 = scmp.ne.s32.totalorder %s832_s13, %s651_s6  ;;  %s656_s12 = sshll.u32 %s734_s11, 4  ;;  %s657_s12 = int_to_ptr.vmem [resolvable:$false] %s656_s12 }
  0x23   : > { %s658_s14 = scalar_lea.vmem %s657_s12, 1024  ;;  %p659_p11 = scmp.lt.s32.totalorder %s832_s13, %s657_s12 }
  0x24   : > { %p654_p12 = pnand %p652_p9, %p638_p13  ;;  %p660_p2 = scmp.lt.s32.totalorder %s658_s14, %s651_s6 }
  0x26   : > { %p655_p0 = pneg %p654_p12  ;;  %p661_p3 = por %p660_p2, %p659_p11 }
  0x28   : > { %p662_p4 = pnand %p661_p3, %p655_p0 }
  0x2a   : > { %665 = shalt.err (!%p662_p4)
}
  0x2b   : > { %s735_s15 = smov 128   ;;  %s736_s23 = smov 8  }
  0x2c   : > { %567 = dma.hbm_to_vmem [thread:$0]  (!%p843_p10), %s837_s25, 512, %s832_s13, %s848_s27, %s735_s15, %s735_s15, %s736_s23  }
  0x2d   : > { %p201_p13 = scmp.lt.s32.totalorder %s732_s22, 5  ;;  %p951_p1 = scmp.ge.s32.totalorder %s732_s22, 1 }
  0x2f   : > { %p202_p5 = pnand %p951_p1, %p201_p13 }
  0x30   : > { %s207_s30 = sand.u32 (!%p202_p5), 1, %s708_s16  }
  0x31   : > { %205 = sbr.rel (%p202_p5) target bundleno = 303 (0x12f), region = 32  ;;  %s541_s28 = sshll.u32 (!%p202_p5), %s207_s30, 5 }
  0x32   : > { %s208_s5 = scalar_lea.sflag (!%p202_p5), [#allocation3], %s207_s30  ;;  %s211_s7 = scalar_lea.vmem (!%p202_p5), [#allocation2], %s541_s28 }
  0x38   : > { %699 = dma.done.wait (%p819_p7), %s208_s5, 512  }
  0x39   : > { %701 = vsyncadd (%p819_p7), %s208_s5, 4294966784  ;;  %v635_v0 = vld [vmem:[%s942_s1] sm:$0xff]   ;;  %v269_v2 = vld [vmem:[%s211_s7 + $0x8] sm:$0xff]  ;;  %vm289_vm0 = vcmask 130048   ;;  %s542_s25 = sshll.u32 %s716_s18, 2  ;;  %p250_p7 = scmp.lt.s32.totalorder %s720_s19, 1 }
  0x3a   : > { %v268_v1 = vld [vmem:[%s211_s7] sm:$0xff]  ;;  %v270_v3 = vld [vmem:[%s211_s7 + $0x10] sm:$0xff]  ;;  %556 = vmatprep.subr.bf16.mxu0 %v635_v0  ;;  %v271_v5 = vld [vmem:[%s211_s7 + $0x18] sm:$0xff]  ;;  %p252_p10 = scmp.lt.s32.totalorder %s542_s25, 7  ;;  %vm349_vm1 = vcmask 261120   ;;  %p261_p11 = scmp.lt.s32.totalorder %s716_s18, 1 }
  0x3b   : > { %v272_v4 = vpack.c.bf16 %v269_v2, %v268_v1  ;;  %557 = vmatpush3.bf16.msra.mxu0 %v635_v0  ;;  %v273_v6 = vpack.c.bf16 %v271_v5, %v270_v3  ;;  %s967_s19 = smov (!%p250_p7, %s720_s19), 1  ;;  %v547_v7 = vld [vmem:[%s943_s2] ss:$0 sm:$0xff]  ;;  %vm367_vm2 = vcmask 253952  }
  0x3c   : > { %s969_s25 = smov (!%p252_p10, %s542_s25), 7  ;;  %s543_s29 = sshll.u32 %s967_s19, 3 }
  0x3d   : > { %558 = vmatprep.mubr.msk.bf16.mxu0 %vm289_vm0, %v272_v4  ;;  %s255_s13 = sadd.s32 %s543_s29, %s969_s25  ;;  %s971_s18 = smov (!%p261_p11, %s716_s18), 1 }
  0x3e   : > { %559 = vmatmul.mubr.msk.bf16.vlgmr.msra.gmra.mrb[0].mxu0 %vm289_vm0, %v273_v6  ;;  %s544_s6 = sshll.u32 %s255_s13, 3  ;;  %s545_s15 = sshll.u32 %s967_s19, 1 }
  0x3f   : > { %s257_s14 = scalar_lea.vmem %s944_s3, %s544_s6  ;;  %s264_s23 = sadd.s32 %s545_s15, %s971_s18 }
  0x40   : > { %s546_s30 = sshll.u32 %s264_s23, 1 }
  0x41   : > { %s266_s7 = scalar_lea.vmem %s945_s4, %s546_s30 }
 0x111   : > { %v560_v8 = vpop.f32.mrb[0].mxu0 }
 0x112   : > { %v339_v9 = vadd.f32 %v560_v8, %v547_v7  ;;  %v330_v10 = vpop.f32.mrb[1].mxu0 }
 0x113   : > { %v331_v11 = vadd.f32 %v547_v7, %v330_v10  ;;  %v561_v12 = vpop.f32.mrb[2].mxu0 }
 0x114   : > { %v347_v13 = vmax.f32 %v339_v9, 0.0  ;;  %v342_v14 = vadd.f32 %v561_v12, %v547_v7  ;;  %v333_v15 = vpop.f32.mrb[3].mxu0 }
 0x115   : > { %v345_v16 = vmax.f32 %v331_v11, 0.0  ;;  %v334_v17 = vadd.f32 %v547_v7, %v333_v15 }
 0x116   : > { %352 = vst.msk [vmem:[%s257_s14 + $0x10] sm:$0xff] %vm349_vm1, %v347_v13  ;;  %v348_v18 = vmax.f32 %v342_v14, 0.0  ;;  %v371_v21 = vmul.f32 %v347_v13, %v347_v13  ;;  %v357_v26 = vsel %vm349_vm1, %v347_v13, 0.0 }
 0x117   : > { %350 = vst.msk [vmem:[%s257_s14] sm:$0xff] %vm349_vm1, %v345_v16  ;;  %v369_v19 = vmul.f32 %v345_v16, %v345_v16  ;;  %v346_v20 = vmax.f32 %v334_v17, 0.0  ;;  %v354_v22 = vsel %vm349_vm1, %v345_v16, 0.0 }
 0x118   : > { %353 = vst.msk [vmem:[%s257_s14 + $0x18] sm:$0xff] %vm349_vm1, %v348_v18  ;;  %v372_v28 = vmul.f32 %v348_v18, %v348_v18  ;;  %v376_v32 = vsel %vm349_vm1, %v371_v21, 0.0  ;;  %v359_v33 = vsel %vm349_vm1, %v348_v18, 0.0 }
 0x119   : > { %351 = vst.msk [vmem:[%s257_s14 + $0x8] sm:$0xff] %vm349_vm1, %v346_v20  ;;  %v355_v23 = vsel %vm349_vm1, %v346_v20, 0.0  ;;  %v370_v24 = vmul.f32 %v346_v20, %v346_v20  ;;  %v373_v27 = vsel %vm349_vm1, %v369_v19, 0.0 }
 0x11a   : > { %v356_v25 = vadd.f32 %v355_v23, %v354_v22  ;;  %v378_v36 = vsel %vm349_vm1, %v372_v28, 0.0 }
 0x11b   : > { %v374_v29 = vsel %vm349_vm1, %v370_v24, 0.0 }
 0x11c   : > { %v358_v30 = vadd.f32 %v357_v26, %v356_v25  ;;  %v375_v31 = vadd.f32 %v374_v29, %v373_v27 }
 0x11e   : > { %v360_v34 = vadd.f32 %v359_v33, %v358_v30  ;;  %v377_v35 = vadd.f32 %v376_v32, %v375_v31 }
 0x120   : > { %v361_v37 = vrot.slane %v360_v34, 4  ;;  %v379_v38 = vadd.f32 %v378_v36, %v377_v35 }
 0x122   : > { %v362_v39 = vadd.f32 %v361_v37, %v360_v34  ;;  %v380_v40 = vrot.slane %v379_v38, 4 }
 0x124   : > { %v363_v41 = vrot.slane %v362_v39, 2  ;;  %v381_v42 = vadd.f32 %v380_v40, %v379_v38 }
 0x126   : > { %v364_v43 = vadd.f32 %v363_v41, %v362_v39  ;;  %v382_v44 = vrot.slane %v381_v42, 2 }
 0x128   : > { %v365_v45 = vrot.slane %v364_v43, 1  ;;  %v383_v46 = vadd.f32 %v382_v44, %v381_v42 }
 0x12a   : > { %v366_v47 = vadd.f32 %v365_v45, %v364_v43  ;;  %v384_v48 = vrot.slane %v383_v46, 1 }
 0x12c   : > { %368 = vst.msk [vmem:[%s266_s7] sm:$0x1] %vm367_vm2, %v366_v47  ;;  %v385_v49 = vadd.f32 %v384_v48, %v383_v46 }
 0x12e   : > { %386 = vst.msk [vmem:[%s266_s7 + $0x1] sm:$0x1] %vm367_vm2, %v385_v49 }
 0x12f PF: > { %s18_s22 = sadd.s32 1, %s732_s22   ;;  %s952_s8 = sld [smem:[#allocation5_spill]] }
 0x130   : > { %p15_p6 = scmp.ge.s32.totalorder %s18_s22, 6   ;;  %s953_s15 = smov %s708_s16 }
 0x131   : > { %s954_s16 = smov %s712_s17  ;;  %s955_s17 = smov %s829_s9 }
 0x132   : > { %s956_s18 = smov %s724_s20  ;;  %s957_s19 = smov %s728_s21 }
 0x133   : > { %s958_s20 = smov %s961_s24  ;;  %17 = sbr.rel (!%p15_p6) target bundleno = 5 (0x5), region = 84 }
 0x135   : > { %s959_s21 = smov %s952_s8 }
 0x13a   :  { %439 = vsyncpa [#allocation3], 1 }
 0x13b   :  { %441 = vsyncpa [#allocation3 + $0x1], 1 }

// kernel: unet_block_pallas.5
= control target key start
LH: loop header
LB: loop body
LE: loop exit
PB: predicated region body
PF: predicated region fallthrough
CT: control target
= control target key end

     0   :  { %s3699_s24 = smov 0   ;;  %s3701_s25 = smov 0   ;;  %s4248_s0 = inlined_call_operand.vmem [shape: f32[2,16,16,16], index: 0, kind: input, shape index: {}, may-alias: {0,1,2}]   ;;  %s4249_s1 = inlined_call_operand.vmem [shape: f32[2,16,16,16], index: 1, kind: input, shape index: {}, may-alias: {0,1,2}]   ;;  %s4250_s2 = inlined_call_operand.vmem [shape: f32[2,16,16,16], index: 2, kind: input, shape index: {}, may-alias: {0,1,2}]   ;;  %s4251_s3 = inlined_call_operand.vmem [shape: f32[1,16], index: 3, kind: input, shape index: {}]   ;;  %s4252_s4 = inlined_call_operand.vmem [shape: f32[1,16], index: 4, kind: input, shape index: {}]   ;;  %s4253_s5 = inlined_call_operand.vmem [shape: bf16[3,3,16,16], index: 5, kind: input, shape index: {}]   ;;  %s4254_s6 = inlined_call_operand.vmem [shape: f32[2,16,16,16], index: 6, kind: output, shape index: {0}]   ;;  %s4255_s7 = inlined_call_operand.vmem [shape: f32[2,4,2,16], index: 7, kind: output, shape index: {1}]  }
   0x1   :  { %s3703_s26 = smov 0   ;;  %s3705_s27 = smov 0  }
   0x2   :  { %s3707_s28 = smov 0  }
   0x3 LB: > { %s27_s29 = sadd.s32 1, %s3646_s26  ;;  %s30_s30 = sadd.s32 1, %s3650_s27  ;;  %s3654_s28 = sphi %s3707_s28, %s18_s28   ;;  %s3650_s27 = sphi %s3705_s27, %s4264_s27   ;;  %s3646_s26 = sphi %s3703_s26, %s4263_s26   ;;  %s3642_s25 = sphi %s3701_s25, %s4262_s25   ;;  %s3638_s24 = sphi %s3699_s24, %s4261_s24  }
   0x4   : > { %p28_p0 = scmp.ge.s32.totalorder %s27_s29, 4  ;;  %p3057_p1 = scmp.ge.s32.totalorder %s3654_s28, 1 }
   0x5   : > { %p328_p2 = scmp.lt.s32.totalorder %s3654_s28, 9 }
   0x6   : > { %s4266_s29 = smov (%p28_p0, %s27_s29), 0  ;;  %s4268_s30 = smov (!%p28_p0, %s30_s30), %s3650_s27 }
   0x7   : > { %p329_p3 = pnand %p3057_p1, %p328_p2  ;;  %p32_p4 = scmp.ge.s32.totalorder %s4268_s30, 2 }
   0x8   : > { %v3734_v0 = vld [vmem:[%s4253_s5 + $0x20] sm:$0xff] (!%p329_p3)   ;;  %v3656_v1 = vmov (!%p329_p3), 0.0   ;;  %s3739_s10 = sshll.u32 (!%p329_p3), %s3638_s24, 2  ;;  %p405_p5 = scmp.lt.s32.totalorder (!%p329_p3), %s3642_s25, 1  ;;  %vm3657_vm0 = vmmov (!%p329_p3), 0   ;;  %v622_v2 = vlaneseq (!%p329_p3)  ;;  %v3609_v5 = vld [vmem:[%s4253_s5 + $0x8] sm:$0xff] (!%p329_p3)  }
   0x9   : > { %s4270_s30 = smov (%p32_p4, %s4268_s30), 0  ;;  %332 = sbr.rel (%p329_p3) target bundleno = 488 (0x1e8), region = 44 }
   0xa   : > { %3303 = vmatprep.subr.bf16.mxu0 (!%p329_p3), %v3656_v1  ;;  %3215 = vmatprep.subr.bf16.mxu1 (!%p329_p3), %v3656_v1  ;;  %p407_p6 = scmp.lt.s32.totalorder (!%p329_p3), %s3739_s10, 15  ;;  %s3746_s11 = sadd.s32 (!%p329_p3), 4294967295, %s3739_s10  ;;  %v3658_v3 = vmov (!%p329_p3), 1983009808   ;;  %v3764_v6 = vld [vmem:[%s4251_s3] ss:$0 sm:$0xff] (!%p329_p3) }
   0xb   : > { %3304 = vmatpush3.bf16.msra.mxu0 (!%p329_p3), %v3734_v0  ;;  %3305 = vmatprep.mubr.msk.bf16.mxu0 (!%p329_p3), %vm3657_vm0, %v3656_v1  ;;  %v620_v4 = vunpack.c.l.s4 (!%p329_p3), %v3658_v3  ;;  %p417_p7 = scmp.gt.s32.totalorder (!%p329_p3), %s3746_s11, 0  ;;  %p469_p8 = scmp.gt.s32.totalorder (!%p329_p3), %s3638_s24, 0  ;;  %v623_v7 = vshrl.u32 (!%p329_p3), %v622_v2, 7  ;;  %v3781_v9 = vld [vmem:[%s4252_s4] ss:$0 sm:$0xff] (!%p329_p3)  ;;  %vm556_vm1 = vcmask (!%p329_p3), 1040384  }
   0xc   : > { %3325 = vmatprep.subr.bf16.mxu0 (!%p329_p3), %v3656_v1  ;;  %3217 = vmatprep.mubr.msk.bf16.mxu1 (!%p329_p3), %vm3657_vm0, %v3656_v1  ;;  %p3064_p9 = scmp.lt.s32.totalorder (!%p329_p3), %s3746_s11, 15  ;;  %s433_s22 = sadd.s32 (!%p329_p3), 4, %s3739_s10  ;;  %vm1192_vm3 = vcmask (!%p329_p3), 130048   ;;  %vm2627_vm5 = vcmask (!%p329_p3), 122880  }
   0xd   : > { %3216 = vmatpush3.bf16.msra.mxu1 (!%p329_p3), %v3609_v5  ;;  %v621_v8 = vunpack.c.0.s8 (!%p329_p3), %v620_v4  ;;  %p3839_p10 = scmp.lt.s32.totalorder (!%p329_p3), %s433_s22, 15  ;;  %p462_p11 = scmp.lt.s32.totalorder (!%p329_p3), %s3638_s24, 3 }
   0xe   : > { %3237 = vmatprep.subr.bf16.mxu1 (!%p329_p3), %v3656_v1 }
   0xf   : > { %v3791_v19 = vsub.s32 (!%p329_p3), %v621_v8, %v623_v7 }
  0x10   : > { %s4272_s25 = smov (!%p405_p5, %s3642_s25), 1  ;;  %s4276_s22 = smov (!%p3839_p10, %s433_s22), 15 }
  0x11   : > { %s408_s12 = scalar_select %p407_p6, %s3739_s10, 15 }
  0x12   : > { %s3758_s15 = sshll.u32 %s4272_s25, 5  ;;  %s4278_s22 = smov (!%p3839_p10, %s4276_s22), 15 }
  0x13   : > { %s3059_s16 = sshll.u32 %s408_s12, 1  ;;  %s3076_s10 = sshll.u32 %s4278_s22, 1 }
  0x14   : > { %s3767_s19 = sadd.s32 %s3758_s15, %s3059_s16  ;;  %s442_s8 = sadd.s32 %s3076_s10, %s3758_s15 }
  0x15   : > { %s3061_s20 = sshll.u32 %s3767_s19, 3  ;;  %s4280_s24 = smov (!%p462_p11, %s3638_s24), 3 }
  0x16   : > { %s413_s23 = scalar_lea.vmem %s4248_s0, %s3061_s20  ;;  %s4146_s17 = scalar_lea.vmem %s4254_s6, %s3061_s20 }
  0x17   : > { %s418_s12 = scalar_select %p417_p7, %s3746_s11, 0  ;;  %v471_v10 = vld [vmem:[%s413_s23] sm:$0xff]  ;;  %v472_v11 = vld [vmem:[%s413_s23 + $0x8] sm:$0xff]  ;;  %v473_v12 = vld [vmem:[%s413_s23 + $0x10] sm:$0xff] }
  0x18   : > { %v491_v13 = vmul.f32 %v3764_v6, %v471_v10  ;;  %v492_v14 = vmul.f32 %v3764_v6, %v472_v11  ;;  %v493_v15 = vmul.f32 %v3764_v6, %v473_v12  ;;  %s533_s13 = scalar_select %p469_p8, 1, 0  ;;  %v474_v16 = vld [vmem:[%s413_s23 + $0x18] sm:$0xff]  ;;  %v475_v17 = vld [vmem:[%s413_s23 + $0x20] sm:$0xff]  ;;  %v476_v18 = vld [vmem:[%s413_s23 + $0x28] sm:$0xff] }
  0x19   : > { %s4274_s12 = smov (!%p3064_p9, %s418_s12), 15  ;;  %v494_v20 = vmul.f32 %v3764_v6, %v474_v16  ;;  %v495_v21 = vmul.f32 %v3764_v6, %v475_v17  ;;  %v496_v22 = vmul.f32 %v3764_v6, %v476_v18  ;;  %v477_v23 = vld [vmem:[%s413_s23 + $0x30] sm:$0xff]  ;;  %v478_v28 = vld [vmem:[%s413_s23 + $0x38] sm:$0xff]  ;;  %s3083_s19 = sshll.u32 %s4272_s25, 2 }
  0x1a   : > { %v505_v24 = vadd.f32 %v3781_v9, %v491_v13  ;;  %v506_v25 = vadd.f32 %v3781_v9, %v492_v14  ;;  %v507_v26 = vadd.f32 %v3781_v9, %v493_v15  ;;  %v534_v27 = vstv %s533_s13  ;;  %s3069_s11 = sshll.u32 %s4274_s12, 1  ;;  %s465_s20 = sadd.s32 %s3083_s19, %s4280_s24 }
  0x1b   : > { %vm3799_vm2 = vcmp.eq.s32.totalorder %v534_v27, 1  ;;  %v508_v30 = vadd.f32 %v3781_v9, %v494_v20  ;;  %v509_v31 = vadd.f32 %v3781_v9, %v495_v21  ;;  %v510_v32 = vadd.f32 %v3781_v9, %v496_v22  ;;  %s425_s14 = sadd.s32 %s3069_s11, %s3758_s15  ;;  %s3078_s15 = sshll.u32 %s442_s8, 3 }
  0x1c   : > { %v513_v33 = vmax.f32 %v505_v24, 0.0  ;;  %v514_v34 = vmax.f32 %v506_v25, 0.0  ;;  %v515_v35 = vmax.f32 %v507_v26, 0.0  ;;  %v497_v36 = vmul.f32 %v3764_v6, %v477_v23  ;;  %s3071_s16 = sshll.u32 %s425_s14, 3  ;;  %s444_s14 = scalar_lea.vmem %s4250_s2, %s3078_s15 }
  0x1d   : > { %v516_v37 = vmax.f32 %v508_v30, 0.0  ;;  %v517_v38 = vmax.f32 %v509_v31, 0.0  ;;  %v518_v39 = vmax.f32 %v510_v32, 0.0  ;;  %v498_v40 = vmul.f32 %v3764_v6, %v478_v28  ;;  %s427_s21 = scalar_lea.vmem %s4249_s1, %s3071_s16  ;;  %s3084_s18 = sshll.u32 %s465_s20, 1 }
  0x1e   : > { %v560_v41 = vrot.slane %v513_v33, 7  ;;  %v561_v42 = vrot.slane %v514_v34, 7  ;;  %v563_v43 = vrot.slane %v515_v35, 7  ;;  %v3813_v44 = vadd.f32 %v3781_v9, %v497_v36  ;;  %v480_v45 = vld [vmem:[%s427_s21 + $0x8] sm:$0xff]  ;;  %v479_v54 = vld [vmem:[%s427_s21] sm:$0xff]  ;;  %s467_s23 = scalar_lea.vmem %s4255_s7, %s3084_s18 }
  0x1f   : > { %v564_v46 = vrot.slane %v516_v37, 7  ;;  %v3815_v47 = vrot.slane %v517_v38, 7  ;;  %v3817_v48 = vrot.slane %v518_v39, 7  ;;  %v3820_v49 = vadd.f32 %v3781_v9, %v498_v40  ;;  %s3924_s16 = scalar_select %p462_p11, 1, 0 }
  0x20   : > { %v522_v50 = vmul.f32 %v3764_v6, %v480_v45  ;;  %v562_v51 = vsel %vm556_vm1, %v560_v41, %v561_v42  ;;  %v591_v52 = vsel %vm556_vm1, 0.0, %v560_v41  ;;  %v592_v53 = vsel %vm556_vm1, 0.0, %v563_v43 }
  0x21   : > { %v598_v55 = vsel %vm556_vm1, %v561_v42, 0.0  ;;  %v659_v56 = vcombine.high %v591_v52, %v591_v52  ;;  %v666_v57 = vrot.slane %v591_v52, %v3791_v19  ;;  %v676_v58 = vcombine.high %v562_v51, %v562_v51 }
  0x22   : > { %v524_v59 = vadd.f32 %v3781_v9, %v522_v50  ;;  %v683_v60 = vrot.slane %v562_v51, %v3791_v19  ;;  %v699_v61 = vrot.slane %v598_v55, %v3791_v19  ;;  %v707_v62 = vrot.slane %v592_v53, %v3791_v19 }
  0x23   : > { %v673_v63 = vrot.slane %v659_v56, %v3791_v19  ;;  %v674_v2 = vcombine.high %v666_v57, %v666_v57  ;;  %v690_v3 = vrot.slane %v676_v58, %v3791_v19  ;;  %v521_v4 = vmul.f32 %v3764_v6, %v479_v54 }
  0x24   : > { %v526_v5 = vmax.f32 %v524_v59, 0.0  ;;  %v691_v7 = vcombine.high %v683_v60, %v683_v60  ;;  %v715_v8 = vcombine.high %v707_v62, %v707_v62  ;;  %v565_v10 = vsel %vm556_vm1, %v563_v43, %v564_v46 }
  0x25   : > { %v675_v11 = vcombine.high %v673_v63, %v673_v63  ;;  %v692_v12 = vcombine.high %v690_v3, %v690_v3  ;;  %v940_v13 = vcombine.low %v674_v2, %v673_v63  ;;  %v523_v14 = vadd.f32 %v3781_v9, %v521_v4 }
  0x26   : > { %v537_v15 = vsel %vm3799_vm2, %v526_v5, 0.0  ;;  %v957_v16 = vcombine.low %v691_v7, %v690_v3  ;;  %v974_v17 = vcombine.low %v707_v62, %v715_v8  ;;  %v3848_v18 = vsel %vm556_vm1, 0.0, %v3815_v47 }
  0x27   : > { %v558_v20 = vrot.slane %v537_v15, 7  ;;  %v954_v21 = vrot.slane %v940_v13, %v3791_v19  ;;  %v956_v22 = vcombine.low %v675_v11, %v683_v60  ;;  %v973_v23 = vcombine.low %v692_v12, %v699_v61 }
  0x28   : > { %v971_v24 = vrot.slane %v957_v16, %v3791_v19  ;;  %v988_v25 = vrot.slane %v974_v17, %v3791_v19  ;;  %v525_v26 = vmax.f32 %v523_v14, 0.0  ;;  %v599_v27 = vsel %vm556_vm1, %v564_v46, 0.0 }
  0x29   : > { %v597_v28 = vsel %vm556_vm1, %v558_v20, 0.0  ;;  %v964_v30 = vrot.slane %v956_v22, %v3791_v19  ;;  %v981_v31 = vrot.slane %v973_v23, %v3791_v19  ;;  %v700_v32 = vcombine.high %v592_v53, %v592_v53 }
  0x2a   : > { %v658_v33 = vrot.slane %v597_v28, %v3791_v19  ;;  %v536_v34 = vsel %vm3799_vm2, %v525_v26, 0.0  ;;  %v717_v35 = vcombine.high %v565_v10, %v565_v10  ;;  %v724_v36 = vrot.slane %v565_v10, %v3791_v19 }
  0x2b   : > { %v972_v37 = vcombine.low %v964_v30, %v971_v24  ;;  %v989_v38 = vcombine.low %v981_v31, %v988_v25  ;;  %v557_v39 = vrot.slane %v536_v34, 7  ;;  %v714_v40 = vrot.slane %v700_v32, %v3791_v19 }
  0x2c   : > { %v939_v41 = vcombine.low %v658_v33, %v666_v57  ;;  %v731_v42 = vrot.slane %v717_v35, %v3791_v19  ;;  %v732_v43 = vcombine.high %v724_v36, %v724_v36  ;;  %v740_v45 = vrot.slane %v599_v27, %v3791_v19 }
  0x2d   : > { %1196 = vst.msk [vmem:[#allocation2 + $0x18] sm:$0xff] %vm1192_vm3, %v972_v37  ;;  %1197 = vst.msk [vmem:[#allocation2 + $0x20] sm:$0xff] %vm1192_vm3, %v989_v38  ;;  %v559_v29 = vsel %vm556_vm1, %v557_v39, %v558_v20  ;;  %v590_v46 = vsel %vm556_vm1, 0.0, %v557_v39  ;;  %v716_v50 = vcombine.high %v714_v40, %v714_v40  ;;  %v748_v51 = vrot.slane %v3848_v18, %v3791_v19  ;;  %v3608_v38 = vld [vmem:[%s4253_s5 + $0x28] sm:$0xff]  }
  0x2e   : > { %v947_v52 = vrot.slane %v939_v41, %v3791_v19  ;;  %v618_v53 = vcombine.high %v590_v46, %v590_v46  ;;  %v625_v54 = vrot.slane %v590_v46, %v3791_v19  ;;  %v635_v55 = vcombine.high %v559_v29, %v559_v29 }
  0x2f   : > { %v642_v56 = vrot.slane %v559_v29, %v3791_v19  ;;  %v733_v57 = vcombine.high %v731_v42, %v731_v42  ;;  %v990_v58 = vcombine.low %v714_v40, %v716_v50  ;;  %v991_v59 = vcombine.low %v724_v36, %v732_v43 }
  0x30   : > { %v955_v60 = vcombine.low %v947_v52, %v954_v21  ;;  %v632_v61 = vrot.slane %v618_v53, %v3791_v19  ;;  %v633_v62 = vcombine.high %v625_v54, %v625_v54  ;;  %v649_v63 = vrot.slane %v635_v55, %v3791_v19 }
  0x31   : > { %v650_v2 = vcombine.high %v642_v56, %v642_v56  ;;  %v998_v3 = vrot.slane %v990_v58, %v3791_v19  ;;  %v1005_v4 = vrot.slane %v991_v59, %v3791_v19  ;;  %v1007_v5 = vcombine.low %v731_v42, %v733_v57 }
  0x32   : > { %1195 = vst.msk [vmem:[#allocation2 + $0x10] sm:$0xff] %vm1192_vm3, %v955_v60  ;;  %v634_v7 = vcombine.high %v632_v61, %v632_v61  ;;  %v651_v8 = vcombine.high %v649_v63, %v649_v63  ;;  %v905_v10 = vcombine.low %v625_v54, %v633_v62  ;;  %v1008_v11 = vcombine.low %v740_v45, %v748_v51  ;;  %v481_v54 = vld [vmem:[%s444_s14] sm:$0xff] }
  0x33   : > { %v922_v12 = vcombine.low %v642_v56, %v650_v2  ;;  %v1006_v13 = vcombine.low %v998_v3, %v1005_v4  ;;  %v1015_v14 = vrot.slane %v1007_v5, %v3791_v19  ;;  %v568_v15 = vsel %vm556_vm1, %v3815_v47, %v3817_v48  ;;  %v482_v4 = vld [vmem:[%s444_s14 + $0x8] sm:$0xff] }
  0x34   : > { %v906_v16 = vcombine.low %v632_v61, %v634_v7  ;;  %v913_v17 = vrot.slane %v905_v10, %v3791_v19  ;;  %v923_v20 = vcombine.low %v649_v63, %v651_v8  ;;  %v1022_v21 = vrot.slane %v1008_v11, %v3791_v19  ;;  %v1668_v30 = vld [vmem:[#allocation2 + $0x1b] sm:$0xff] }
  0x35   : > { %v930_v22 = vrot.slane %v922_v12, %v3791_v19  ;;  %1198 = vst.msk [vmem:[#allocation2 + $0x28] sm:$0xff] %vm1192_vm3, %v1006_v13  ;;  %v600_v23 = vsel %vm556_vm1, %v3817_v48, 0.0  ;;  %v741_v24 = vcombine.high %v3848_v18, %v3848_v18  ;;  %v756_v25 = vcombine.high %v748_v51, %v748_v51  ;;  %v3610_v13 = vld [vmem:[%s4253_s5] sm:$0xff]  }
  0x36   : > { %v920_v47 = vrot.slane %v906_v16, %v3791_v19  ;;  %v937_v26 = vrot.slane %v923_v20, %v3791_v19  ;;  %v1023_v27 = vcombine.low %v1015_v14, %v1022_v21  ;;  %v758_v28 = vcombine.high %v568_v15, %v568_v15 }
  0x37   : > { %v755_v31 = vrot.slane %v741_v24, %v3791_v19  ;;  %v765_v32 = vrot.slane %v568_v15, %v3791_v19  ;;  %v781_v33 = vrot.slane %v600_v23, %v3791_v19  ;;  %v519_v48 = vmax.f32 %v3813_v44, 0.0 }
  0x38   : > { %v921_v34 = vcombine.low %v913_v17, %v920_v47  ;;  %v938_v18 = vcombine.low %v930_v22, %v937_v26  ;;  %1199 = vst.msk [vmem:[#allocation2 + $0x30] sm:$0xff] %vm1192_vm3, %v1023_v27  ;;  %v772_v35 = vrot.slane %v758_v28, %v3791_v19  ;;  %v520_v36 = vmax.f32 %v3820_v49, 0.0  ;;  %v1229_v26 = vld [vmem:[#allocation2 + $0x19] sm:$0xff] }
  0x39   : > { %v1667_v37 = vld [vmem:[#allocation2 + $0x13] sm:$0xff]  ;;  %v757_v39 = vcombine.high %v755_v31, %v755_v31  ;;  %v773_v40 = vcombine.high %v765_v32, %v765_v32  ;;  %v1024_v41 = vcombine.low %v756_v25, %v755_v31  ;;  %v569_v42 = vrot.slane %v519_v48, 7 }
  0x3a   : > { %v1676_v44 = vpack.c.bf16 %v1668_v30, %v1667_v37  ;;  %1193 = vst.msk [vmem:[#allocation2] sm:$0xff] %vm1192_vm3, %v921_v34  ;;  %1194 = vst.msk [vmem:[#allocation2 + $0x8] sm:$0xff] %vm1192_vm3, %v938_v18  ;;  %v774_v49 = vcombine.high %v772_v35, %v772_v35  ;;  %v570_v53 = vrot.slane %v520_v36, 7  ;;  %v527_v5 = vmul.f32 %v3764_v6, %v481_v54  ;;  %v1228_v31 = vld [vmem:[#allocation2 + $0x11] sm:$0xff] }
  0x3b   : > { %v1025_v43 = vcombine.low %v757_v39, %v765_v32  ;;  %v1032_v45 = vrot.slane %v1024_v41, %v3791_v19  ;;  %v1041_v29 = vcombine.low %v773_v40, %v772_v35  ;;  %v594_v46 = vsel %vm556_vm1, 0.0, %v569_v42  ;;  %v1786_v32 = vld [vmem:[#allocation2 + $0x14] sm:$0xff] }
  0x3c   : > { %3306 = vmatmul.mubr.msk.bf16.vlgmr.msra.gmra.mrb[0].mxu0 %vm1192_vm3, %v1676_v44  ;;  %v1042_v50 = vcombine.low %v774_v49, %v781_v33  ;;  %v782_v51 = vcombine.high %v594_v46, %v594_v46  ;;  %v789_v52 = vrot.slane %v594_v46, %v3791_v19  ;;  %v1669_v55 = vld [vmem:[#allocation2 + $0x23] sm:$0xff]  ;;  %v571_v61 = vsel %vm556_vm1, %v569_v42, %v570_v53 }
  0x3d   : > { %3326 = vmatpush3.bf16.msra.mxu0 %v3608_v38  ;;  %3309 = vmatprep.mubr.msk.bf16.mxu0 %vm3657_vm0, %v3656_v1  ;;  %v1039_v56 = vrot.slane %v1025_v43, %v3791_v19  ;;  %v1049_v57 = vrot.slane %v1041_v29, %v3791_v19  ;;  %v799_v2 = vcombine.high %v571_v61, %v571_v61  ;;  %v539_v10 = vstv %s3924_s16  ;;  %v1787_v33 = vld [vmem:[#allocation2 + $0x1c] sm:$0xff] }
  0x3e   : > { %v1056_v58 = vrot.slane %v1042_v50, %v3791_v19  ;;  %3347 = vmatprep.subr.bf16.mxu0 %v3656_v1  ;;  %v796_v59 = vrot.slane %v782_v51, %v3791_v19  ;;  %v797_v60 = vcombine.high %v789_v52, %v789_v52  ;;  %v806_v3 = vrot.slane %v571_v61, %v3791_v19  ;;  %v1230_v37 = vld [vmem:[#allocation2 + $0x21] sm:$0xff] }
  0x3f   : > { %v1670_v62 = vld [vmem:[#allocation2 + $0x2b] sm:$0xff]  ;;  %v1040_v63 = vcombine.low %v1032_v45, %v1039_v56  ;;  %v813_v16 = vrot.slane %v799_v2, %v3791_v19  ;;  %v528_v21 = vmul.f32 %v3764_v6, %v482_v4  ;;  %v529_v22 = vadd.f32 %v3781_v9, %v527_v5 }
  0x40   : > { %v1677_v7 = vpack.c.bf16 %v1670_v62, %v1669_v55  ;;  %v1057_v8 = vcombine.low %v1049_v57, %v1056_v58  ;;  %v798_v14 = vcombine.high %v796_v59, %v796_v59  ;;  %v1058_v15 = vcombine.low %v789_v52, %v797_v60  ;;  %v1231_v38 = vld [vmem:[#allocation2 + $0x29] sm:$0xff] }
  0x41   : > { %v1226_v11 = vld [vmem:[#allocation2 + $0x1] sm:$0xff]  ;;  %v1227_v12 = vld [vmem:[#allocation2 + $0x9] sm:$0xff]  ;;  %1200 = vst.msk [vmem:[#allocation2 + $0x38] sm:$0xff] %vm1192_vm3, %v1040_v63  ;;  %v814_v17 = vcombine.high %v806_v3, %v806_v3  ;;  %v815_v25 = vcombine.high %v813_v16, %v813_v16  ;;  %vm3946_vm4 = vcmp.eq.s32.totalorder %v539_v10, 1  ;;  %v530_v28 = vadd.f32 %v3781_v9, %v528_v21 }
  0x42   : > { %v1235_v20 = vpack.c.bf16 %v1227_v12, %v1226_v11  ;;  %1201 = vst.msk [vmem:[#allocation2 + $0x40] sm:$0xff] %vm1192_vm3, %v1057_v8  ;;  %v1059_v23 = vcombine.low %v796_v59, %v798_v14  ;;  %v1066_v24 = vrot.slane %v1058_v15, %v3791_v19  ;;  %v531_v30 = vmax.f32 %v529_v22, 0.0  ;;  %v3611_v15 = vld [vmem:[%s4253_s5 + $0x30] sm:$0xff]  }
  0x43   : > { %v1075_v27 = vcombine.low %v806_v3, %v814_v17  ;;  %v575_v6 = vrot.slane %v3656_v1, 7  ;;  %v1076_v34 = vcombine.low %v813_v16, %v815_v25  ;;  %v532_v18 = vmax.f32 %v530_v28, 0.0  ;;  %v1789_v28 = vld [vmem:[#allocation2 + $0x2c] sm:$0xff] }
  0x44   : > { %3218 = vmatmul.mubr.msk.bf16.vlgmr.msra.gmra.mrb[0].mxu1 %vm1192_vm3, %v1235_v20  ;;  %3310 = vmatmul.mubr.msk.bf16.gmra.mrb[4].mxu0 %vm1192_vm3, %v1677_v7  ;;  %v1073_v48 = vrot.slane %v1059_v23, %v3791_v19  ;;  %v541_v35 = vsel %vm3946_vm4, %v531_v30, 0.0  ;;  %v601_v36 = vsel %vm556_vm1, %v570_v53, 0.0  ;;  %v1236_v42 = vpack.c.bf16 %v1229_v26, %v1228_v31 }
  0x45   : > { %3238 = vmatpush3.bf16.msra.mxu1 %v3610_v13  ;;  %3221 = vmatprep.mubr.msk.bf16.mxu1 %vm3657_vm0, %v3656_v1  ;;  %v1083_v9 = vrot.slane %v1075_v27, %v3791_v19  ;;  %v1090_v40 = vrot.slane %v1076_v34, %v3791_v19  ;;  %v572_v41 = vrot.slane %v541_v35, 7  ;;  %v1795_v49 = vpack.c.bf16 %v1787_v33, %v1786_v32  ;;  %v1210_v35 = vld [vmem:[#allocation2] sm:$0xff] }
  0x46   : > { %3313 = vmatprep.mubr.msk.bf16.mxu0 %vm3657_vm0, %v3656_v1  ;;  %3259 = vmatprep.subr.bf16.mxu1 %v3656_v1  ;;  %v1074_v39 = vcombine.low %v1066_v24, %v1073_v48  ;;  %v542_v43 = vsel %vm3946_vm4, %v532_v18, 0.0  ;;  %v596_v45 = vsel %vm556_vm1, 0.0, %v575_v6  ;;  %v822_v52 = vrot.slane %v601_v36, %v3791_v19  ;;  %v1788_v24 = vld [vmem:[#allocation2 + $0x24] sm:$0xff] }
  0x47   : > { %v1091_v46 = vcombine.low %v1083_v9, %v1090_v40  ;;  %v573_v50 = vrot.slane %v542_v43, 7  ;;  %v595_v51 = vsel %vm556_vm1, 0.0, %v572_v41  ;;  %v1237_v54 = vpack.c.bf16 %v1231_v38, %v1230_v37  ;;  %v1211_v36 = vld [vmem:[#allocation2 + $0x8] sm:$0xff] }
  0x48   : > { %v1671_v44 = vld [vmem:[#allocation2 + $0x33] sm:$0xff]  ;;  %1202 = vst.msk [vmem:[#allocation2 + $0x48] sm:$0xff] %vm1192_vm3, %v1074_v39  ;;  %v823_v55 = vcombine.high %v595_v51, %v595_v51  ;;  %v830_v56 = vrot.slane %v595_v51, %v3791_v19  ;;  %v871_v58 = vrot.slane %v596_v45, %v3791_v19  ;;  %v1796_v32 = vpack.c.bf16 %v1789_v28, %v1788_v24 }
  0x49   : > { %v1672_v29 = vld [vmem:[#allocation2 + $0x3b] sm:$0xff]  ;;  %1203 = vst.msk [vmem:[#allocation2 + $0x50] sm:$0xff] %vm1192_vm3, %v1091_v46  ;;  %v574_v57 = vsel %vm556_vm1, %v572_v41, %v573_v50  ;;  %v602_v62 = vsel %vm556_vm1, %v573_v50, 0.0  ;;  %v1232_v26 = vld [vmem:[#allocation2 + $0x31] sm:$0xff]  ;;  %v1219_v39 = vpack.c.bf16 %v1211_v36, %v1210_v35  ;;  %v1215_v46 = vld [vmem:[#allocation2 + $0x28] sm:$0xff] }
  0x4a   : > { %v1678_v53 = vpack.c.bf16 %v1672_v29, %v1671_v44  ;;  %v837_v59 = vrot.slane %v823_v55, %v3791_v19  ;;  %v840_v60 = vcombine.high %v574_v57, %v574_v57  ;;  %v847_v61 = vrot.slane %v574_v57, %v3791_v19  ;;  %v1233_v27 = vld [vmem:[#allocation2 + $0x39] sm:$0xff]  ;;  %v3612_v41 = vld [vmem:[%s4253_s5 + $0x10] sm:$0xff]   ;;  %v1429_v57 = vld [vmem:[#allocation2 + $0x2] sm:$0xff] }
  0x4b   : > { %v838_v63 = vcombine.high %v830_v56, %v830_v56  ;;  %v1092_v2 = vcombine.low %v822_v52, %v830_v56  ;;  %v863_v3 = vrot.slane %v602_v62, %v3791_v19  ;;  %v879_v11 = vcombine.high %v871_v58, %v871_v58  ;;  %v1790_v48 = vld [vmem:[#allocation2 + $0x34] sm:$0xff]  ;;  %v1791_v34 = vld [vmem:[#allocation2 + $0x3c] sm:$0xff] }
  0x4c   : > { %3222 = vmatmul.mubr.msk.bf16.gmra.mrb[4].mxu1 %vm1192_vm3, %v1236_v42  ;;  %3314 = vmatmul.mubr.msk.bf16.gmra.mrb[8].mxu0 %vm1192_vm3, %v1678_v53  ;;  %v839_v4 = vcombine.high %v837_v59, %v837_v59  ;;  %v854_v5 = vrot.slane %v840_v60, %v3791_v19  ;;  %v855_v7 = vcombine.high %v847_v61, %v847_v61  ;;  %v1212_v42 = vld [vmem:[#allocation2 + $0x10] sm:$0xff]  ;;  %v1213_v44 = vld [vmem:[#allocation2 + $0x18] sm:$0xff]  ;;  %v1214_v29 = vld [vmem:[#allocation2 + $0x20] sm:$0xff] }
  0x4d   : > { %3225 = vmatprep.mubr.msk.bf16.mxu1 %vm3657_vm0, %v3656_v1  ;;  %3327 = vmatprep.mubr.msk.bf16.mxu0 %vm3657_vm0, %v3656_v1  ;;  %v1093_v8 = vcombine.low %v838_v63, %v837_v59  ;;  %v1100_v10 = vrot.slane %v1092_v2, %v3791_v19  ;;  %v1127_v23 = vcombine.low %v871_v58, %v879_v11  ;;  %v3613_v51 = vld [vmem:[%s4253_s5 + $0x38] sm:$0xff]   ;;  %v1216_v52 = vld [vmem:[#allocation2 + $0x30] sm:$0xff]  ;;  %v1218_v55 = vld [vmem:[#allocation2 + $0x40] sm:$0xff] }
  0x4e   : > { %v1109_v12 = vcombine.low %v839_v4, %v847_v61  ;;  %v1110_v13 = vcombine.low %v855_v7, %v854_v5  ;;  %v856_v14 = vcombine.high %v854_v5, %v854_v5  ;;  %v1238_v31 = vpack.c.bf16 %v1233_v27, %v1232_v26  ;;  %v1217_v53 = vld [vmem:[#allocation2 + $0x38] sm:$0xff]  ;;  %v1430_v58 = vld [vmem:[#allocation2 + $0xa] sm:$0xff]  ;;  %v1433_v7 = vld [vmem:[#allocation2 + $0x22] sm:$0xff] }
  0x4f   : > { %v1107_v16 = vrot.slane %v1093_v8, %v3791_v19  ;;  %v1141_v30 = vrot.slane %v1127_v23, %v3791_v19  ;;  %v1234_v33 = vld [vmem:[#allocation2 + $0x41] sm:$0xff]  ;;  %v1797_v18 = vpack.c.bf16 %v1791_v34, %v1790_v48  ;;  %v1220_v43 = vpack.c.bf16 %v1213_v44, %v1212_v42  ;;  %v3614_v62 = vld [vmem:[%s4253_s5 + $0x18] sm:$0xff]   ;;  %v1434_v8 = vld [vmem:[#allocation2 + $0x2a] sm:$0xff] }
  0x50   : > { %v1117_v17 = vrot.slane %v1109_v12, %v3791_v19  ;;  %v1124_v20 = vrot.slane %v1110_v13, %v3791_v19  ;;  %v1126_v21 = vcombine.low %v856_v14, %v863_v3  ;;  %v1239_v9 = vpack.c.bf16 %v1234_v33, %v1234_v33  ;;  %v1792_v37 = vld [vmem:[#allocation2 + $0x44] sm:$0xff]  ;;  %v1793_v38 = vld [vmem:[#allocation2 + $0x4c] sm:$0xff]  ;;  %v1432_v2 = vld [vmem:[#allocation2 + $0x1a] sm:$0xff] }
  0x51   : > { %v1108_v22 = vcombine.low %v1100_v10, %v1107_v16  ;;  %v1798_v40 = vpack.c.bf16 %v1793_v38, %v1792_v37  ;;  %v1221_v50 = vpack.c.bf16 %v1215_v46, %v1214_v29  ;;  %v1223_v56 = vpack.c.bf16 %v1218_v55, %v1218_v55  ;;  %v1431_v63 = vld [vmem:[#allocation2 + $0x12] sm:$0xff]  ;;  %v2024_v10 = vld [vmem:[#allocation2 + $0x25] sm:$0xff]  ;;  %v1436_v16 = vld [vmem:[#allocation2 + $0x3a] sm:$0xff] }
  0x52   : > { %v1125_v25 = vcombine.low %v1117_v17, %v1124_v20  ;;  %v1134_v47 = vrot.slane %v1126_v21, %v3791_v19  ;;  %v1438_v60 = vpack.c.bf16 %v1430_v58, %v1429_v57  ;;  %v1439_v4 = vpack.c.bf16 %v1432_v2, %v1431_v63  ;;  %v2025_v11 = vld [vmem:[#allocation2 + $0x2d] sm:$0xff]  ;;  %v3615_v14 = vld [vmem:[%s4253_s5 + $0x40] sm:$0xff]   ;;  %v2026_v17 = vld [vmem:[#allocation2 + $0x35] sm:$0xff] }
  0x53   : > { %1204 = vst.msk [vmem:[#allocation2 + $0x58] sm:$0xff] %vm1192_vm3, %v1108_v22  ;;  %v1440_v12 = vpack.c.bf16 %v1434_v8, %v1433_v7  ;;  %v2033_v13 = vpack.c.bf16 %v2025_v11, %v2024_v10  ;;  %v2027_v20 = vld [vmem:[#allocation2 + $0x3d] sm:$0xff]  ;;  %v2028_v24 = vld [vmem:[#allocation2 + $0x45] sm:$0xff]  ;;  %v2148_v38 = vld [vmem:[#allocation2 + $0x4e] sm:$0xff] }
  0x54   : > { %3226 = vmatmul.mubr.msk.bf16.gmra.mrb[8].mxu1 %vm1192_vm3, %v1237_v54  ;;  %3328 = vmatmul.mubr.msk.bf16.vlgmr.msra.gmra.mrb[0].mxu0 %vm1192_vm3, %v1795_v49  ;;  %1205 = vst.msk [vmem:[#allocation2 + $0x60] sm:$0xff] %vm1192_vm3, %v1125_v25  ;;  %v1142_v6 = vcombine.low %v1134_v47, %v1141_v30  ;;  %v1222_v54 = vpack.c.bf16 %v1217_v53, %v1216_v52  ;;  %v1437_v23 = vld [vmem:[#allocation2 + $0x42] sm:$0xff]  ;;  %v2029_v25 = vld [vmem:[#allocation2 + $0x4d] sm:$0xff]  ;;  %v2145_v34 = vld [vmem:[#allocation2 + $0x36] sm:$0xff] }
  0x55   : > { %3348 = vmatpush3.bf16.msra.mxu0 %v3611_v15  ;;  %3229 = vmatprep.mubr.msk.bf16.mxu1 %vm3657_vm0, %v3656_v1  ;;  %v1435_v15 = vld [vmem:[#allocation2 + $0x32] sm:$0xff]  ;;  %v2034_v22 = vpack.c.bf16 %v2027_v20, %v2026_v17  ;;  %v1442_v47 = vpack.c.bf16 %v1437_v23, %v1437_v23  ;;  %v2035_v26 = vpack.c.bf16 %v2029_v25, %v2028_v24  ;;  %v1555_v48 = vld [vmem:[#allocation2 + $0x4a] sm:$0xff] }
  0x56   : > { %3331 = vmatprep.mubr.msk.bf16.mxu0 %vm3657_vm0, %v3656_v1  ;;  %3369 = vmatprep.subr.bf16.mxu0 %v3656_v1  ;;  %1206 = vst.msk [vmem:[#allocation2 + $0x68] sm:$0xff] %vm1192_vm3, %v1142_v6  ;;  %v1441_v21 = vpack.c.bf16 %v1436_v16, %v1435_v15  ;;  %v2147_v37 = vld [vmem:[#allocation2 + $0x46] sm:$0xff] }
  0x57   : > { %v1674_v42 = vld [vmem:[#allocation2 + $0x4b] sm:$0xff] }
  0x5a   : > { %v1794_v49 = vld [vmem:[#allocation2 + $0x54] sm:$0xff] }
  0x5b   : > { %v1799_v45 = vpack.c.bf16 %v1794_v49, %v1794_v49  ;;  %v1912_v59 = vld [vmem:[#allocation2 + $0x5c] sm:$0xff]  ;;  %v1556_v36 = vld [vmem:[#allocation2 + $0x52] sm:$0xff] }
  0x5c   : > { %3230 = vmatmul.mubr.msk.bf16.gmra.mrb[12].mxu1 %vm1192_vm3, %v1238_v31  ;;  %3332 = vmatmul.mubr.msk.bf16.gmra.mrb[4].mxu0 %vm1192_vm3, %v1796_v32  ;;  %v1917_v61 = vpack.c.bf16 %v1912_v59, %v1794_v49  ;;  %v2030_v27 = vld [vmem:[#allocation2 + $0x55] sm:$0xff]  ;;  %v2031_v28 = vld [vmem:[#allocation2 + $0x5d] sm:$0xff] }
  0x5d   : > { %3233 = vmatprep.mubr.msk.bf16.mxu1 %vm3657_vm0, %v3656_v1  ;;  %3335 = vmatprep.mubr.msk.bf16.mxu0 %vm3657_vm0, %v3656_v1  ;;  %v1913_v3 = vld [vmem:[#allocation2 + $0x64] sm:$0xff]  ;;  %v2036_v30 = vpack.c.bf16 %v2031_v28, %v2030_v27  ;;  %v2149_v44 = vld [vmem:[#allocation2 + $0x56] sm:$0xff] }
  0x5e   : > { %v1918_v5 = vpack.c.bf16 %v1913_v3, %v1913_v3  ;;  %v2032_v6 = vld [vmem:[#allocation2 + $0x65] sm:$0xff]  ;;  %v1675_v29 = vld [vmem:[#allocation2 + $0x53] sm:$0xff] }
  0x5f   : > { %v2037_v31 = vpack.c.bf16 %v2032_v6, %v2032_v6  ;;  %v2150_v49 = vld [vmem:[#allocation2 + $0x5e] sm:$0xff]  ;;  %v2151_v46 = vld [vmem:[#allocation2 + $0x66] sm:$0xff] }
  0x64   : > { %3234 = vmatmul.mubr.msk.bf16.gmra.mrb[16].mxu1 %vm1192_vm3, %v1239_v9  ;;  %3336 = vmatmul.mubr.msk.bf16.gmra.mrb[8].mxu0 %vm1192_vm3, %v1797_v18  ;;  %v2146_v9 = vld [vmem:[#allocation2 + $0x3e] sm:$0xff] }
  0x65   : > { %3239 = vmatprep.mubr.msk.bf16.mxu1 %vm3657_vm0, %v3656_v1  ;;  %3339 = vmatprep.mubr.msk.bf16.mxu0 %vm3657_vm0, %v3656_v1  ;;  %v2153_v35 = vpack.c.bf16 %v2146_v9, %v2145_v34 }
  0x6c   : > { %3240 = vmatmul.mubr.msk.bf16.vlgmr.msra.gmra.mrb[0].mxu1 %vm1192_vm3, %v1219_v39  ;;  %3340 = vmatmul.mubr.msk.bf16.gmra.mrb[12].mxu0 %vm1192_vm3, %v1798_v40  ;;  %v1561_v39 = vpack.c.bf16 %v1556_v36, %v1556_v36 }
  0x6d   : > { %3260 = vmatpush3.bf16.msra.mxu1 %v3612_v41  ;;  %3243 = vmatprep.mubr.msk.bf16.mxu1 %vm3657_vm0, %v3656_v1  ;;  %v1673_v41 = vld [vmem:[#allocation2 + $0x43] sm:$0xff] }
  0x6e   : > { %3343 = vmatprep.mubr.msk.bf16.mxu0 %vm3657_vm0, %v3656_v1  ;;  %3281 = vmatprep.subr.bf16.mxu1 %v3656_v1 }
  0x74   : > { %3244 = vmatmul.mubr.msk.bf16.gmra.mrb[4].mxu1 %vm1192_vm3, %v1220_v43  ;;  %3344 = vmatmul.mubr.msk.bf16.gmra.mrb[16].mxu0 %vm1192_vm3, %v1799_v45  ;;  %v1679_v43 = vpack.c.bf16 %v1674_v42, %v1673_v41  ;;  %v2155_v45 = vpack.c.bf16 %v2150_v49, %v2149_v44 }
  0x75   : > { %3247 = vmatprep.mubr.msk.bf16.mxu1 %vm3657_vm0, %v3656_v1  ;;  %3349 = vmatprep.mubr.msk.bf16.mxu0 %vm3657_vm0, %v3656_v1 }
  0x7c   : > { %3248 = vmatmul.mubr.msk.bf16.gmra.mrb[8].mxu1 %vm1192_vm3, %v1221_v50  ;;  %3350 = vmatmul.mubr.msk.bf16.vlgmr.msra.gmra.mrb[0].mxu0 %vm1192_vm3, %v1796_v32  ;;  %v2143_v32 = vld [vmem:[#allocation2 + $0x26] sm:$0xff]  ;;  %v1680_v50 = vpack.c.bf16 %v1675_v29, %v1675_v29 }
  0x7d   : > { %3370 = vmatpush3.bf16.msra.mxu0 %v3613_v51  ;;  %3251 = vmatprep.mubr.msk.bf16.mxu1 %vm3657_vm0, %v3656_v1  ;;  %v2156_v51 = vpack.c.bf16 %v2151_v46, %v2151_v46 }
  0x7e   : > { %3353 = vmatprep.mubr.msk.bf16.mxu0 %vm3657_vm0, %v3656_v1  ;;  %3391 = vmatprep.subr.bf16.mxu0 %v3656_v1 }
  0x84   : > { %3252 = vmatmul.mubr.msk.bf16.gmra.mrb[12].mxu1 %vm1192_vm3, %v1222_v54  ;;  %3354 = vmatmul.mubr.msk.bf16.gmra.mrb[4].mxu0 %vm1192_vm3, %v1797_v18  ;;  %v1560_v18 = vpack.c.bf16 %v1555_v48, %v1437_v23 }
  0x85   : > { %3255 = vmatprep.mubr.msk.bf16.mxu1 %vm3657_vm0, %v3656_v1  ;;  %3357 = vmatprep.mubr.msk.bf16.mxu0 %vm3657_vm0, %v3656_v1 }
  0x8c   : > { %3256 = vmatmul.mubr.msk.bf16.gmra.mrb[16].mxu1 %vm1192_vm3, %v1223_v56  ;;  %3358 = vmatmul.mubr.msk.bf16.gmra.mrb[8].mxu0 %vm1192_vm3, %v1798_v40  ;;  %v2154_v40 = vpack.c.bf16 %v2148_v38, %v2147_v37 }
  0x8d   : > { %3261 = vmatprep.mubr.msk.bf16.mxu1 %vm3657_vm0, %v3656_v1  ;;  %3361 = vmatprep.mubr.msk.bf16.mxu0 %vm3657_vm0, %v3656_v1 }
  0x94   : > { %3262 = vmatmul.mubr.msk.bf16.vlgmr.msra.gmra.mrb[0].mxu1 %vm1192_vm3, %v1438_v60  ;;  %3362 = vmatmul.mubr.msk.bf16.gmra.mrb[12].mxu0 %vm1192_vm3, %v1917_v61 }
  0x95   : > { %3282 = vmatpush3.bf16.msra.mxu1 %v3614_v62  ;;  %3265 = vmatprep.mubr.msk.bf16.mxu1 %vm3657_vm0, %v3656_v1 }
  0x96   : > { %3365 = vmatprep.mubr.msk.bf16.mxu0 %vm3657_vm0, %v3656_v1  ;;  %3413 = vmatprep.subr.bf16.mxu1 %v3656_v1 }
  0x9c   : > { %3266 = vmatmul.mubr.msk.bf16.gmra.mrb[4].mxu1 %vm1192_vm3, %v1439_v4  ;;  %3366 = vmatmul.mubr.msk.bf16.gmra.mrb[16].mxu0 %vm1192_vm3, %v1918_v5 }
  0x9d   : > { %3269 = vmatprep.mubr.msk.bf16.mxu1 %vm3657_vm0, %v3656_v1  ;;  %3371 = vmatprep.mubr.msk.bf16.mxu0 %vm3657_vm0, %v3656_v1 }
  0xa4   : > { %3270 = vmatmul.mubr.msk.bf16.gmra.mrb[8].mxu1 %vm1192_vm3, %v1440_v12  ;;  %3372 = vmatmul.mubr.msk.bf16.vlgmr.msra.gmra.mrb[0].mxu0 %vm1192_vm3, %v2033_v13 }
  0xa5   : > { %3392 = vmatpush3.bf16.msra.mxu0 %v3615_v14  ;;  %3273 = vmatprep.mubr.msk.bf16.mxu1 %vm3657_vm0, %v3656_v1 }
  0xa6   : > { %3375 = vmatprep.mubr.msk.bf16.mxu0 %vm3657_vm0, %v3656_v1 }
  0xac   : > { %3274 = vmatmul.mubr.msk.bf16.gmra.mrb[12].mxu1 %vm1192_vm3, %v1441_v21  ;;  %3376 = vmatmul.mubr.msk.bf16.gmra.mrb[4].mxu0 %vm1192_vm3, %v2034_v22 }
  0xad   : > { %3277 = vmatprep.mubr.msk.bf16.mxu1 %vm3657_vm0, %v3656_v1  ;;  %3379 = vmatprep.mubr.msk.bf16.mxu0 %vm3657_vm0, %v3656_v1 }
  0xb4   : > { %3278 = vmatmul.mubr.msk.bf16.gmra.mrb[16].mxu1 %vm1192_vm3, %v1442_v47  ;;  %3380 = vmatmul.mubr.msk.bf16.gmra.mrb[8].mxu0 %vm1192_vm3, %v2035_v26 }
  0xb5   : > { %3283 = vmatprep.mubr.msk.bf16.mxu1 %vm3657_vm0, %v3656_v1  ;;  %3383 = vmatprep.mubr.msk.bf16.mxu0 %vm3657_vm0, %v3656_v1 }
  0xbc   : > { %3284 = vmatmul.mubr.msk.bf16.vlgmr.msra.gmra.mrb[0].mxu1 %vm1192_vm3, %v1439_v4  ;;  %3384 = vmatmul.mubr.msk.bf16.gmra.mrb[12].mxu0 %vm1192_vm3, %v2036_v30 }
  0xbd   : > { %3414 = vmatpush3.bf16.msra.mxu1 %v3734_v0  ;;  %3287 = vmatprep.mubr.msk.bf16.mxu1 %vm3657_vm0, %v3656_v1  ;;  %v2144_v0 = vld [vmem:[#allocation2 + $0x2e] sm:$0xff] }
  0xbe   : > { %3387 = vmatprep.mubr.msk.bf16.mxu0 %vm3657_vm0, %v3656_v1  ;;  %v2152_v33 = vpack.c.bf16 %v2144_v0, %v2143_v32 }
  0xc4   : > { %3288 = vmatmul.mubr.msk.bf16.gmra.mrb[4].mxu1 %vm1192_vm3, %v1440_v12  ;;  %3388 = vmatmul.mubr.msk.bf16.gmra.mrb[16].mxu0 %vm1192_vm3, %v2037_v31 }
  0xc5   : > { %3291 = vmatprep.mubr.msk.bf16.mxu1 %vm3657_vm0, %v3656_v1  ;;  %3393 = vmatprep.mubr.msk.bf16.mxu0 %vm3657_vm0, %v3656_v1 }
  0xcc   : > { %3292 = vmatmul.mubr.msk.bf16.gmra.mrb[8].mxu1 %vm1192_vm3, %v1441_v21  ;;  %3394 = vmatmul.mubr.msk.bf16.vlgmr.msra.gmra.mrb[0].mxu0 %vm1192_vm3, %v2152_v33 }
  0xcd   : > { %3295 = vmatprep.mubr.msk.bf16.mxu1 %vm3657_vm0, %v3656_v1  ;;  %3397 = vmatprep.mubr.msk.bf16.mxu0 %vm3657_vm0, %v3656_v1 }
  0xd4   : > { %3296 = vmatmul.mubr.msk.bf16.gmra.mrb[12].mxu1 %vm1192_vm3, %v1560_v18  ;;  %3398 = vmatmul.mubr.msk.bf16.gmra.mrb[4].mxu0 %vm1192_vm3, %v2153_v35 }
  0xd5   : > { %3299 = vmatprep.mubr.msk.bf16.mxu1 %vm3657_vm0, %v3656_v1  ;;  %3401 = vmatprep.mubr.msk.bf16.mxu0 %vm3657_vm0, %v3656_v1 }
  0xdc   : > { %3300 = vmatmul.mubr.msk.bf16.gmra.mrb[16].mxu1 %vm1192_vm3, %v1561_v39  ;;  %3402 = vmatmul.mubr.msk.bf16.gmra.mrb[8].mxu0 %vm1192_vm3, %v2154_v40 }
  0xdd   : > { %3317 = vmatprep.mubr.msk.bf16.mxu1 %vm3657_vm0, %v3656_v1  ;;  %3405 = vmatprep.mubr.msk.bf16.mxu0 %vm3657_vm0, %v3656_v1 }
  0xe4   : > { %3318 = vmatmul.mubr.msk.bf16.vlgmr.msra.gmra.mrb[12].mxu1 %vm1192_vm3, %v1679_v43  ;;  %3406 = vmatmul.mubr.msk.bf16.gmra.mrb[12].mxu0 %vm1192_vm3, %v2155_v45 }
  0xe5   : > { %3321 = vmatprep.mubr.msk.bf16.mxu1 %vm3657_vm0, %v3656_v1  ;;  %3409 = vmatprep.mubr.msk.bf16.mxu0 %vm3657_vm0, %v3656_v1 }
  0xec   : > { %3322 = vmatmul.mubr.msk.bf16.gmra.mrb[16].mxu1 %vm1192_vm3, %v1680_v50  ;;  %3410 = vmatmul.mubr.msk.bf16.gmra.mrb[16].mxu0 %vm1192_vm3, %v2156_v51 }
 0x18f   : > { %v1620_v52 = vpop.f32.mrb[0].mxu1 }
 0x190   : > { %v3285_v53 = vpop.f32.mrb[1].mxu1 }
 0x191   : > { %v1623_v54 = vpop.f32.mrb[2].mxu1 }
 0x192   : > { %v3286_v55 = vpop.f32.mrb[3].mxu1 }
 0x197   : > { %v1628_v56 = vpop.f32.mrb[4].mxu1 }
 0x198   : > { %v3289_v57 = vpop.f32.mrb[5].mxu1 }
 0x199   : > { %v1631_v58 = vpop.f32.mrb[6].mxu1 }
 0x19a   : > { %v3290_v59 = vpop.f32.mrb[7].mxu1 }
 0x19f   : > { %v4131_v60 = vpop.f32.mrb[8].mxu1  ;;  %v2215_v61 = vpop.f32.mrb[0].mxu0 }
 0x1a0   : > { %v3293_v62 = vpop.f32.mrb[9].mxu1  ;;  %v3415_v1 = vadd.f32 %v2215_v61, %v1620_v52  ;;  %v3395_v63 = vpop.f32.mrb[1].mxu0 }
 0x1a1   : > { %v4133_v2 = vpop.f32.mrb[10].mxu1  ;;  %v2218_v3 = vpop.f32.mrb[2].mxu0 }
 0x1a2   : > { %v3294_v4 = vpop.f32.mrb[11].mxu1  ;;  %v2271_v5 = vcombine.high %v3415_v1, %v3415_v1  ;;  %v2278_v7 = vrot.slane %v3415_v1, %v3791_v19  ;;  %v3416_v8 = vadd.f32 %v2218_v3, %v1623_v54  ;;  %v3396_v10 = vpop.f32.mrb[3].mxu0 }
 0x1a4   : > { %v2285_v11 = vrot.slane %v2271_v5, %v3791_v19  ;;  %v2286_v12 = vcombine.high %v2278_v7, %v2278_v7  ;;  %v2288_v13 = vcombine.high %v3416_v8, %v3416_v8  ;;  %v2295_v14 = vrot.slane %v3416_v8, %v3791_v19 }
 0x1a5   : > { %v2629_v17 = vmul.f32 %v2278_v7, %v2278_v7 }
 0x1a6   : > { %v2287_v15 = vcombine.high %v2285_v11, %v2285_v11  ;;  %v2454_v16 = vcombine.low %v2278_v7, %v2286_v12  ;;  %v2630_v20 = vmul.f32 %v2286_v12, %v2286_v12  ;;  %v2631_v21 = vmul.f32 %v2285_v11, %v2285_v11 }
 0x1a7   : > { %v2302_v22 = vrot.slane %v2288_v13, %v3791_v19  ;;  %v2303_v23 = vcombine.high %v2295_v14, %v2295_v14  ;;  %v2223_v24 = vpop.f32.mrb[4].mxu0  ;;  %v2633_v27 = vmul.f32 %v2295_v14, %v2295_v14 }
 0x1a8   : > { %v2455_v25 = vcombine.low %v2285_v11, %v2287_v15  ;;  %v2632_v47 = vmul.f32 %v2287_v15, %v2287_v15  ;;  %v2693_v26 = vcombine.low %v2629_v17, %v2630_v20  ;;  %v3399_v28 = vpop.f32.mrb[5].mxu0  ;;  %v2462_v30 = vrot.slane %v2454_v16, %v3791_v19 }
 0x1a9   : > { %v2304_v6 = vcombine.high %v2302_v22, %v2302_v22  ;;  %v2471_v31 = vcombine.low %v2295_v14, %v2303_v23  ;;  %v2634_v32 = vmul.f32 %v2303_v23, %v2303_v23  ;;  %v2226_v0 = vpop.f32.mrb[6].mxu0  ;;  %v2635_v34 = vmul.f32 %v2302_v22, %v2302_v22 }
 0x1aa   : > { %v2469_v33 = vrot.slane %v2455_v25, %v3791_v19  ;;  %v2694_v48 = vcombine.low %v2631_v21, %v2632_v47  ;;  %v3417_v9 = vadd.f32 %v2223_v24, %v1628_v56  ;;  %v3400_v18 = vpop.f32.mrb[7].mxu0  ;;  %v2701_v35 = vrot.slane %v2693_v26, %v3791_v19 }
 0x1ab   : > { %v2472_v36 = vcombine.low %v2302_v22, %v2304_v6  ;;  %v2636_v37 = vmul.f32 %v2304_v6, %v2304_v6  ;;  %v2710_v38 = vcombine.low %v2633_v27, %v2634_v32  ;;  %v2479_v44 = vrot.slane %v2471_v31, %v3791_v19 }
 0x1ac   : > { %v2470_v39 = vcombine.low %v2462_v30, %v2469_v33  ;;  %v2708_v40 = vrot.slane %v2694_v48, %v3791_v19  ;;  %v2305_v41 = vcombine.high %v3417_v9, %v3417_v9  ;;  %v2312_v42 = vrot.slane %v3417_v9, %v3791_v19 }
 0x1ad   : > { %v2486_v49 = vrot.slane %v2472_v36, %v3791_v19  ;;  %v2711_v43 = vcombine.low %v2635_v34, %v2636_v37  ;;  %v3418_v45 = vadd.f32 %v2226_v0, %v1631_v58  ;;  %v2718_v46 = vrot.slane %v2710_v38, %v3791_v19 }
 0x1ae   : > { %2598 = vst.msk [vmem:[%s4146_s17] sm:$0xff] %vm1192_vm3, %v2470_v39  ;;  %v2709_v29 = vcombine.low %v2701_v35, %v2708_v40  ;;  %v2319_v50 = vrot.slane %v2305_v41, %v3791_v19  ;;  %v2320_v51 = vcombine.high %v2312_v42, %v2312_v42  ;;  %v2606_v57 = vsel %vm1192_vm3, %v2470_v39, 0.0 }
 0x1af   : > { %v2487_v52 = vcombine.low %v2479_v44, %v2486_v49  ;;  %v2725_v53 = vrot.slane %v2711_v43, %v3791_v19  ;;  %v2322_v54 = vcombine.high %v3418_v45, %v3418_v45  ;;  %v2329_v55 = vrot.slane %v3418_v45, %v3791_v19  ;;  %v2231_v56 = vpop.f32.mrb[8].mxu0 }
 0x1b0   : > { %v2488_v59 = vcombine.low %v2320_v51, %v2319_v50  ;;  %v2637_v58 = vmul.f32 %v2320_v51, %v2320_v51  ;;  %v2638_v61 = vmul.f32 %v2319_v50, %v2319_v50  ;;  %v3403_v62 = vpop.f32.mrb[9].mxu0  ;;  %v2321_v3 = vcombine.high %v2319_v50, %v2319_v50 }
 0x1b1   : > { %2599 = vst.msk [vmem:[%s4146_s17 + $0x8] sm:$0xff] %vm1192_vm3, %v2487_v52  ;;  %v2607_v1 = vsel %vm1192_vm3, %v2487_v52, 0.0  ;;  %v2726_v63 = vcombine.low %v2718_v46, %v2725_v53  ;;  %v2336_v4 = vrot.slane %v2322_v54, %v3791_v19  ;;  %v2234_v5 = vpop.f32.mrb[10].mxu0  ;;  %v2837_v7 = vsel %vm1192_vm3, %v2709_v29, 0.0 }
 0x1b2   : > { %v2608_v8 = vadd.f32 %v2607_v1, %v2606_v57  ;;  %v2727_v10 = vcombine.low %v2637_v58, %v2638_v61  ;;  %v2337_v11 = vcombine.high %v2329_v55, %v2329_v55  ;;  %v3404_v12 = vpop.f32.mrb[11].mxu0  ;;  %v2489_v14 = vcombine.low %v2321_v3, %v2329_v55 }
 0x1b3   : > { %v2838_v13 = vsel %vm1192_vm3, %v2726_v63, 0.0  ;;  %v2639_v15 = vmul.f32 %v2321_v3, %v2321_v3  ;;  %v2640_v16 = vmul.f32 %v2329_v55, %v2329_v55  ;;  %v2496_v20 = vrot.slane %v2488_v59, %v3791_v19 }
 0x1b4   : > { %v2839_v17 = vadd.f32 %v2838_v13, %v2837_v7  ;;  %v2505_v21 = vcombine.low %v2337_v11, %v2336_v4  ;;  %v2641_v22 = vmul.f32 %v2337_v11, %v2337_v11  ;;  %v2503_v23 = vrot.slane %v2489_v14, %v3791_v19 }
 0x1b5   : > { %v2642_v24 = vmul.f32 %v2336_v4, %v2336_v4  ;;  %v2728_v25 = vcombine.low %v2639_v15, %v2640_v16  ;;  %v3419_v47 = vadd.f32 %v2231_v56, %v4131_v60  ;;  %v2735_v26 = vrot.slane %v2727_v10, %v3791_v19 }
 0x1b6   : > { %v2338_v27 = vcombine.high %v2336_v4, %v2336_v4  ;;  %v2513_v28 = vrot.slane %v2505_v21, %v3791_v19  ;;  %v3420_v30 = vadd.f32 %v2234_v5, %v4133_v2  ;;  %v2504_v6 = vcombine.low %v2496_v20, %v2503_v23 }
 0x1b7   : > { %v2742_v31 = vrot.slane %v2728_v25, %v3791_v19  ;;  %v2744_v32 = vcombine.low %v2641_v22, %v2642_v24  ;;  %v2339_v0 = vcombine.high %v3419_v47, %v3419_v47  ;;  %v1763_v33 = vpop.f32.mrb[12].mxu1  ;;  %v2239_v48 = vpop.f32.mrb[12].mxu0  ;;  %v2346_v34 = vrot.slane %v3419_v47, %v3791_v19 }
 0x1b8   : > { %v2643_v9 = vmul.f32 %v2338_v27, %v2338_v27  ;;  %v2355_v18 = vcombine.high %v3420_v30, %v3420_v30  ;;  %v2362_v60 = vrot.slane %v3420_v30, %v3791_v19  ;;  %v3319_v35 = vpop.f32.mrb[13].mxu1  ;;  %v3407_v36 = vpop.f32.mrb[13].mxu0  ;;  %2600 = vst.msk [vmem:[%s4146_s17 + $0x10] sm:$0xff] %vm1192_vm3, %v2504_v6  ;;  %v2609_v37 = vsel %vm1192_vm3, %v2504_v6, 0.0 }
 0x1b9   : > { %v2743_v2 = vcombine.low %v2735_v26, %v2742_v31  ;;  %v2353_v38 = vrot.slane %v2339_v0, %v3791_v19  ;;  %v2752_v39 = vrot.slane %v2744_v32, %v3791_v19  ;;  %v1766_v40 = vpop.f32.mrb[14].mxu1  ;;  %v2242_v41 = vpop.f32.mrb[14].mxu0  ;;  %v2506_v42 = vcombine.low %v2338_v27, %v2346_v34 }
 0x1ba   : > { %v2610_v44 = vadd.f32 %v2609_v37, %v2608_v8  ;;  %v2644_v49 = vmul.f32 %v2346_v34, %v2346_v34  ;;  %v2369_v43 = vrot.slane %v2355_v18, %v3791_v19  ;;  %v3320_v45 = vpop.f32.mrb[15].mxu1  ;;  %v3408_v29 = vpop.f32.mrb[15].mxu0  ;;  %v2370_v52 = vcombine.high %v2362_v60, %v2362_v60 }
 0x1bb   : > { %v2840_v46 = vsel %vm1192_vm3, %v2743_v2, 0.0  ;;  %v2354_v50 = vcombine.high %v2353_v38, %v2353_v38  ;;  %v2645_v51 = vmul.f32 %v2353_v38, %v2353_v38  ;;  %v2520_v53 = vrot.slane %v2506_v42, %v3791_v19 }
 0x1bc   : > { %v2745_v54 = vcombine.low %v2643_v9, %v2644_v49  ;;  %v2841_v55 = vadd.f32 %v2840_v46, %v2839_v17  ;;  %v2371_v56 = vcombine.high %v2369_v43, %v2369_v43  ;;  %v2523_v58 = vcombine.low %v2362_v60, %v2370_v52 }
 0x1bd   : > { %v2522_v57 = vcombine.low %v2353_v38, %v2354_v50  ;;  %v2646_v59 = vmul.f32 %v2354_v50, %v2354_v50  ;;  %v2647_v61 = vmul.f32 %v2362_v60, %v2362_v60  ;;  %v2521_v62 = vcombine.low %v2513_v28, %v2520_v53 }
 0x1be   : > { %v2759_v1 = vrot.slane %v2745_v54, %v3791_v19  ;;  %v2539_v63 = vcombine.low %v2369_v43, %v2371_v56  ;;  %v2648_v3 = vmul.f32 %v2370_v52, %v2370_v52  ;;  %v2537_v7 = vrot.slane %v2523_v58, %v3791_v19 }
 0x1bf   : > { %v2530_v4 = vrot.slane %v2522_v57, %v3791_v19  ;;  %v2761_v5 = vcombine.low %v2645_v51, %v2646_v59  ;;  %v2649_v8 = vmul.f32 %v2369_v43, %v2369_v43  ;;  %v1771_v10 = vpop.f32.mrb[16].mxu1  ;;  %v2247_v11 = vpop.f32.mrb[16].mxu0  ;;  %2601 = vst.msk [vmem:[%s4146_s17 + $0x18] sm:$0xff] %vm1192_vm3, %v2521_v62  ;;  %v2611_v12 = vsel %vm1192_vm3, %v2521_v62, 0.0 }
 0x1c0   : > { %v2760_v13 = vcombine.low %v2752_v39, %v2759_v1  ;;  %v2547_v14 = vrot.slane %v2539_v63, %v3791_v19  ;;  %v2650_v15 = vmul.f32 %v2371_v56, %v2371_v56  ;;  %v3323_v16 = vpop.f32.mrb[17].mxu1  ;;  %v3411_v17 = vpop.f32.mrb[17].mxu0  ;;  %v2612_v20 = vadd.f32 %v2611_v12, %v2610_v44 }
 0x1c1   : > { %v2769_v21 = vrot.slane %v2761_v5, %v3791_v19  ;;  %v2538_v22 = vcombine.low %v2530_v4, %v2537_v7  ;;  %v2762_v23 = vcombine.low %v2647_v61, %v2648_v3  ;;  %v1774_v24 = vpop.f32.mrb[18].mxu1  ;;  %v2250_v25 = vpop.f32.mrb[18].mxu0  ;;  %v3421_v27 = vadd.f32 %v2239_v48, %v1763_v33 }
 0x1c2   : > { %v2842_v47 = vsel %vm1192_vm3, %v2760_v13, 0.0  ;;  %v2778_v26 = vcombine.low %v2649_v8, %v2650_v15  ;;  %v3422_v28 = vadd.f32 %v2242_v41, %v1766_v40  ;;  %v3324_v30 = vpop.f32.mrb[19].mxu1  ;;  %v3412_v6 = vpop.f32.mrb[19].mxu0  ;;  %v3423_v34 = vadd.f32 %v2247_v11, %v1771_v10 }
 0x1c3   : > { %v2843_v31 = vadd.f32 %v2842_v47, %v2841_v55  ;;  %2602 = vst.msk [vmem:[%s4146_s17 + $0x20] sm:$0xff] %vm1192_vm3, %v2538_v22  ;;  %v2613_v32 = vsel %vm1192_vm3, %v2538_v22, 0.0  ;;  %v2776_v0 = vrot.slane %v2762_v23, %v3791_v19  ;;  %v2372_v60 = vcombine.high %v3421_v27, %v3421_v27 }
 0x1c4   : > { %v2614_v9 = vadd.f32 %v2613_v32, %v2612_v20  ;;  %v2786_v18 = vrot.slane %v2778_v26, %v3791_v19  ;;  %v2379_v35 = vrot.slane %v3421_v27, %v3791_v19  ;;  %v2389_v37 = vcombine.high %v3422_v28, %v3422_v28 }
 0x1c5   : > { %v2777_v36 = vcombine.low %v2769_v21, %v2776_v0  ;;  %v2396_v33 = vrot.slane %v3422_v28, %v3791_v19  ;;  %v2406_v48 = vcombine.high %v3423_v34, %v3423_v34  ;;  %v2386_v2 = vrot.slane %v2372_v60, %v3791_v19 }
 0x1c6   : > { %v2387_v38 = vcombine.high %v2379_v35, %v2379_v35  ;;  %v2651_v39 = vmul.f32 %v2379_v35, %v2379_v35  ;;  %v2413_v40 = vrot.slane %v3423_v34, %v3791_v19  ;;  %v2403_v42 = vrot.slane %v2389_v37, %v3791_v19 }
 0x1c7   : > { %v2844_v41 = vsel %vm1192_vm3, %v2777_v36, 0.0  ;;  %v2404_v44 = vcombine.high %v2396_v33, %v2396_v33  ;;  %v2654_v49 = vmul.f32 %v2396_v33, %v2396_v33  ;;  %v2388_v45 = vcombine.high %v2386_v2, %v2386_v2 }
 0x1c8   : > { %v2845_v43 = vadd.f32 %v2844_v41, %v2843_v31  ;;  %v2540_v29 = vcombine.low %v2379_v35, %v2387_v38  ;;  %v2652_v46 = vmul.f32 %v2387_v38, %v2387_v38  ;;  %v2656_v52 = vmul.f32 %v2403_v42, %v2403_v42 }
 0x1c9   : > { %v2557_v50 = vcombine.low %v2404_v44, %v2403_v42  ;;  %v2655_v51 = vmul.f32 %v2404_v44, %v2404_v44  ;;  %v2405_v53 = vcombine.high %v2403_v42, %v2403_v42  ;;  %v2653_v55 = vmul.f32 %v2388_v45, %v2388_v45 }
 0x1ca   : > { %v2554_v54 = vrot.slane %v2540_v29, %v3791_v19  ;;  %v2779_v56 = vcombine.low %v2651_v39, %v2652_v46  ;;  %v2556_v57 = vcombine.low %v2388_v45, %v2396_v33  ;;  %v2420_v61 = vrot.slane %v2406_v48, %v3791_v19 }
 0x1cb   : > { %v2571_v59 = vrot.slane %v2557_v50, %v3791_v19  ;;  %v2796_v58 = vcombine.low %v2655_v51, %v2656_v52  ;;  %v2421_v62 = vcombine.high %v2413_v40, %v2413_v40  ;;  %v2795_v4 = vcombine.low %v2653_v55, %v2654_v49 }
 0x1cc   : > { %v2555_v1 = vcombine.low %v2547_v14, %v2554_v54  ;;  %v2793_v63 = vrot.slane %v2779_v56, %v3791_v19  ;;  %v2564_v3 = vrot.slane %v2556_v57, %v3791_v19  ;;  %v2573_v7 = vcombine.low %v2405_v53, %v2413_v40 }
 0x1cd   : > { %v2810_v5 = vrot.slane %v2796_v58, %v3791_v19  ;;  %v2574_v8 = vcombine.low %v2421_v62, %v2420_v61  ;;  %v2657_v10 = vmul.f32 %v2405_v53, %v2405_v53  ;;  %v2803_v15 = vrot.slane %v2795_v4, %v3791_v19 }
 0x1ce   : > { %2603 = vst.msk [vmem:[%s4146_s17 + $0x28] sm:$0xff] %vm1192_vm3, %v2555_v1  ;;  %v2615_v11 = vsel %vm1192_vm3, %v2555_v1, 0.0  ;;  %v2794_v12 = vcombine.low %v2786_v18, %v2793_v63  ;;  %v2572_v13 = vcombine.low %v2564_v3, %v2571_v59  ;;  %v2581_v16 = vrot.slane %v2573_v7, %v3791_v19 }
 0x1cf   : > { %v2616_v14 = vadd.f32 %v2615_v11, %v2614_v9  ;;  %v2588_v17 = vrot.slane %v2574_v8, %v3791_v19  ;;  %v2658_v20 = vmul.f32 %v2413_v40, %v2413_v40  ;;  %v2811_v23 = vcombine.low %v2803_v15, %v2810_v5 }
 0x1d0   : > { %v2846_v21 = vsel %vm1192_vm3, %v2794_v12, 0.0  ;;  %2604 = vst.msk [vmem:[%s4146_s17 + $0x30] sm:$0xff] %vm1192_vm3, %v2572_v13  ;;  %v2617_v22 = vsel %vm1192_vm3, %v2572_v13, 0.0  ;;  %v2659_v24 = vmul.f32 %v2421_v62, %v2421_v62  ;;  %v2660_v27 = vmul.f32 %v2420_v61, %v2420_v61 }
 0x1d1   : > { %v2847_v25 = vadd.f32 %v2846_v21, %v2845_v43  ;;  %v2618_v47 = vadd.f32 %v2617_v22, %v2616_v14  ;;  %v2589_v26 = vcombine.low %v2581_v16, %v2588_v17  ;;  %v2848_v28 = vsel %vm1192_vm3, %v2811_v23, 0.0 }
 0x1d2   : > { %v2812_v30 = vcombine.low %v2657_v10, %v2658_v20  ;;  %v2813_v32 = vcombine.low %v2659_v24, %v2660_v27 }
 0x1d3   : > { %v2849_v6 = vadd.f32 %v2848_v28, %v2847_v25  ;;  %2605 = vst.msk [vmem:[%s4146_s17 + $0x38] sm:$0xff] %vm1192_vm3, %v2589_v26  ;;  %v2619_v31 = vsel %vm1192_vm3, %v2589_v26, 0.0 }
 0x1d4   : > { %v2620_v0 = vadd.f32 %v2619_v31, %v2618_v47  ;;  %v2820_v34 = vrot.slane %v2812_v30, %v3791_v19  ;;  %v2827_v9 = vrot.slane %v2813_v32, %v3791_v19 }
 0x1d6   : > { %v2621_v18 = vrot.slane %v2620_v0, 4  ;;  %v2828_v60 = vcombine.low %v2820_v34, %v2827_v9 }
 0x1d8   : > { %v2622_v35 = vadd.f32 %v2621_v18, %v2620_v0  ;;  %v2850_v36 = vsel %vm1192_vm3, %v2828_v60, 0.0 }
 0x1d9   : > { %v2851_v33 = vadd.f32 %v2850_v36, %v2849_v6 }
 0x1da   : > { %v2623_v37 = vrot.slane %v2622_v35, 2 }
 0x1db   : > { %v2852_v2 = vrot.slane %v2851_v33, 4 }
 0x1dc   : > { %v2624_v48 = vadd.f32 %v2623_v37, %v2622_v35 }
 0x1dd   : > { %v2853_v39 = vadd.f32 %v2852_v2, %v2851_v33 }
 0x1de   : > { %v2625_v38 = vrot.slane %v2624_v48, 1 }
 0x1df   : > { %v2854_v40 = vrot.slane %v2853_v39, 2 }
 0x1e0   : > { %v2626_v19 = vadd.f32 %v2625_v38, %v2624_v48 }
 0x1e1   : > { %v2855_v41 = vadd.f32 %v2854_v40, %v2853_v39 }
 0x1e2   : > { %2628 = vst.msk [vmem:[%s467_s23] sm:$0x1] %vm2627_vm5, %v2626_v19 }
 0x1e3   : > { %v2856_v42 = vrot.slane %v2855_v41, 1 }
 0x1e5   : > { %v2857_v44 = vadd.f32 %v2856_v42, %v2855_v41 }
 0x1e7   : > { %2858 = vst.msk [vmem:[%s467_s23 + $0x1] sm:$0x1] %vm2627_vm5, %v2857_v44 }
 0x1e8 PF: > { %s18_s28 = sadd.s32 1, %s3654_s28   ;;  %s4261_s24 = smov %s3646_s26 }
 0x1e9   : > { %p15_p12 = scmp.ge.s32.totalorder %s18_s28, 10   ;;  %s4262_s25 = smov %s3650_s27 }
 0x1ea   : > { %s4263_s26 = smov %s4266_s29  ;;  %s4264_s27 = smov %s4270_s30 }
 0x1eb   :  { %17 = sbr.rel (!%p15_p12) target bundleno = 3 (0x3), region = 100 }

// kernel: unet_block_pallas.4
= control target key start
LH: loop header
LB: loop body
LE: loop exit
PB: predicated region body
PF: predicated region fallthrough
CT: control target
= control target key end

     0   :  { %s6219_s17 = smov 0   ;;  %s6221_s18 = smov 0   ;;  %s7252_s0 = inlined_call_operand.vmem [shape: f32[2,16,16,8], index: 0, kind: input, shape index: {}, may-alias: {0,1,2}]   ;;  %s7253_s1 = inlined_call_operand.vmem [shape: f32[2,16,16,8], index: 1, kind: input, shape index: {}, may-alias: {0,1,2}]   ;;  %s7254_s2 = inlined_call_operand.vmem [shape: f32[2,16,16,8], index: 2, kind: input, shape index: {}, may-alias: {0,1,2}]   ;;  %s7255_s3 = inlined_call_operand.vmem [shape: f32[2,16,16,12], index: 3, kind: input, shape index: {}, may-alias: {3,4,5}]   ;;  %s7256_s4 = inlined_call_operand.vmem [shape: f32[2,16,16,12], index: 4, kind: input, shape index: {}, may-alias: {3,4,5}]   ;;  %s7257_s5 = inlined_call_operand.vmem [shape: f32[2,16,16,12], index: 5, kind: input, shape index: {}, may-alias: {3,4,5}]   ;;  %s7258_s6 = inlined_call_operand.vmem [shape: f32[1,8], index: 6, kind: input, shape index: {}]   ;;  %s7259_s7 = inlined_call_operand.vmem [shape: f32[1,8], index: 7, kind: input, shape index: {}]   ;;  %s7260_s8 = inlined_call_operand.vmem [shape: bf16[3,3,8,16], index: 8, kind: input, shape index: {}]   ;;  %s7261_s9 = inlined_call_operand.vmem [shape: bf16[3,3,12,16], index: 9, kind: input, shape index: {}]   ;;  %s7262_s10 = inlined_call_operand.vmem [shape: f32[2,16,16,16], index: 10, kind: output, shape index: {0}]   ;;  %s7263_s11 = inlined_call_operand.vmem [shape: f32[2,4,2,16], index: 11, kind: output, shape index: {1}]  }
   0x1   :  { %7265 = sst [smem:[#allocation7_spill]] %s7255_s3  ;;  %s6223_s19 = smov 0  }
   0x2   :  { %s6225_s20 = smov 0   ;;  %s6227_s21 = smov 0  }
   0x3 LB: > { %7266 = sst [smem:[#allocation4_spill]] %s6150_s20  ;;  %s31_s22 = sadd.s32 1, %s6146_s19  ;;  %s6154_s21 = sphi %s6227_s21, %s22_s21   ;;  %s6150_s20 = sphi %s6225_s20, %s7279_s20   ;;  %s6146_s19 = sphi %s6223_s19, %s7281_s19   ;;  %s6142_s18 = sphi %s6221_s18, %s7277_s18   ;;  %s6138_s17 = sphi %s6219_s17, %s7280_s17  }
   0x4   : > { %s34_s23 = sadd.s32 1, %s6150_s20  ;;  %p32_p0 = scmp.ge.s32.totalorder %s31_s22, 4 }
   0x5   : > { %p5042_p1 = scmp.ge.s32.totalorder %s6154_s21, 1  ;;  %p510_p2 = scmp.lt.s32.totalorder %s6154_s21, 9 }
   0x6   : > { %s7283_s22 = smov (%p32_p0, %s31_s22), 0  ;;  %s7285_s23 = smov (!%p32_p0, %s34_s23), %s6150_s20 }
   0x7   : > { %7267 = sst [smem:[#allocation5_spill]] %s7283_s22  ;;  %p511_p3 = pnand %p5042_p1, %p510_p2 }
   0x8   : > { %p36_p4 = scmp.ge.s32.totalorder %s7285_s23, 2  ;;  %vm2122_vm0 = vcmask (!%p511_p3), 1045504   ;;  %v6156_v0 = vmov (!%p511_p3), 0.0   ;;  %v6098_v1 = vld [vmem:[%s7261_s9 + $0x20] sm:$0x3f] (!%p511_p3)   ;;  %s6259_s26 = sshll.u32 (!%p511_p3), %s6138_s17, 2  ;;  %v893_v4 = vlaneseq (!%p511_p3) }
   0x9   : > { %514 = sbr.rel (%p511_p3) target bundleno = 668 (0x29c), region = 60  ;;  %5528 = vmatprep.subr.bf16.mxu0 (!%p511_p3), %v6156_v0  ;;  %5330 = vmatprep.subr.bf16.mxu1 (!%p511_p3), %v6156_v0  ;;  %vm6157_vm1 = vmmov (!%p511_p3), 0   ;;  %v6099_v2 = vld [vmem:[%s7261_s9] sm:$0x3f] (!%p511_p3)   ;;  %p631_p5 = scmp.lt.s32.totalorder (!%p511_p3), %s6142_s18, 1  ;;  %v3150_v3 = vsel (!%p511_p3), %vm2122_vm0, %v6098_v1, 0 }
   0xa   : > { %s7287_s23 = smov (%p36_p4, %s7285_s23), 0  ;;  %5530 = vmatprep.mubr.msk.bf16.mxu0 (!%p511_p3), %vm6157_vm1, %v6156_v0  ;;  %p633_p6 = scmp.lt.s32.totalorder (!%p511_p3), %s6259_s26, 15  ;;  %5332 = vmatprep.mubr.msk.bf16.mxu1 (!%p511_p3), %vm6157_vm1, %v6156_v0  ;;  %v2124_v5 = vsel (!%p511_p3), %vm2122_vm0, %v6099_v2, 0  ;;  %v6158_v6 = vmov (!%p511_p3), 1983009808   ;;  %v894_v9 = vshrl.u32 (!%p511_p3), %v893_v4, 7 }
   0xb   : > { %7268 = sst [smem:[#allocation6_spill]] %s7287_s23  ;;  %s6272_s29 = sadd.s32 (!%p511_p3), 4294967295, %s6259_s26  ;;  %5529 = vmatpush3.bf16.msra.mxu0 (!%p511_p3), %v3150_v3  ;;  %5331 = vmatpush3.bf16.msra.mxu1 (!%p511_p3), %v2124_v5  ;;  %v891_v7 = vunpack.c.l.s4 (!%p511_p3), %v6158_v6  ;;  %v2085_v10 = vld [vmem:[%s7260_s8] sm:$0xf] (!%p511_p3)  ;;  %v5160_v11 = vld [vmem:[%s7260_s8 + $0x14] sm:$0xf] (!%p511_p3) }
   0xc   : > { %5550 = vmatprep.subr.bf16.mxu0 (!%p511_p3), %v6156_v0  ;;  %5352 = vmatprep.subr.bf16.mxu1 (!%p511_p3), %v6156_v0  ;;  %p643_p7 = scmp.gt.s32.totalorder (!%p511_p3), %s6272_s29, 0  ;;  %p740_p8 = scmp.gt.s32.totalorder (!%p511_p3), %s6138_s17, 0  ;;  %v5104_v12 = vld [vmem:[%s7260_s8 + $0x4] sm:$0xf] (!%p511_p3)  ;;  %vm827_vm2 = vcmask (!%p511_p3), 1040384   ;;  %vm2213_vm3 = vcmask (!%p511_p3), 1043456  }
   0xd   : > { %v892_v8 = vunpack.c.0.s8 (!%p511_p3), %v891_v7  ;;  %p5049_p9 = scmp.lt.s32.totalorder (!%p511_p3), %s6272_s29, 15  ;;  %s7269_s3 = sld [smem:[#allocation7_spill]] (!%p511_p3)  ;;  %v6109_v20 = vld [vmem:[%s7261_s9 + $0x28] sm:$0x3f] (!%p511_p3)   ;;  %v6329_v24 = vsel (!%p511_p3), %vm2213_vm3, %v2085_v10, 0  ;;  %v6336_v28 = vsel (!%p511_p3), %vm2213_vm3, %v5160_v11, 0 }
   0xe   : > { %v6339_v29 = vsel (!%p511_p3), %vm2213_vm3, %v5104_v12, 0  ;;  %vm2053_vm4 = vcmask (!%p511_p3), 97280   ;;  %v6353_v38 = vsel (!%p511_p3), %vm2122_vm0, %v6109_v20, 0  ;;  %v6364_v39 = vld [vmem:[%s7258_s6] ss:$0 sm:$0xff] (!%p511_p3)  ;;  %p733_p11 = scmp.lt.s32.totalorder (!%p511_p3), %s6138_s17, 3 }
   0xf   : > { %v6306_v13 = vsub.s32 (!%p511_p3), %v892_v8, %v894_v9  ;;  %v6371_v46 = vld [vmem:[%s7259_s7] ss:$0 sm:$0xff] (!%p511_p3)  ;;  %vm1463_vm6 = vcmask (!%p511_p3), 64512   ;;  %vm4513_vm8 = vcmask (!%p511_p3), 130048   ;;  %vm4543_vm9 = vcmask (!%p511_p3), 122880  }
  0x10   : > { %s7289_s18 = smov (!%p631_p5, %s6142_s18), 1  ;;  %s7297_s17 = smov (!%p733_p11, %s6138_s17), 3 }
  0x11   : > { %s634_s30 = scalar_select %p633_p6, %s6259_s26, 15 }
  0x12   : > { %s6281_s12 = sshll.u32 %s7289_s18, 5 }
  0x13   : > { %s5044_s13 = sshll.u32 %s634_s30, 1 }
  0x14   : > { %s637_s14 = sadd.s32 %s6281_s12, %s5044_s13 }
  0x15   : > { %s6287_s15 = sshll.u32 %s637_s14, 3 }
  0x16   : > { %s6297_s28 = scalar_lea.vmem %s7269_s3, %s6287_s15  ;;  %s7270_s3 = sadd.s32 4, %s6259_s26 }
  0x17   : > { %s644_s22 = scalar_select %p643_p7, %s6272_s29, 0  ;;  %v1481_v14 = vld [vmem:[%s6297_s28] sm:$0xff]  ;;  %v1482_v15 = vld [vmem:[%s6297_s28 + $0x8] sm:$0xff]  ;;  %v6311_v16 = vld [vmem:[%s6297_s28 + $0x10] sm:$0xff] }
  0x18   : > { %s6315_s16 = scalar_select %p740_p8, 1, 0  ;;  %v1512_v17 = vrot.slane %v1481_v14, 7  ;;  %v1513_v18 = vrot.slane %v1482_v15, 7  ;;  %v1515_v19 = vrot.slane %v6311_v16, 7  ;;  %v1484_v25 = vld [vmem:[%s6297_s28 + $0x18] sm:$0xff] }
  0x19   : > { %s7291_s22 = smov (!%p5049_p9, %s644_s22), 15  ;;  %v6346_v34 = vld [vmem:[%s6297_s28 + $0x20] sm:$0xff]  ;;  %v1516_v37 = vrot.slane %v1484_v25, 7  ;;  %p6391_p10 = scmp.lt.s32.totalorder %s7270_s3, 15 }
  0x1a   : > { %v1514_v21 = vsel %vm827_vm2, %v1512_v17, %v1513_v18  ;;  %v1540_v22 = vsel %vm827_vm2, 0.0, %v1512_v17  ;;  %v1541_v23 = vsel %vm827_vm2, 0.0, %v1515_v19  ;;  %s5054_s25 = sshll.u32 %s7291_s22, 1  ;;  %v1546_v30 = vsel %vm827_vm2, %v1513_v18, 0.0 }
  0x1b   : > { %v1604_v26 = vcombine.high %v1540_v22, %v1540_v22  ;;  %v6333_v27 = vrot.slane %v1540_v22, %v6306_v13  ;;  %s651_s29 = sadd.s32 %s5054_s25, %s6281_s12  ;;  %v1621_v31 = vcombine.high %v1514_v21, %v1514_v21  ;;  %v1628_v32 = vrot.slane %v1514_v21, %v6306_v13 }
  0x1c   : > { %v1652_v33 = vrot.slane %v1541_v23, %v6306_v13  ;;  %s5056_s22 = sshll.u32 %s651_s29, 3  ;;  %v805_v40 = vstv %s6315_s16  ;;  %v1644_v48 = vrot.slane %v1546_v30, %v6306_v13  ;;  %v1518_v49 = vrot.slane %v6346_v34, 7  ;;  %s7272_s16 = smov %s7270_s3 }
  0x1d   : > { %v1618_v35 = vrot.slane %v1604_v26, %v6306_v13  ;;  %v1619_v36 = vcombine.high %v6333_v27, %v6333_v27  ;;  %s653_s14 = scalar_lea.vmem %s7253_s1, %s5056_s22  ;;  %s698_s25 = scalar_lea.vmem %s7256_s4, %s5056_s22  ;;  %v1635_v41 = vrot.slane %v1621_v31, %v6306_v13  ;;  %v1636_v42 = vcombine.high %v1628_v32, %v1628_v32 }
  0x1e   : > { %v1660_v43 = vcombine.high %v1652_v33, %v1652_v33  ;;  %v750_v44 = vld [vmem:[%s653_s14] sm:$0xff]  ;;  %v751_v45 = vld [vmem:[%s653_s14 + $0x8] sm:$0xff]  ;;  %s6101_s30 = scalar_select %p740_p8, 255, 0  ;;  %v1645_v50 = vcombine.high %v1541_v23, %v1541_v23  ;;  %v1517_v7 = vsel %vm827_vm2, %v1515_v19, %v1516_v37  ;;  %v6402_v8 = vsel %vm827_vm2, 0.0, %v1518_v49 }
  0x1f   : > { %v1620_v47 = vcombine.high %v1618_v35, %v1618_v35  ;;  %v792_v51 = vmul.f32 %v6364_v39, %v750_v44  ;;  %v793_v52 = vmul.f32 %v6364_v39, %v751_v45  ;;  %v1637_v53 = vcombine.high %v1635_v41, %v1635_v41  ;;  %s7293_s16 = smov (!%p6391_p10, %s7272_s16), 15  ;;  %s6513_s29 = scalar_lea.vmem %s7252_s0, %s6287_s15 }
  0x20   : > { %v1861_v54 = vcombine.low %v1636_v42, %v1635_v41  ;;  %v6102_v55 = vld [vmem:[%s698_s25 + $0x8] sm:%s6101_s30]  ;;  %v1844_v56 = vcombine.low %v1619_v36, %v1618_v35  ;;  %v1878_v58 = vcombine.low %v1652_v33, %v1660_v43  ;;  %v1659_v59 = vrot.slane %v1645_v50, %v6306_v13  ;;  %v6105_v1 = vld [vmem:[%s698_s25] sm:%s6101_s30]  ;;  %s7295_s16 = smov (!%p6391_p10, %s7293_s16), 15 }
  0x21   : > { %v1860_v57 = vcombine.low %v1620_v47, %v1628_v32  ;;  %v6381_v60 = vadd.f32 %v6371_v46, %v792_v51  ;;  %v6384_v61 = vadd.f32 %v6371_v46, %v793_v52  ;;  %v1510_v62 = vrot.slane %v6102_v55, 7  ;;  %s6447_s26 = scalar_select %p733_p11, 1, 0 }
  0x22   : > { %v1875_v63 = vrot.slane %v1861_v54, %v6306_v13  ;;  %v1877_v3 = vcombine.low %v1637_v53, %v1644_v48  ;;  %v1892_v4 = vrot.slane %v1878_v58, %v6306_v13  ;;  %v1509_v5 = vrot.slane %v6105_v1, 7  ;;  %v1487_v1 = vld [vmem:[%s6297_s28 + $0x30] sm:$0xff]  ;;  %s6452_s22 = sshll.u32 %s7295_s16, 1 }
  0x23   : > { %v1868_v2 = vrot.slane %v1860_v57, %v6306_v13  ;;  %v1545_v6 = vsel %vm827_vm2, %v1510_v62, 0.0  ;;  %v1547_v9 = vsel %vm827_vm2, %v1516_v37, 0.0  ;;  %v796_v15 = vmax.f32 %v6381_v60, 0.0  ;;  %s668_s27 = sadd.s32 %s6452_s22, %s6281_s12 }
  0x24   : > { %v1603_v10 = vrot.slane %v1545_v6, %v6306_v13  ;;  %v1885_v12 = vrot.slane %v1877_v3, %v6306_v13  ;;  %v1511_v14 = vsel %vm827_vm2, %v1509_v5, %v1510_v62  ;;  %v1858_v16 = vrot.slane %v1844_v56, %v6306_v13  ;;  %v1486_v56 = vld [vmem:[%s6297_s28 + $0x28] sm:$0xff]  ;;  %s6483_s12 = sshll.u32 %s668_s27, 3 }
  0x25   : > { %v1876_v11 = vcombine.low %v1868_v2, %v1875_v63  ;;  %v1539_v17 = vsel %vm827_vm2, 0.0, %v1509_v5  ;;  %v1580_v18 = vcombine.high %v1511_v14, %v1511_v14  ;;  %v797_v19 = vmax.f32 %v6384_v61, 0.0  ;;  %s6507_s23 = scalar_lea.vmem %s7257_s5, %s6483_s12  ;;  %s6632_s20 = scalar_lea.vmem %s7254_s2, %s6483_s12 }
  0x26   : > { %v1843_v20 = vcombine.low %v1603_v10, %v6333_v27  ;;  %v1893_v21 = vcombine.low %v1885_v12, %v1892_v4  ;;  %v1661_v22 = vcombine.high %v1659_v59, %v1659_v59  ;;  %vm6420_vm5 = vcmp.eq.s32.totalorder %v805_v40, 1 }
  0x27   : > { %2057 = vst.msk [vmem:[#allocation3 + $0x18] sm:$0xff] %vm2053_vm4, %v1876_v11  ;;  %v1563_v25 = vcombine.high %v1539_v17, %v1539_v17  ;;  %v1570_v26 = vrot.slane %v1539_v17, %v6306_v13  ;;  %v1587_v30 = vrot.slane %v1511_v14, %v6306_v13  ;;  %v1594_v27 = vrot.slane %v1580_v18, %v6306_v13  ;;  %v6459_v14 = vld [vmem:[%s6297_s28 + $0x38] sm:$0xff]  ;;  %s6107_s28 = scalar_select %p733_p11, 255, 0 }
  0x28   : > { %v1851_v31 = vrot.slane %v1843_v20, %v6306_v13  ;;  %2058 = vst.msk [vmem:[#allocation3 + $0x20] sm:$0xff] %vm2053_vm4, %v1893_v21  ;;  %v1662_v32 = vcombine.high %v1517_v7, %v1517_v7  ;;  %v1669_v33 = vrot.slane %v1517_v7, %v6306_v13  ;;  %v1685_v35 = vrot.slane %v1547_v9, %v6306_v13 }
  0x29   : > { %v1577_v36 = vrot.slane %v1563_v25, %v6306_v13  ;;  %v1578_v37 = vcombine.high %v1570_v26, %v1570_v26  ;;  %v1595_v40 = vcombine.high %v1587_v30, %v1587_v30  ;;  %v1596_v41 = vcombine.high %v1594_v27, %v1594_v27 }
  0x2a   : > { %v1859_v42 = vcombine.low %v1851_v31, %v1858_v16  ;;  %v1676_v43 = vrot.slane %v1662_v32, %v6306_v13  ;;  %v1677_v44 = vcombine.high %v1669_v33, %v1669_v33  ;;  %v1693_v45 = vrot.slane %v6402_v8, %v6306_v13 }
  0x2b   : > { %v1579_v47 = vcombine.high %v1577_v36, %v1577_v36  ;;  %v1809_v48 = vcombine.low %v1570_v26, %v1578_v37  ;;  %v1826_v50 = vcombine.low %v1587_v30, %v1595_v40  ;;  %v1827_v51 = vcombine.low %v1594_v27, %v1596_v41 }
  0x2c   : > { %2056 = vst.msk [vmem:[#allocation3 + $0x10] sm:$0xff] %vm2053_vm4, %v1859_v42  ;;  %v1678_v52 = vcombine.high %v1676_v43, %v1676_v43  ;;  %v1894_v53 = vcombine.low %v1659_v59, %v1661_v22  ;;  %v1895_v54 = vcombine.low %v1669_v33, %v1677_v44  ;;  %v1912_v55 = vcombine.low %v1685_v35, %v1693_v45 }
  0x2d   : > { %v1810_v57 = vcombine.low %v1577_v36, %v1579_v47  ;;  %v1817_v58 = vrot.slane %v1809_v48, %v6306_v13  ;;  %v1834_v62 = vrot.slane %v1826_v50, %v6306_v13  ;;  %v1841_v63 = vrot.slane %v1827_v51, %v6306_v13 }
  0x2e   : > { %v1902_v2 = vrot.slane %v1894_v53, %v6306_v13  ;;  %v1909_v3 = vrot.slane %v1895_v54, %v6306_v13  ;;  %v1911_v59 = vcombine.low %v1676_v43, %v1678_v52  ;;  %v1926_v4 = vrot.slane %v1912_v55, %v6306_v13 }
  0x2f   : > { %v1824_v5 = vrot.slane %v1810_v57, %v6306_v13  ;;  %v1842_v6 = vcombine.low %v1834_v62, %v1841_v63  ;;  %v1519_v7 = vrot.slane %v1486_v56, 7  ;;  %v1686_v9 = vcombine.high %v6402_v8, %v6402_v8  ;;  %v3113_v17 = vld [vmem:[#allocation3 + $0x1b] sm:$0xff] }
  0x30   : > { %v1910_v10 = vcombine.low %v1902_v2, %v1909_v3  ;;  %v1919_v11 = vrot.slane %v1911_v59, %v6306_v13  ;;  %v1701_v12 = vcombine.high %v1693_v45, %v1693_v45  ;;  %v1521_v16 = vrot.slane %v1487_v1, 7 }
  0x31   : > { %v1825_v18 = vcombine.low %v1817_v58, %v1824_v5  ;;  %2055 = vst.msk [vmem:[#allocation3 + $0x8] sm:$0xff] %vm2053_vm4, %v1842_v6  ;;  %v1520_v20 = vsel %vm827_vm2, %v1518_v49, %v1519_v7  ;;  %v1548_v21 = vsel %vm827_vm2, %v1519_v7, 0.0  ;;  %v1700_v22 = vrot.slane %v1686_v9, %v6306_v13 }
  0x32   : > { %v6473_v8 = vsel %vm6420_vm5, %v796_v15, 0.0  ;;  %v1927_v25 = vcombine.low %v1919_v11, %v1926_v4  ;;  %2059 = vst.msk [vmem:[#allocation3 + $0x28] sm:$0xff] %vm2053_vm4, %v1910_v10  ;;  %v1703_v26 = vcombine.high %v1520_v20, %v1520_v20  ;;  %v1710_v30 = vrot.slane %v1520_v20, %v6306_v13  ;;  %v6526_v4 = vld [vmem:[%s6507_s23] sm:%s6107_s28]  ;;  %v744_v20 = vld [vmem:[%s6513_s29 + $0x10] sm:$0xff] }
  0x33   : > { %v3112_v34 = vld [vmem:[#allocation3 + $0x13] sm:$0xff]  ;;  %2054 = vst.msk [vmem:[#allocation3] sm:$0xff] %vm2053_vm4, %v1825_v18  ;;  %v1702_v49 = vcombine.high %v1700_v22, %v1700_v22  ;;  %v1928_v27 = vcombine.low %v1701_v12, %v1700_v22  ;;  %v1522_v31 = vrot.slane %v6459_v14, 7  ;;  %v1543_v32 = vsel %vm827_vm2, 0.0, %v1521_v16  ;;  %v742_v11 = vld [vmem:[%s6513_s29] sm:$0xff]  ;;  %v743_v18 = vld [vmem:[%s6513_s29 + $0x8] sm:$0xff] }
  0x34   : > { %v3121_v60 = vpack.c.bf16 %v3113_v17, %v3112_v34  ;;  %2060 = vst.msk [vmem:[#allocation3 + $0x30] sm:$0xff] %vm2053_vm4, %v1927_v25  ;;  %v1717_v15 = vrot.slane %v1703_v26, %v6306_v13  ;;  %v1718_v33 = vcombine.high %v1710_v30, %v1710_v30  ;;  %v1726_v35 = vrot.slane %v1548_v21, %v6306_v13  ;;  %v6515_v61 = vld [vmem:[#allocation3 + $0x10] sm:$0xff] }
  0x35   : > { %v1929_v36 = vcombine.low %v1702_v49, %v1710_v30  ;;  %v1936_v37 = vrot.slane %v1928_v27, %v6306_v13  ;;  %v1523_v40 = vsel %vm827_vm2, %v1521_v16, %v1522_v31  ;;  %v1727_v41 = vcombine.high %v1543_v32, %v1543_v32  ;;  %v6543_v30 = vld [vmem:[#allocation3 + $0x20] sm:$0xff] }
  0x36   : > { %5531 = vmatmul.mubr.msk.bf16.vlgmr.msra.gmra.mrb[0].mxu0 %vm2053_vm4, %v3121_v60  ;;  %v1719_v42 = vcombine.high %v1717_v15, %v1717_v15  ;;  %v1945_v43 = vcombine.low %v1718_v33, %v1717_v15  ;;  %v1734_v44 = vrot.slane %v1543_v32, %v6306_v13  ;;  %v1744_v45 = vcombine.high %v1523_v40, %v1523_v40 }
  0x37   : > { %v6495_v47 = vsel %vm6420_vm5, %v797_v19, 0.0  ;;  %5551 = vmatpush3.bf16.msra.mxu0 %v6336_v28  ;;  %5534 = vmatprep.mubr.msk.bf16.mxu0 %vm6157_vm1, %v6156_v0  ;;  %v1943_v48 = vrot.slane %v1929_v36, %v6306_v13  ;;  %v1741_v50 = vrot.slane %v1727_v41, %v6306_v13  ;;  %v1751_v51 = vrot.slane %v1523_v40, %v6306_v13  ;;  %v6517_v19 = vld [vmem:[#allocation3 + $0x18] sm:$0xff] }
  0x38   : > { %v2087_v28 = vld [vmem:[#allocation3 + $0x8] sm:$0xff]  ;;  %v1946_v23 = vcombine.low %v1719_v42, %v1726_v35  ;;  %v1953_v52 = vrot.slane %v1945_v43, %v6306_v13  ;;  %v1742_v53 = vcombine.high %v1734_v44, %v1734_v44  ;;  %v1758_v54 = vrot.slane %v1744_v45, %v6306_v13  ;;  %5572 = vmatprep.subr.bf16.mxu0 %v6156_v0 }
  0x39   : > { %v828_v55 = vrot.slane %v6473_v8, 7  ;;  %v3114_v56 = vld [vmem:[#allocation3 + $0x23] sm:$0xff]  ;;  %v1944_v57 = vcombine.low %v1936_v37, %v1943_v48  ;;  %v1743_v58 = vcombine.high %v1741_v50, %v1741_v50  ;;  %v1759_v62 = vcombine.high %v1751_v51, %v1751_v51 }
  0x3a   : > { %v829_v63 = vrot.slane %v6495_v47, 7  ;;  %v2086_v1 = vld [vmem:[#allocation3] sm:$0xff]  ;;  %v1960_v2 = vrot.slane %v1946_v23, %v6306_v13  ;;  %v1760_v3 = vcombine.high %v1758_v54, %v1758_v54  ;;  %v1962_v59 = vcombine.low %v1734_v44, %v1742_v53  ;;  %v6545_v34 = vld [vmem:[#allocation3 + $0x28] sm:$0xff] }
  0x3b   : > { %v2095_v5 = vpack.c.bf16 %v2087_v28, %v2086_v1  ;;  %v3115_v6 = vld [vmem:[#allocation3 + $0x2b] sm:$0xff]  ;;  %v2096_v7 = vpack.c.bf16 %v6517_v19, %v6515_v61  ;;  %2061 = vst.msk [vmem:[#allocation3 + $0x38] sm:$0xff] %vm2053_vm4, %v1944_v57  ;;  %v1963_v9 = vcombine.low %v1741_v50, %v1743_v58  ;;  %v1979_v10 = vcombine.low %v1751_v51, %v1759_v62 }
  0x3c   : > { %v3122_v12 = vpack.c.bf16 %v3115_v6, %v3114_v56  ;;  %v1961_v14 = vcombine.low %v1953_v52, %v1960_v2  ;;  %v1970_v16 = vrot.slane %v1962_v59, %v6306_v13  ;;  %v1980_v17 = vcombine.low %v1758_v54, %v1760_v3  ;;  %v6568_v42 = vld [vmem:[#allocation3 + $0x30] sm:$0xff] }
  0x3d   : > { %5333 = vmatmul.mubr.msk.bf16.vlgmr.msra.gmra.mrb[0].mxu1 %vm2053_vm4, %v2095_v5  ;;  %v1977_v21 = vrot.slane %v1963_v9, %v6306_v13  ;;  %v1987_v22 = vrot.slane %v1979_v10, %v6306_v13  ;;  %v1524_v25 = vrot.slane %v6526_v4, 7  ;;  %v1549_v26 = vsel %vm827_vm2, %v1522_v31, 0.0  ;;  %v6110_v4 = vld [vmem:[%s7261_s9 + $0x8] sm:$0x3f]  }
  0x3e   : > { %5353 = vmatpush3.bf16.msra.mxu1 %v6329_v24  ;;  %5535 = vmatmul.mubr.msk.bf16.gmra.mrb[4].mxu0 %vm2053_vm4, %v3122_v12  ;;  %2062 = vst.msk [vmem:[#allocation3 + $0x40] sm:$0xff] %vm2053_vm4, %v1961_v14  ;;  %v1994_v49 = vrot.slane %v1980_v17, %v6306_v13  ;;  %v1767_v27 = vrot.slane %v1549_v26, %v6306_v13  ;;  %v6551_v60 = vsel %vm827_vm2, %v829_v63, 0.0  ;;  %v861_v53 = vsel %vm827_vm2, 0.0, %v828_v55 }
  0x3f   : > { %v762_v32 = vmul.f32 %v6364_v39, %v742_v11  ;;  %5336 = vmatprep.mubr.msk.bf16.mxu1 %vm6157_vm1, %v6156_v0  ;;  %5538 = vmatprep.mubr.msk.bf16.mxu0 %vm6157_vm1, %v6156_v0  ;;  %v1978_v24 = vcombine.low %v1970_v16, %v1977_v21  ;;  %v1544_v31 = vsel %vm827_vm2, 0.0, %v1524_v25  ;;  %v763_v15 = vmul.f32 %v6364_v39, %v743_v18 }
  0x40   : > { %v764_v33 = vmul.f32 %v6364_v39, %v744_v20  ;;  %v1995_v35 = vcombine.low %v1987_v22, %v1994_v49  ;;  %v1768_v36 = vcombine.high %v1544_v31, %v1544_v31  ;;  %v1775_v37 = vrot.slane %v1544_v31, %v6306_v13  ;;  %5374 = vmatprep.subr.bf16.mxu1 %v6156_v0 }
  0x41   : > { %v776_v40 = vadd.f32 %v6371_v46, %v762_v32  ;;  %v2097_v41 = vpack.c.bf16 %v6545_v34, %v6543_v30  ;;  %2063 = vst.msk [vmem:[#allocation3 + $0x48] sm:$0xff] %vm2053_vm4, %v1978_v24  ;;  %v777_v43 = vadd.f32 %v6371_v46, %v763_v15  ;;  %v929_v45 = vrot.slane %v6551_v60, %v6306_v13 }
  0x42   : > { %v778_v44 = vadd.f32 %v6371_v46, %v764_v33  ;;  %2064 = vst.msk [vmem:[#allocation3 + $0x50] sm:$0xff] %vm2053_vm4, %v1995_v35  ;;  %v6575_v47 = vld [vmem:[#allocation3 + $0x38] sm:$0xff]  ;;  %v6578_v48 = vrot.slane %v1768_v36, %v6306_v13  ;;  %v1783_v50 = vcombine.high %v1775_v37, %v1775_v37  ;;  %v1996_v51 = vcombine.low %v1767_v27, %v1775_v37 }
  0x43   : > { %v784_v28 = vmax.f32 %v776_v40, 0.0  ;;  %v3116_v61 = vld [vmem:[#allocation3 + $0x33] sm:$0xff]  ;;  %v785_v19 = vmax.f32 %v777_v43, 0.0  ;;  %v830_v52 = vsel %vm827_vm2, %v828_v55, %v829_v63  ;;  %v2098_v54 = vpack.c.bf16 %v6575_v47, %v6568_v42 }
  0x44   : > { %v786_v23 = vmax.f32 %v778_v44, 0.0  ;;  %v1997_v56 = vcombine.low %v1783_v50, %v6578_v48  ;;  %v2004_v57 = vrot.slane %v1996_v51, %v6306_v13  ;;  %v889_v3 = vcombine.high %v861_v53, %v861_v53 }
  0x45   : > { %v831_v58 = vrot.slane %v784_v28, 7  ;;  %5337 = vmatmul.mubr.msk.bf16.gmra.mrb[4].mxu1 %vm2053_vm4, %v2096_v7  ;;  %v3117_v62 = vld [vmem:[#allocation3 + $0x3b] sm:$0xff]  ;;  %v832_v1 = vrot.slane %v785_v19, 7  ;;  %v896_v63 = vrot.slane %v861_v53, %v6306_v13  ;;  %v906_v5 = vcombine.high %v830_v52, %v830_v52 }
  0x46   : > { %v6591_v2 = vrot.slane %v786_v23, 7  ;;  %v3123_v8 = vpack.c.bf16 %v3117_v62, %v3116_v61  ;;  %5340 = vmatprep.mubr.msk.bf16.mxu1 %vm6157_vm1, %v6156_v0  ;;  %v2011_v55 = vrot.slane %v1997_v56, %v6306_v13  ;;  %v903_v26 = vrot.slane %v889_v3, %v6306_v13  ;;  %v745_v61 = vld [vmem:[%s6513_s29 + $0x18] sm:$0xff]  ;;  %v746_v62 = vld [vmem:[%s6513_s29 + $0x20] sm:$0xff] }
  0x47   : > { %v862_v59 = vsel %vm827_vm2, 0.0, %v831_v58  ;;  %v833_v6 = vsel %vm827_vm2, %v831_v58, %v832_v1  ;;  %v869_v9 = vsel %vm827_vm2, %v832_v1, 0.0  ;;  %v904_v31 = vcombine.high %v896_v63, %v896_v63 }
  0x48   : > { %v6601_v7 = vsel %vm827_vm2, 0.0, %v6591_v2  ;;  %v930_v10 = vcombine.high %v862_v59, %v862_v59  ;;  %5539 = vmatmul.mubr.msk.bf16.gmra.mrb[8].mxu0 %vm2053_vm4, %v3123_v8  ;;  %v3118_v11 = vld [vmem:[#allocation3 + $0x43] sm:$0xff]  ;;  %v2012_v12 = vcombine.low %v2004_v57, %v2011_v55  ;;  %v937_v14 = vrot.slane %v862_v59, %v6306_v13 }
  0x49   : > { %v947_v16 = vcombine.high %v833_v6, %v833_v6  ;;  %v954_v17 = vrot.slane %v833_v6, %v6306_v13  ;;  %5542 = vmatprep.mubr.msk.bf16.mxu0 %vm6157_vm1, %v6156_v0  ;;  %v3119_v18 = vld [vmem:[#allocation3 + $0x4b] sm:$0xff]  ;;  %v970_v21 = vrot.slane %v869_v9, %v6306_v13  ;;  %v978_v22 = vrot.slane %v6601_v7, %v6306_v13 }
  0x4a   : > { %v944_v20 = vrot.slane %v930_v10, %v6306_v13  ;;  %v3124_v30 = vpack.c.bf16 %v3119_v18, %v3118_v11  ;;  %2065 = vst.msk [vmem:[#allocation3 + $0x58] sm:$0xff] %vm2053_vm4, %v2012_v12  ;;  %v945_v34 = vcombine.high %v937_v14, %v937_v14  ;;  %v1210_v24 = vcombine.low %v929_v45, %v937_v14  ;;  %v747_v59 = vld [vmem:[%s6513_s29 + $0x28] sm:$0xff]  ;;  %v749_v12 = vld [vmem:[%s6513_s29 + $0x38] sm:$0xff]  ;;  %v752_v14 = vld [vmem:[%s6632_s20] sm:$0xff] }
  0x4b   : > { %v961_v49 = vrot.slane %v947_v16, %v6306_v13  ;;  %v962_v27 = vcombine.high %v954_v17, %v954_v17  ;;  %v986_v60 = vcombine.high %v978_v22, %v978_v22  ;;  %v905_v36 = vcombine.high %v903_v26, %v903_v26 }
  0x4c   : > { %v946_v32 = vcombine.high %v944_v20, %v944_v20  ;;  %v1211_v33 = vcombine.low %v945_v34, %v944_v20  ;;  %v1218_v37 = vrot.slane %v1210_v24, %v6306_v13  ;;  %v913_v44 = vrot.slane %v830_v52, %v6306_v13  ;;  %v2094_v34 = vld [vmem:[#allocation3 + $0x40] sm:$0xff] }
  0x4d   : > { %v963_v15 = vcombine.high %v961_v49, %v961_v49  ;;  %v1228_v35 = vcombine.low %v962_v27, %v961_v49  ;;  %5341 = vmatmul.mubr.msk.bf16.gmra.mrb[8].mxu1 %vm2053_vm4, %v2097_v41  ;;  %v1245_v43 = vcombine.low %v978_v22, %v986_v60  ;;  %v920_v28 = vrot.slane %v906_v5, %v6306_v13  ;;  %v748_v5 = vld [vmem:[%s6513_s29 + $0x30] sm:$0xff]  ;;  %s7149_s29 = scalar_lea.vmem %s7262_s10, %s6287_s15  ;;  %s5089_s15 = sshll.u32 %s7289_s18, 2 }
  0x4e   : > { %v1227_v40 = vcombine.low %v946_v32, %v954_v17  ;;  %5344 = vmatprep.mubr.msk.bf16.mxu1 %vm6157_vm1, %v6156_v0  ;;  %v1225_v45 = vrot.slane %v1211_v33, %v6306_v13  ;;  %v921_v23 = vcombine.high %v913_v44, %v913_v44  ;;  %v1176_v52 = vcombine.low %v896_v63, %v904_v31  ;;  %s736_s30 = sadd.s32 %s5089_s15, %s7297_s17 }
  0x4f   : > { %v1242_v50 = vrot.slane %v1228_v35, %v6306_v13  ;;  %v1244_v51 = vcombine.low %v963_v15, %v970_v21  ;;  %v1259_v19 = vrot.slane %v1245_v43, %v6306_v13  ;;  %v922_v57 = vcombine.high %v920_v28, %v920_v28  ;;  %s5090_s3 = sshll.u32 %s736_s30, 1 }
  0x50   : > { %v1235_v41 = vrot.slane %v1227_v40, %v6306_v13  ;;  %5543 = vmatmul.mubr.msk.bf16.gmra.mrb[12].mxu0 %vm2053_vm4, %v3124_v30  ;;  %v1226_v53 = vcombine.low %v1218_v37, %v1225_v45  ;;  %v1177_v58 = vcombine.low %v903_v26, %v905_v36  ;;  %v1184_v63 = vrot.slane %v1176_v52, %v6306_v13 }
  0x51   : > { %v1252_v56 = vrot.slane %v1244_v51, %v6306_v13  ;;  %5546 = vmatprep.mubr.msk.bf16.mxu0 %vm6157_vm1, %v6156_v0  ;;  %v3120_v1 = vld [vmem:[#allocation3 + $0x53] sm:$0xff]  ;;  %v1193_v8 = vcombine.low %v913_v44, %v921_v23  ;;  %v765_v55 = vmul.f32 %v6364_v39, %v745_v61  ;;  %v1194_v11 = vcombine.low %v920_v28, %v922_v57 }
  0x52   : > { %v1243_v3 = vcombine.low %v1235_v41, %v1242_v50  ;;  %v3125_v6 = vpack.c.bf16 %v3120_v1, %v3120_v1  ;;  %1466 = vst.msk [vmem:[#allocation2 + $0x10] sm:$0xff] %vm1463_vm6, %v1226_v53  ;;  %v1191_v10 = vrot.slane %v1177_v58, %v6306_v13  ;;  %v766_v17 = vmul.f32 %v6364_v39, %v746_v62 }
  0x53   : > { %v1260_v9 = vcombine.low %v1252_v56, %v1259_v19  ;;  %v1201_v16 = vrot.slane %v1193_v8, %v6306_v13  ;;  %v779_v18 = vadd.f32 %v6371_v46, %v765_v55  ;;  %v971_v20 = vcombine.high %v6601_v7, %v6601_v7 }
  0x54   : > { %1467 = vst.msk [vmem:[#allocation2 + $0x18] sm:$0xff] %vm1463_vm6, %v1243_v3  ;;  %v1192_v21 = vcombine.low %v1184_v63, %v1191_v10  ;;  %v1208_v22 = vrot.slane %v1194_v11, %v6306_v13  ;;  %v767_v26 = vmul.f32 %v6364_v39, %v747_v59  ;;  %v768_v30 = vmul.f32 %v6364_v39, %v748_v5 }
  0x55   : > { %1468 = vst.msk [vmem:[#allocation2 + $0x20] sm:$0xff] %vm1463_vm6, %v1260_v9  ;;  %5345 = vmatmul.mubr.msk.bf16.gmra.mrb[12].mxu1 %vm2053_vm4, %v2098_v54  ;;  %v780_v49 = vadd.f32 %v6371_v46, %v766_v17  ;;  %v787_v27 = vmax.f32 %v779_v18, 0.0  ;;  %v985_v7 = vrot.slane %v971_v20, %v6306_v13  ;;  %v769_v32 = vmul.f32 %v6364_v39, %v749_v12 }
  0x56   : > { %5348 = vmatprep.mubr.msk.bf16.mxu1 %vm6157_vm1, %v6156_v0  ;;  %v1209_v60 = vcombine.low %v1201_v16, %v1208_v22  ;;  %1464 = vst.msk [vmem:[#allocation2] sm:$0xff] %vm1463_vm6, %v1192_v21  ;;  %v781_v24 = vadd.f32 %v6371_v46, %v767_v26  ;;  %v782_v42 = vadd.f32 %v6371_v46, %v768_v30  ;;  %v810_v35 = vstv %s6447_s26  ;;  %s738_s26 = scalar_lea.vmem %s7263_s11, %s5090_s3 }
  0x57   : > { %v798_v47 = vmul.f32 %v6364_v39, %v752_v14  ;;  %v788_v54 = vmax.f32 %v780_v49, 0.0  ;;  %v835_v31 = vrot.slane %v787_v27, 7  ;;  %v987_v15 = vcombine.high %v985_v7, %v985_v7 }
  0x58   : > { %v783_v33 = vadd.f32 %v6371_v46, %v769_v32  ;;  %5547 = vmatmul.mubr.msk.bf16.gmra.mrb[16].mxu0 %vm2053_vm4, %v3125_v6  ;;  %v2099_v36 = vpack.c.bf16 %v2094_v34, %v2094_v34  ;;  %1465 = vst.msk [vmem:[#allocation2 + $0x8] sm:$0xff] %vm1463_vm6, %v1209_v60  ;;  %v789_v37 = vmax.f32 %v781_v24, 0.0  ;;  %v790_v40 = vmax.f32 %v782_v42, 0.0 }
  0x59   : > { %5552 = vmatprep.mubr.msk.bf16.mxu0 %vm6157_vm1, %v6156_v0  ;;  %v836_v43 = vsel %vm827_vm2, %v6591_v2, %v835_v31  ;;  %v837_v44 = vrot.slane %v788_v54, 7  ;;  %v870_v45 = vsel %vm827_vm2, %v835_v31, 0.0  ;;  %v1261_v50 = vcombine.low %v985_v7, %v987_v15 }
  0x5a   : > { %v988_v28 = vcombine.high %v836_v43, %v836_v43  ;;  %v995_v61 = vrot.slane %v836_v43, %v6306_v13  ;;  %v1011_v41 = vrot.slane %v870_v45, %v6306_v13  ;;  %v838_v19 = vrot.slane %v789_v37, 7 }
  0x5b   : > { %v3233_v51 = vld [vmem:[#allocation2 + $0x14] sm:$0xff]  ;;  %v864_v52 = vsel %vm827_vm2, 0.0, %v837_v44  ;;  %v1269_v53 = vrot.slane %v1261_v50, %v6306_v13  ;;  %v791_v56 = vmax.f32 %v783_v33, 0.0  ;;  %v6683_v57 = vadd.f32 %v6371_v46, %v798_v47 }
  0x5c   : > { %v3234_v23 = vld [vmem:[#allocation2 + $0x1c] sm:$0xff]  ;;  %v1002_v58 = vrot.slane %v988_v28, %v6306_v13  ;;  %v1003_v62 = vcombine.high %v995_v61, %v995_v61  ;;  %v1019_v1 = vrot.slane %v864_v52, %v6306_v13  ;;  %vm6687_vm7 = vcmp.eq.s32.totalorder %v810_v35, 1 }
  0x5d   : > { %v3242_v2 = vpack.c.bf16 %v3234_v23, %v3233_v51  ;;  %5349 = vmatmul.mubr.msk.bf16.gmra.mrb[16].mxu1 %vm2053_vm4, %v2099_v36  ;;  %v2071_v63 = vld [vmem:[#allocation2] sm:$0xff]  ;;  %v839_v8 = vsel %vm827_vm2, %v837_v44, %v838_v19  ;;  %v871_v55 = vsel %vm827_vm2, %v838_v19, 0.0  ;;  %v1012_v59 = vcombine.high %v864_v52, %v864_v52  ;;  %v2073_v44 = vld [vmem:[#allocation2 + $0x10] sm:$0xff]  ;;  %v2074_v45 = vld [vmem:[#allocation2 + $0x18] sm:$0xff] }
  0x5e   : > { %v840_v5 = vrot.slane %v790_v40, 7  ;;  %5354 = vmatprep.mubr.msk.bf16.mxu1 %vm6157_vm1, %v6156_v0  ;;  %v1004_v6 = vcombine.high %v1002_v58, %v1002_v58  ;;  %v1262_v9 = vcombine.low %v995_v61, %v1003_v62  ;;  %v1279_v10 = vcombine.low %v1011_v41, %v1019_v1 }
  0x5f   : > { %v1027_v11 = vcombine.high %v1019_v1, %v1019_v1  ;;  %v2072_v12 = vld [vmem:[#allocation2 + $0x8] sm:$0xff]  ;;  %v1026_v14 = vrot.slane %v1012_v59, %v6306_v13  ;;  %v1029_v16 = vcombine.high %v839_v8, %v839_v8  ;;  %v1036_v17 = vrot.slane %v839_v8, %v6306_v13 }
  0x60   : > { %v1052_v18 = vrot.slane %v871_v55, %v6306_v13  ;;  %5553 = vmatmul.mubr.msk.bf16.vlgmr.msra.gmra.mrb[0].mxu0 %vm1463_vm6, %v3242_v2  ;;  %v2080_v20 = vpack.c.bf16 %v2072_v12, %v2071_v63  ;;  %v1276_v21 = vrot.slane %v1262_v9, %v6306_v13  ;;  %v1278_v22 = vcombine.low %v1002_v58, %v1004_v6  ;;  %v753_v59 = vld [vmem:[%s6632_s20 + $0x8] sm:$0xff] }
  0x61   : > { %v1293_v26 = vrot.slane %v1279_v10, %v6306_v13  ;;  %5573 = vmatpush3.bf16.msra.mxu0 %v6353_v38  ;;  %5556 = vmatprep.mubr.msk.bf16.mxu0 %vm6157_vm1, %v6156_v0  ;;  %v1028_v30 = vcombine.high %v1026_v14, %v1026_v14  ;;  %v1043_v34 = vrot.slane %v1029_v16, %v6306_v13  ;;  %v841_v27 = vrot.slane %v791_v56, 7 }
  0x62   : > { %v1044_v49 = vcombine.high %v1036_v17, %v1036_v17  ;;  %v1277_v7 = vcombine.low %v1269_v53, %v1276_v21  ;;  %v1286_v32 = vrot.slane %v1278_v22, %v6306_v13  ;;  %v1295_v60 = vcombine.low %v1027_v11, %v1026_v14  ;;  %5594 = vmatprep.subr.bf16.mxu0 %v6156_v0  ;;  %v2075_v22 = vld [vmem:[#allocation2 + $0x20] sm:$0xff] }
  0x63   : > { %v865_v24 = vsel %vm827_vm2, 0.0, %v840_v5  ;;  %v1045_v42 = vcombine.high %v1043_v34, %v1043_v34  ;;  %v1296_v47 = vcombine.low %v1028_v30, %v1036_v17  ;;  %v842_v38 = vsel %vm827_vm2, %v840_v5, %v841_v27 }
  0x64   : > { %v1312_v54 = vcombine.low %v1044_v49, %v1043_v34  ;;  %v1294_v31 = vcombine.low %v1286_v32, %v1293_v26  ;;  %1469 = vst.msk [vmem:[#allocation2 + $0x28] sm:$0xff] %vm1463_vm6, %v1277_v7  ;;  %v1303_v15 = vrot.slane %v1295_v60, %v6306_v13  ;;  %v1053_v33 = vcombine.high %v865_v24, %v865_v24 }
  0x65   : > { %v1060_v35 = vrot.slane %v865_v24, %v6306_v13  ;;  %5355 = vmatmul.mubr.msk.bf16.vlgmr.msra.gmra.mrb[0].mxu1 %vm1463_vm6, %v2080_v20  ;;  %v1310_v36 = vrot.slane %v1296_v47, %v6306_v13  ;;  %v1313_v37 = vcombine.low %v1045_v42, %v1052_v18  ;;  %v1070_v43 = vcombine.high %v842_v38, %v842_v38 }
  0x66   : > { %v1320_v40 = vrot.slane %v1312_v54, %v6306_v13  ;;  %5375 = vmatpush3.bf16.msra.mxu1 %v6339_v29  ;;  %1470 = vst.msk [vmem:[#allocation2 + $0x30] sm:$0xff] %vm1463_vm6, %v1294_v31  ;;  %5358 = vmatprep.mubr.msk.bf16.mxu1 %vm6157_vm1, %v6156_v0  ;;  %v1067_v50 = vrot.slane %v1053_v33, %v6306_v13  ;;  %v802_v61 = vmax.f32 %v6683_v57, 0.0  ;;  %v872_v23 = vsel %vm827_vm2, %v841_v27, 0.0 }
  0x67   : > { %v1068_v51 = vcombine.high %v1060_v35, %v1060_v35  ;;  %v1077_v28 = vrot.slane %v842_v38, %v6306_v13  ;;  %v1311_v41 = vcombine.low %v1303_v15, %v1310_v36  ;;  %v1327_v19 = vrot.slane %v1313_v37, %v6306_v13  ;;  %5396 = vmatprep.subr.bf16.mxu1 %v6156_v0 }
  0x68   : > { %v1084_v29 = vrot.slane %v1070_v43, %v6306_v13  ;;  %v1069_v52 = vcombine.high %v1067_v50, %v1067_v50  ;;  %v6729_v2 = vsel %vm6687_vm7, %v802_v61, 0.0  ;;  %v2081_v58 = vpack.c.bf16 %v2074_v45, %v2073_v44 }
  0x69   : > { %v1085_v53 = vcombine.high %v1077_v28, %v1077_v28  ;;  %v1329_v56 = vcombine.low %v1060_v35, %v1068_v51  ;;  %v1328_v62 = vcombine.low %v1320_v40, %v1327_v19  ;;  %1471 = vst.msk [vmem:[#allocation2 + $0x38] sm:$0xff] %vm1463_vm6, %v1311_v41  ;;  %v843_v1 = vrot.slane %v6729_v2, 7 }
  0x6a   : > { %v1086_v57 = vcombine.high %v1084_v29, %v1084_v29  ;;  %v1330_v63 = vcombine.low %v1067_v50, %v1069_v52  ;;  %v1093_v10 = vrot.slane %v872_v23, %v6306_v13  ;;  %v799_v20 = vmul.f32 %v6364_v39, %v753_v59 }
  0x6b   : > { %v1337_v8 = vrot.slane %v1329_v56, %v6306_v13  ;;  %v1346_v55 = vcombine.low %v1077_v28, %v1085_v53  ;;  %v3235_v5 = vld [vmem:[#allocation2 + $0x24] sm:$0xff]  ;;  %1472 = vst.msk [vmem:[#allocation2 + $0x40] sm:$0xff] %vm1463_vm6, %v1328_v62  ;;  %v866_v9 = vsel %vm827_vm2, 0.0, %v843_v1  ;;  %v846_v54 = vrot.slane %v6156_v0, 7 }
  0x6c   : > { %v1347_v6 = vcombine.low %v1084_v29, %v1086_v57  ;;  %v1344_v11 = vrot.slane %v1330_v63, %v6306_v13  ;;  %v1094_v14 = vcombine.high %v866_v9, %v866_v9  ;;  %v1101_v18 = vrot.slane %v866_v9, %v6306_v13  ;;  %v2076_v26 = vld [vmem:[#allocation2 + $0x28] sm:$0xff] }
  0x6d   : > { %v1354_v12 = vrot.slane %v1346_v55, %v6306_v13  ;;  %v3236_v16 = vld [vmem:[#allocation2 + $0x2c] sm:$0xff]  ;;  %5359 = vmatmul.mubr.msk.bf16.gmra.mrb[4].mxu1 %vm1463_vm6, %v2081_v58  ;;  %v2082_v39 = vpack.c.bf16 %v2076_v26, %v2075_v22  ;;  %v801_v47 = vadd.f32 %v6371_v46, %v799_v20  ;;  %v867_v33 = vsel %vm827_vm2, 0.0, %v846_v54  ;;  %v5174_v54 = vld [vmem:[%s7260_s8 + $0x18] sm:$0xf] }
  0x6e   : > { %v1361_v17 = vrot.slane %v1347_v6, %v6306_v13  ;;  %v6744_v21 = vpack.c.bf16 %v3236_v16, %v3235_v5  ;;  %5362 = vmatprep.mubr.msk.bf16.mxu1 %vm6157_vm1, %v6156_v0  ;;  %v1345_v30 = vcombine.low %v1337_v8, %v1344_v11  ;;  %v1108_v34 = vrot.slane %v1094_v14, %v6306_v13  ;;  %v2077_v37 = vld [vmem:[#allocation2 + $0x30] sm:$0xff]  ;;  %v1492_v62 = vld [vmem:[%s6507_s23 + $0x8] sm:$0xff] }
  0x6f   : > { %v1109_v27 = vcombine.high %v1101_v18, %v1101_v18  ;;  %v1363_v7 = vcombine.low %v1093_v10, %v1101_v18  ;;  %v803_v15 = vmax.f32 %v801_v47, 0.0  ;;  %v1142_v36 = vrot.slane %v867_v33, %v6306_v13 }
  0x70   : > { %v1362_v49 = vcombine.low %v1354_v12, %v1361_v17  ;;  %5557 = vmatmul.mubr.msk.bf16.gmra.mrb[4].mxu0 %vm1463_vm6, %v6744_v21  ;;  %v3237_v32 = vld [vmem:[#allocation2 + $0x34] sm:$0xff]  ;;  %1473 = vst.msk [vmem:[#allocation2 + $0x48] sm:$0xff] %vm1463_vm6, %v1345_v30  ;;  %v1110_v50 = vcombine.high %v1108_v34, %v1108_v34  ;;  %v1496_v10 = vsel %vm6687_vm7, %v1492_v62, 0.0  ;;  %v1784_v16 = vcombine.high %v6578_v48, %v6578_v48  ;;  %v2289_v48 = vld [vmem:[#allocation2 + $0x1] sm:$0xff]  ;;  %v2290_v30 = vld [vmem:[#allocation2 + $0x9] sm:$0xff] }
  0x71   : > { %5560 = vmatprep.mubr.msk.bf16.mxu0 %vm6157_vm1, %v6156_v0  ;;  %v1364_v60 = vcombine.low %v1109_v27, %v1108_v34  ;;  %v1371_v24 = vrot.slane %v1363_v7, %v6306_v13  ;;  %v2078_v40 = vld [vmem:[#allocation2 + $0x38] sm:$0xff]  ;;  %v813_v46 = vsel %vm6687_vm7, %v803_v15, 0.0  ;;  %v1150_v51 = vcombine.high %v1142_v36, %v1142_v36 }
  0x72   : > { %1474 = vst.msk [vmem:[#allocation2 + $0x50] sm:$0xff] %vm1463_vm6, %v1362_v49  ;;  %v3238_v42 = vld [vmem:[#allocation2 + $0x3c] sm:$0xff]  ;;  %v844_v44 = vrot.slane %v813_v46, 7  ;;  %v2083_v28 = vpack.c.bf16 %v2078_v40, %v2077_v37  ;;  %v1525_v14 = vrot.slane %v1496_v10, 7  ;;  %v3348_v7 = vld [vmem:[#allocation3 + $0x14] sm:$0xff]  ;;  %v2442_v47 = vsel %vm2122_vm0, %v6110_v4, 0 }
  0x73   : > { %v6758_v38 = vpack.c.bf16 %v3238_v42, %v3237_v32  ;;  %v1378_v31 = vrot.slane %v1364_v60, %v6306_v13  ;;  %v1398_v58 = vcombine.low %v1142_v36, %v1150_v51  ;;  %v2079_v57 = vld [vmem:[#allocation2 + $0x40] sm:$0xff]  ;;  %v3501_v37 = vsel %vm2213_vm3, %v5174_v54, 0  ;;  %v2291_v40 = vld [vmem:[#allocation2 + $0x11] sm:$0xff] }
  0x74   : > { %v845_v61 = vsel %vm827_vm2, %v843_v1, %v844_v44  ;;  %v873_v41 = vsel %vm827_vm2, %v844_v44, 0.0  ;;  %v2084_v9 = vpack.c.bf16 %v2079_v57, %v2079_v57  ;;  %v1526_v20 = vsel %vm827_vm2, %v1524_v25, %v1525_v14  ;;  %v3349_v32 = vld [vmem:[#allocation3 + $0x1c] sm:$0xff]  ;;  %v3350_v44 = vld [vmem:[#allocation3 + $0x24] sm:$0xff] }
  0x75   : > { %5363 = vmatmul.mubr.msk.bf16.gmra.mrb[8].mxu1 %vm1463_vm6, %v2082_v39  ;;  %v1379_v35 = vcombine.low %v1371_v24, %v1378_v31  ;;  %v1111_v29 = vcombine.high %v845_v61, %v845_v61  ;;  %v1118_v23 = vrot.slane %v845_v61, %v6306_v13  ;;  %v1134_v52 = vrot.slane %v873_v41, %v6306_v13  ;;  %v2292_v46 = vld [vmem:[#allocation2 + $0x19] sm:$0xff]  ;;  %v2294_v61 = vld [vmem:[#allocation2 + $0x29] sm:$0xff]  ;;  %v2412_v4 = vld [vmem:[#allocation3 + $0x41] sm:$0xff] }
  0x76   : > { %5366 = vmatprep.mubr.msk.bf16.mxu1 %vm6157_vm1, %v6156_v0  ;;  %v1412_v5 = vrot.slane %v1398_v58, %v6306_v13  ;;  %v1550_v3 = vsel %vm827_vm2, %v1525_v14, 0.0  ;;  %v1785_v22 = vcombine.high %v1526_v20, %v1526_v20  ;;  %v1792_v26 = vrot.slane %v1526_v20, %v6306_v13  ;;  %v3352_v41 = vld [vmem:[#allocation3 + $0x34] sm:$0xff]  ;;  %v3355_v58 = vld [vmem:[#allocation3 + $0x4c] sm:$0xff]  ;;  %v2408_v20 = vld [vmem:[#allocation3 + $0x21] sm:$0xff] }
  0x77   : > { %v3239_v43 = vld [vmem:[#allocation2 + $0x44] sm:$0xff]  ;;  %1475 = vst.msk [vmem:[#allocation2 + $0x58] sm:$0xff] %vm1463_vm6, %v1379_v35  ;;  %v1125_v53 = vrot.slane %v1111_v29, %v6306_v13  ;;  %v1126_v56 = vcombine.high %v1118_v23, %v1118_v23  ;;  %v1380_v2 = vcombine.low %v1110_v50, %v1118_v23  ;;  %v1808_v27 = vrot.slane %v1550_v3, %v6306_v13  ;;  %v3353_v29 = vld [vmem:[#allocation3 + $0x3c] sm:$0xff] }
  0x78   : > { %5561 = vmatmul.mubr.msk.bf16.gmra.mrb[8].mxu0 %vm1463_vm6, %v6758_v38  ;;  %v1799_v25 = vrot.slane %v1785_v22, %v6306_v13  ;;  %v1800_v34 = vcombine.high %v1792_v26, %v1792_v26  ;;  %v2013_v49 = vcombine.low %v1784_v16, %v1792_v26  ;;  %v2298_v39 = vpack.c.bf16 %v2290_v30, %v2289_v48  ;;  %v2406_v16 = vld [vmem:[#allocation3 + $0x11] sm:$0xff]  ;;  %v2409_v3 = vld [vmem:[#allocation3 + $0x29] sm:$0xff]  ;;  %v2411_v26 = vld [vmem:[#allocation3 + $0x39] sm:$0xff] }
  0x79   : > { %v3240_v45 = vld [vmem:[#allocation2 + $0x4c] sm:$0xff]  ;;  %5564 = vmatprep.mubr.msk.bf16.mxu0 %vm6157_vm1, %v6156_v0  ;;  %v1381_v1 = vcombine.low %v1126_v56, %v1125_v53  ;;  %v1388_v63 = vrot.slane %v1380_v2, %v6306_v13  ;;  %v1127_v8 = vcombine.high %v1125_v53, %v1125_v53  ;;  %v3357_v33 = vpack.c.bf16 %v3349_v32, %v3348_v7  ;;  %v2296_v56 = vld [vmem:[#allocation2 + $0x39] sm:$0xff]  ;;  %v3354_v2 = vld [vmem:[#allocation3 + $0x44] sm:$0xff] }
  0x7a   : > { %v6775_v19 = vpack.c.bf16 %v3240_v45, %v3239_v43  ;;  %v2014_v60 = vcombine.low %v1800_v34, %v1799_v25  ;;  %v2021_v24 = vrot.slane %v2013_v49, %v6306_v13  ;;  %v1801_v42 = vcombine.high %v1799_v25, %v1799_v25  ;;  %v3351_v45 = vld [vmem:[#allocation3 + $0x2c] sm:$0xff]  ;;  %v2529_v54 = vld [vmem:[#allocation2 + $0x22] sm:$0xff] }
  0x7b   : > { %v1395_v55 = vrot.slane %v1381_v1, %v6306_v13  ;;  %v1397_v59 = vcombine.low %v1127_v8, %v1134_v52  ;;  %v2299_v50 = vpack.c.bf16 %v2292_v46, %v2291_v40  ;;  %v6836_v51 = vpack.c.bf16 %v3351_v45, %v3350_v44  ;;  %v2295_v53 = vld [vmem:[#allocation2 + $0x31] sm:$0xff]  ;;  %v2297_v1 = vld [vmem:[#allocation2 + $0x41] sm:$0xff] }
  0x7c   : > { %v2028_v31 = vrot.slane %v2014_v60, %v6306_v13  ;;  %v2030_v15 = vcombine.low %v1801_v42, %v1808_v27  ;;  %v6845_v52 = vpack.c.bf16 %v3353_v29, %v3352_v41  ;;  %v2301_v62 = vpack.c.bf16 %v2296_v56, %v2295_v53  ;;  %v2410_v22 = vld [vmem:[#allocation3 + $0x31] sm:$0xff]  ;;  %v2528_v42 = vld [vmem:[#allocation2 + $0x1a] sm:$0xff]  ;;  %v6961_v46 = vld [vmem:[#allocation2 + $0x42] sm:$0xff] }
  0x7d   : > { %5367 = vmatmul.mubr.msk.bf16.gmra.mrb[12].mxu1 %vm1463_vm6, %v2083_v28  ;;  %v1396_v11 = vcombine.low %v1388_v63, %v1395_v55  ;;  %v1405_v12 = vrot.slane %v1397_v59, %v6306_v13  ;;  %v2293_v28 = vld [vmem:[#allocation2 + $0x21] sm:$0xff]  ;;  %v6854_v57 = vpack.c.bf16 %v3355_v58, %v3354_v2  ;;  %v6863_v63 = vld [vmem:[#allocation3 + $0x54] sm:$0xff]  ;;  %v2302_v8 = vpack.c.bf16 %v2297_v1, %v2297_v1  ;;  %v2526_v49 = vld [vmem:[#allocation2 + $0xa] sm:$0xff] }
  0x7e   : > { %5370 = vmatprep.mubr.msk.bf16.mxu1 %vm6157_vm1, %v6156_v0  ;;  %v6791_v6 = vld [vmem:[#allocation2 + $0x54] sm:$0xff]  ;;  %v2029_v35 = vcombine.low %v2021_v24, %v2028_v31  ;;  %v2037_v36 = vrot.slane %v2030_v15, %v6306_v13  ;;  %v2300_v23 = vpack.c.bf16 %v2294_v61, %v2293_v28  ;;  %v3361_v55 = vpack.c.bf16 %v6863_v63, %v6863_v63  ;;  %v2404_v59 = vld [vmem:[#allocation3 + $0x1] sm:$0xff]  ;;  %v2530_v31 = vld [vmem:[#allocation2 + $0x2a] sm:$0xff] }
  0x7f   : > { %v3246_v17 = vpack.c.bf16 %v6791_v6, %v6791_v6  ;;  %1476 = vst.msk [vmem:[#allocation2 + $0x60] sm:$0xff] %vm1463_vm6, %v1396_v11  ;;  %v1413_v18 = vcombine.low %v1405_v12, %v1412_v5  ;;  %v6111_v11 = vld [vmem:[%s7261_s9 + $0x30] sm:$0x3f]   ;;  %v2416_v30 = vpack.c.bf16 %v2411_v26, %v2410_v22  ;;  %v6944_v15 = vpack.c.bf16 %v2530_v31, %v2529_v54  ;;  %v5132_v28 = vld [vmem:[%s7260_s8 + $0xc] sm:$0xf]  ;;  %v2643_v58 = vld [vmem:[#allocation3 + $0x1a] sm:$0xff] }
  0x80   : > { %5565 = vmatmul.mubr.msk.bf16.gmra.mrb[12].mxu0 %vm1463_vm6, %v6775_v19  ;;  %2066 = vst.msk [vmem:[#allocation3 + $0x60] sm:$0xff] %vm2053_vm4, %v2029_v35  ;;  %v2038_v43 = vcombine.low %v2037_v36, %v1412_v5  ;;  %v2405_v5 = vld [vmem:[#allocation3 + $0x9] sm:$0xff]  ;;  %v3622_v14 = vsel %vm2122_vm0, %v6111_v11, 0  ;;  %v2527_v24 = vld [vmem:[#allocation2 + $0x12] sm:$0xff]  ;;  %v2532_v35 = vld [vmem:[#allocation2 + $0x3a] sm:$0xff]  ;;  %v2538_v44 = vpack.c.bf16 %v6961_v46, %v6961_v46 }
  0x81   : > { %5568 = vmatprep.mubr.msk.bf16.mxu0 %vm6157_vm1, %v6156_v0  ;;  %1477 = vst.msk [vmem:[#allocation2 + $0x68] sm:$0xff] %vm1463_vm6, %v1413_v18  ;;  %v2413_v10 = vpack.c.bf16 %v2405_v5, %v2404_v59  ;;  %v6112_v27 = vld [vmem:[%s7261_s9 + $0x10] sm:$0x3f]   ;;  %v3705_v61 = vld [vmem:[#allocation2 + $0x25] sm:$0xff]  ;;  %v6114_v26 = vld [vmem:[%s7261_s9 + $0x18] sm:$0x3f]  }
  0x82   : > { %2067 = vst.msk [vmem:[#allocation3 + $0x68] sm:$0xff] %vm2053_vm4, %v2038_v43  ;;  %v2678_v32 = vsel %vm2122_vm0, %v6112_v27, 0  ;;  %v3706_v41 = vld [vmem:[#allocation2 + $0x2d] sm:$0xff]  ;;  %v3709_v59 = vld [vmem:[#allocation2 + $0x45] sm:$0xff] }
  0x83   : > { %v3714_v53 = vpack.c.bf16 %v3706_v41, %v3705_v61  ;;  %v2642_v2 = vld [vmem:[#allocation3 + $0x12] sm:$0xff]  ;;  %v3824_v27 = vld [vmem:[#allocation3 + $0x45] sm:$0xff] }
  0x84   : > { %v6989_v1 = vpack.c.bf16 %v2643_v58, %v2642_v2  ;;  %v3710_v5 = vld [vmem:[#allocation2 + $0x4d] sm:$0xff] }
  0x85   : > { %5371 = vmatmul.mubr.msk.bf16.gmra.mrb[16].mxu1 %vm1463_vm6, %v2084_v9  ;;  %v5118_v9 = vld [vmem:[%s7260_s8 + $0x8] sm:$0xf]  ;;  %v2646_v11 = vld [vmem:[#allocation3 + $0x32] sm:$0xff] }
  0x86   : > { %5376 = vmatprep.mubr.msk.bf16.mxu1 %vm6157_vm1, %v6156_v0  ;;  %v2557_v12 = vsel %vm2213_vm3, %v5118_v9, 0  ;;  %v3476_v48 = vld [vmem:[#allocation2 + $0x5c] sm:$0xff]  ;;  %v2769_v54 = vld [vmem:[#allocation2 + $0x52] sm:$0xff] }
  0x87   : > { %v3591_v36 = vld [vmem:[#allocation3 + $0x5c] sm:$0xff]  ;;  %v3946_v61 = vld [vmem:[#allocation2 + $0x4e] sm:$0xff] }
  0x88   : > { %5569 = vmatmul.mubr.msk.bf16.gmra.mrb[16].mxu0 %vm1463_vm6, %v3246_v17  ;;  %v2407_v17 = vld [vmem:[#allocation3 + $0x19] sm:$0xff]  ;;  %v3477_v25 = vld [vmem:[#allocation2 + $0x64] sm:$0xff]  ;;  %v3596_v40 = vpack.c.bf16 %v3591_v36, %v6863_v63 }
  0x89   : > { %5574 = vmatprep.mubr.msk.bf16.mxu0 %vm6157_vm1, %v6156_v0  ;;  %v2414_v18 = vpack.c.bf16 %v2407_v17, %v2406_v16  ;;  %v3482_v34 = vpack.c.bf16 %v3477_v25, %v3477_v25  ;;  %v3592_v43 = vld [vmem:[#allocation3 + $0x64] sm:$0xff]  ;;  %v2884_v2 = vld [vmem:[#allocation3 + $0x52] sm:$0xff] }
  0x8a   : > { %v3597_v45 = vpack.c.bf16 %v3592_v43, %v3592_v43  ;;  %v3712_v16 = vld [vmem:[#allocation2 + $0x5d] sm:$0xff]  ;;  %v3828_v31 = vld [vmem:[#allocation3 + $0x65] sm:$0xff] }
  0x8b   : > { %v3941_v36 = vld [vmem:[#allocation2 + $0x26] sm:$0xff] }
  0x8c   : > { %v3949_v58 = vld [vmem:[#allocation2 + $0x66] sm:$0xff] }
  0x8d   : > { %5377 = vmatmul.mubr.msk.bf16.vlgmr.msra.gmra.mrb[0].mxu1 %vm1463_vm6, %v2298_v39  ;;  %v5188_v39 = vld [vmem:[%s7260_s8 + $0x1c] sm:$0xf] }
  0x8e   : > { %5397 = vmatpush3.bf16.msra.mxu1 %v2442_v47  ;;  %5380 = vmatprep.mubr.msk.bf16.mxu1 %vm6157_vm1, %v6156_v0  ;;  %v3737_v60 = vsel %vm2213_vm3, %v5188_v39, 0  ;;  %v6933_v47 = vpack.c.bf16 %v2528_v42, %v2527_v24  ;;  %v2768_v39 = vld [vmem:[#allocation2 + $0x4a] sm:$0xff]  ;;  %v3827_v24 = vld [vmem:[#allocation3 + $0x5d] sm:$0xff] }
  0x8f   : > { %5418 = vmatprep.subr.bf16.mxu1 %v6156_v0  ;;  %v2773_v42 = vpack.c.bf16 %v2768_v39, %v6961_v46 }
  0x90   : > { %5575 = vmatmul.mubr.msk.bf16.vlgmr.msra.gmra.mrb[0].mxu0 %vm2053_vm4, %v3357_v33  ;;  %v2531_v33 = vld [vmem:[#allocation2 + $0x32] sm:$0xff] }
  0x91   : > { %5595 = vmatpush3.bf16.msra.mxu0 %v3501_v37  ;;  %5578 = vmatprep.mubr.msk.bf16.mxu0 %vm6157_vm1, %v6156_v0  ;;  %v6954_v37 = vpack.c.bf16 %v2532_v35, %v2531_v33  ;;  %v3833_v33 = vpack.c.bf16 %v3828_v31, %v3828_v31  ;;  %v5146_v35 = vld [vmem:[%s7260_s8 + $0x10] sm:$0xf] }
  0x92   : > { %5616 = vmatprep.subr.bf16.mxu0 %v6156_v0  ;;  %v3029_v46 = vsel %vm2213_vm3, %v5146_v35, 0 }
  0x95   : > { %5381 = vmatmul.mubr.msk.bf16.gmra.mrb[4].mxu1 %vm1463_vm6, %v2299_v50  ;;  %v2640_v50 = vld [vmem:[#allocation3 + $0x2] sm:$0xff] }
  0x96   : > { %5384 = vmatprep.mubr.msk.bf16.mxu1 %vm6157_vm1, %v6156_v0 }
  0x98   : > { %5579 = vmatmul.mubr.msk.bf16.gmra.mrb[4].mxu0 %vm2053_vm4, %v6836_v51 }
  0x99   : > { %5582 = vmatprep.mubr.msk.bf16.mxu0 %vm6157_vm1, %v6156_v0 }
  0x9d   : > { %5385 = vmatmul.mubr.msk.bf16.gmra.mrb[8].mxu1 %vm1463_vm6, %v2300_v23  ;;  %v6113_v23 = vld [vmem:[%s7261_s9 + $0x38] sm:$0x3f]  }
  0x9e   : > { %5388 = vmatprep.mubr.msk.bf16.mxu1 %vm6157_vm1, %v6156_v0  ;;  %v3858_v56 = vsel %vm2122_vm0, %v6113_v23, 0  ;;  %v3947_v23 = vld [vmem:[#allocation2 + $0x56] sm:$0xff] }
  0xa0   : > { %5583 = vmatmul.mubr.msk.bf16.gmra.mrb[8].mxu0 %vm2053_vm4, %v6845_v52 }
  0xa1   : > { %5586 = vmatprep.mubr.msk.bf16.mxu0 %vm6157_vm1, %v6156_v0 }
  0xa5   : > { %5389 = vmatmul.mubr.msk.bf16.gmra.mrb[12].mxu1 %vm1463_vm6, %v2301_v62  ;;  %v3707_v62 = vld [vmem:[#allocation2 + $0x35] sm:$0xff] }
  0xa6   : > { %5392 = vmatprep.mubr.msk.bf16.mxu1 %vm6157_vm1, %v6156_v0 }
  0xa8   : > { %5587 = vmatmul.mubr.msk.bf16.gmra.mrb[12].mxu0 %vm2053_vm4, %v6854_v57 }
  0xa9   : > { %5590 = vmatprep.mubr.msk.bf16.mxu0 %vm6157_vm1, %v6156_v0 }
  0xad   : > { %5393 = vmatmul.mubr.msk.bf16.gmra.mrb[16].mxu1 %vm1463_vm6, %v2302_v8  ;;  %v2644_v8 = vld [vmem:[#allocation3 + $0x22] sm:$0xff] }
  0xae   : > { %5398 = vmatprep.mubr.msk.bf16.mxu1 %vm6157_vm1, %v6156_v0 }
  0xb0   : > { %5591 = vmatmul.mubr.msk.bf16.gmra.mrb[16].mxu0 %vm2053_vm4, %v3361_v55  ;;  %v2645_v55 = vld [vmem:[#allocation3 + $0x2a] sm:$0xff] }
  0xb1   : > { %5596 = vmatprep.mubr.msk.bf16.mxu0 %vm6157_vm1, %v6156_v0  ;;  %v6999_v9 = vpack.c.bf16 %v2645_v55, %v2644_v8  ;;  %v4056_v8 = vld [vmem:[#allocation3 + $0x26] sm:$0xff]  ;;  %v4057_v55 = vld [vmem:[#allocation3 + $0x2e] sm:$0xff] }
  0xb5   : > { %5399 = vmatmul.mubr.msk.bf16.vlgmr.msra.gmra.mrb[0].mxu1 %vm2053_vm4, %v2413_v10  ;;  %v3716_v10 = vpack.c.bf16 %v3710_v5, %v3709_v59  ;;  %v4065_v5 = vpack.c.bf16 %v4057_v55, %v4056_v8 }
  0xb6   : > { %5419 = vmatpush3.bf16.msra.mxu1 %v2557_v12  ;;  %5402 = vmatprep.mubr.msk.bf16.mxu1 %vm6157_vm1, %v6156_v0  ;;  %v2647_v12 = vld [vmem:[#allocation3 + $0x3a] sm:$0xff] }
  0xb7   : > { %5440 = vmatprep.subr.bf16.mxu1 %v6156_v0  ;;  %v7008_v17 = vpack.c.bf16 %v2647_v12, %v2646_v11  ;;  %v4058_v11 = vld [vmem:[#allocation3 + $0x36] sm:$0xff]  ;;  %v4059_v12 = vld [vmem:[#allocation3 + $0x3e] sm:$0xff] }
  0xb8   : > { %5597 = vmatmul.mubr.msk.bf16.vlgmr.msra.gmra.mrb[0].mxu0 %vm1463_vm6, %v6744_v21  ;;  %v2415_v21 = vpack.c.bf16 %v2409_v3, %v2408_v20  ;;  %v7014_v20 = vld [vmem:[#allocation3 + $0x42] sm:$0xff] }
  0xb9   : > { %5617 = vmatpush3.bf16.msra.mxu0 %v3622_v14  ;;  %5600 = vmatprep.mubr.msk.bf16.mxu0 %vm6157_vm1, %v6156_v0  ;;  %v3711_v14 = vld [vmem:[#allocation2 + $0x55] sm:$0xff]  ;;  %v3713_v3 = vld [vmem:[#allocation2 + $0x65] sm:$0xff] }
  0xba   : > { %5638 = vmatprep.subr.bf16.mxu0 %v6156_v0  ;;  %v3718_v22 = vpack.c.bf16 %v3713_v3, %v3713_v3  ;;  %v4061_v3 = vld [vmem:[#allocation3 + $0x4e] sm:$0xff] }
  0xbd   : > { %5403 = vmatmul.mubr.msk.bf16.gmra.mrb[4].mxu1 %vm2053_vm4, %v2414_v18  ;;  %v3717_v18 = vpack.c.bf16 %v3712_v16, %v3711_v14  ;;  %v4066_v16 = vpack.c.bf16 %v4059_v12, %v4058_v11 }
  0xbe   : > { %5406 = vmatprep.mubr.msk.bf16.mxu1 %vm6157_vm1, %v6156_v0 }
  0xc0   : > { %5601 = vmatmul.mubr.msk.bf16.gmra.mrb[4].mxu0 %vm1463_vm6, %v6758_v38  ;;  %v3481_v38 = vpack.c.bf16 %v3476_v48, %v6791_v6  ;;  %v2525_v6 = vld [vmem:[#allocation2 + $0x2] sm:$0xff] }
  0xc1   : > { %5604 = vmatprep.mubr.msk.bf16.mxu0 %vm6157_vm1, %v6156_v0  ;;  %v2534_v7 = vpack.c.bf16 %v2526_v49, %v2525_v6  ;;  %v3820_v48 = vld [vmem:[#allocation3 + $0x25] sm:$0xff]  ;;  %v3823_v6 = vld [vmem:[#allocation3 + $0x3d] sm:$0xff] }
  0xc5   : > { %5407 = vmatmul.mubr.msk.bf16.gmra.mrb[8].mxu1 %vm2053_vm4, %v2415_v21  ;;  %v2653_v21 = vpack.c.bf16 %v7014_v20, %v7014_v20 }
  0xc6   : > { %5410 = vmatprep.mubr.msk.bf16.mxu1 %vm6157_vm1, %v6156_v0 }
  0xc8   : > { %5605 = vmatmul.mubr.msk.bf16.gmra.mrb[8].mxu0 %vm1463_vm6, %v6775_v19  ;;  %v2417_v19 = vpack.c.bf16 %v2412_v4, %v2412_v4  ;;  %v5202_v4 = vld [vmem:[%s7260_s8 + $0x20] sm:$0xf] }
  0xc9   : > { %5608 = vmatprep.mubr.msk.bf16.mxu0 %vm6157_vm1, %v6156_v0 }
  0xcd   : > { %5411 = vmatmul.mubr.msk.bf16.gmra.mrb[12].mxu1 %vm2053_vm4, %v2416_v30  ;;  %v3821_v30 = vld [vmem:[#allocation3 + $0x2d] sm:$0xff] }
  0xce   : > { %5414 = vmatprep.mubr.msk.bf16.mxu1 %vm6157_vm1, %v6156_v0  ;;  %v3829_v25 = vpack.c.bf16 %v3821_v30, %v3820_v48  ;;  %v3004_v48 = vld [vmem:[#allocation2 + $0x4b] sm:$0xff]  ;;  %v4062_v30 = vld [vmem:[#allocation3 + $0x56] sm:$0xff] }
  0xd0   : > { %5609 = vmatmul.mubr.msk.bf16.gmra.mrb[12].mxu0 %vm1463_vm6, %v3481_v38  ;;  %v2914_v38 = vsel %vm2122_vm0, %v6114_v26, 0  ;;  %v3003_v26 = vld [vmem:[#allocation2 + $0x43] sm:$0xff] }
  0xd1   : > { %5612 = vmatprep.mubr.msk.bf16.mxu0 %vm6157_vm1, %v6156_v0 }
  0xd5   : > { %5415 = vmatmul.mubr.msk.bf16.gmra.mrb[16].mxu1 %vm2053_vm4, %v2417_v19  ;;  %v3973_v19 = vsel %vm2213_vm3, %v5202_v4, 0  ;;  %v3009_v4 = vpack.c.bf16 %v3004_v48, %v3003_v26 }
  0xd6   : > { %5420 = vmatprep.mubr.msk.bf16.mxu1 %vm6157_vm1, %v6156_v0 }
  0xd8   : > { %5613 = vmatmul.mubr.msk.bf16.gmra.mrb[16].mxu0 %vm1463_vm6, %v3482_v34  ;;  %v3822_v34 = vld [vmem:[#allocation3 + $0x35] sm:$0xff] }
  0xd9   : > { %5618 = vmatprep.mubr.msk.bf16.mxu0 %vm6157_vm1, %v6156_v0  ;;  %v3830_v49 = vpack.c.bf16 %v3823_v6, %v3822_v34  ;;  %v4064_v34 = vld [vmem:[#allocation3 + $0x66] sm:$0xff] }
  0xdd   : > { %5421 = vmatmul.mubr.msk.bf16.vlgmr.msra.gmra.mrb[0].mxu1 %vm1463_vm6, %v2534_v7  ;;  %v3825_v7 = vld [vmem:[#allocation3 + $0x4d] sm:$0xff] }
  0xde   : > { %5441 = vmatpush3.bf16.msra.mxu1 %v2678_v32  ;;  %5424 = vmatprep.mubr.msk.bf16.mxu1 %vm6157_vm1, %v6156_v0  ;;  %v3831_v32 = vpack.c.bf16 %v3825_v7, %v3824_v27 }
  0xdf   : > { %5462 = vmatprep.subr.bf16.mxu1 %v6156_v0 }
  0xe0   : > { %5619 = vmatmul.mubr.msk.bf16.vlgmr.msra.gmra.mrb[0].mxu0 %vm2053_vm4, %v6836_v51  ;;  %v2641_v51 = vld [vmem:[#allocation3 + $0xa] sm:$0xff] }
  0xe1   : > { %5639 = vmatpush3.bf16.msra.mxu0 %v3737_v60  ;;  %5622 = vmatprep.mubr.msk.bf16.mxu0 %vm6157_vm1, %v6156_v0  ;;  %v2649_v29 = vpack.c.bf16 %v2641_v51, %v2640_v50  ;;  %v3826_v60 = vld [vmem:[#allocation3 + $0x55] sm:$0xff]  ;;  %v3944_v50 = vld [vmem:[#allocation2 + $0x3e] sm:$0xff] }
  0xe2   : > { %5660 = vmatprep.subr.bf16.mxu0 %v6156_v0 }
  0xe5   : > { %5425 = vmatmul.mubr.msk.bf16.gmra.mrb[4].mxu1 %vm1463_vm6, %v6933_v47 }
  0xe6   : > { %5428 = vmatprep.mubr.msk.bf16.mxu1 %vm6157_vm1, %v6156_v0 }
  0xe8   : > { %5623 = vmatmul.mubr.msk.bf16.gmra.mrb[4].mxu0 %vm2053_vm4, %v6845_v52  ;;  %v2793_v52 = vsel %vm2213_vm3, %v5132_v28, 0  ;;  %v3945_v28 = vld [vmem:[#allocation2 + $0x46] sm:$0xff] }
  0xe9   : > { %5626 = vmatprep.mubr.msk.bf16.mxu0 %vm6157_vm1, %v6156_v0  ;;  %v3952_v41 = vpack.c.bf16 %v3946_v61, %v3945_v28 }
  0xed   : > { %5429 = vmatmul.mubr.msk.bf16.gmra.mrb[8].mxu1 %vm1463_vm6, %v6944_v15 }
  0xee   : > { %5432 = vmatprep.mubr.msk.bf16.mxu1 %vm6157_vm1, %v6156_v0 }
  0xf0   : > { %5627 = vmatmul.mubr.msk.bf16.gmra.mrb[8].mxu0 %vm2053_vm4, %v6854_v57  ;;  %v3708_v57 = vld [vmem:[#allocation2 + $0x3d] sm:$0xff] }
  0xf1   : > { %5630 = vmatprep.mubr.msk.bf16.mxu0 %vm6157_vm1, %v6156_v0  ;;  %v3715_v63 = vpack.c.bf16 %v3708_v57, %v3707_v62  ;;  %v2889_v62 = vpack.c.bf16 %v2884_v2, %v2884_v2  ;;  %v3954_v57 = vpack.c.bf16 %v3949_v58, %v3949_v58 }
  0xf5   : > { %5433 = vmatmul.mubr.msk.bf16.gmra.mrb[12].mxu1 %vm1463_vm6, %v6954_v37 }
  0xf6   : > { %5436 = vmatprep.mubr.msk.bf16.mxu1 %vm6157_vm1, %v6156_v0 }
  0xf8   : > { %5631 = vmatmul.mubr.msk.bf16.gmra.mrb[12].mxu0 %vm2053_vm4, %v3596_v40  ;;  %v6115_v40 = vld [vmem:[%s7261_s9 + $0x40] sm:$0x3f]  }
  0xf9   : > { %5634 = vmatprep.mubr.msk.bf16.mxu0 %vm6157_vm1, %v6156_v0 }
  0xfd   : > { %5437 = vmatmul.mubr.msk.bf16.gmra.mrb[16].mxu1 %vm1463_vm6, %v2538_v44  ;;  %v4094_v44 = vsel %vm2122_vm0, %v6115_v40, 0 }
  0xfe   : > { %5442 = vmatprep.mubr.msk.bf16.mxu1 %vm6157_vm1, %v6156_v0 }
 0x100   : > { %5635 = vmatmul.mubr.msk.bf16.gmra.mrb[16].mxu0 %vm2053_vm4, %v3597_v45  ;;  %v3943_v45 = vld [vmem:[#allocation2 + $0x36] sm:$0xff] }
 0x101   : > { %5640 = vmatprep.mubr.msk.bf16.mxu0 %vm6157_vm1, %v6156_v0  ;;  %v3951_v51 = vpack.c.bf16 %v3944_v50, %v3943_v45 }
 0x105   : > { %5443 = vmatmul.mubr.msk.bf16.vlgmr.msra.gmra.mrb[0].mxu1 %vm2053_vm4, %v2649_v29  ;;  %v2883_v29 = vld [vmem:[#allocation3 + $0x4a] sm:$0xff] }
 0x106   : > { %5463 = vmatpush3.bf16.msra.mxu1 %v2793_v52  ;;  %5446 = vmatprep.mubr.msk.bf16.mxu1 %vm6157_vm1, %v6156_v0  ;;  %v3948_v52 = vld [vmem:[#allocation2 + $0x5e] sm:$0xff] }
 0x107   : > { %5484 = vmatprep.subr.bf16.mxu1 %v6156_v0 }
 0x108   : > { %5641 = vmatmul.mubr.msk.bf16.vlgmr.msra.gmra.mrb[0].mxu0 %vm1463_vm6, %v3714_v53  ;;  %v2888_v53 = vpack.c.bf16 %v2883_v29, %v7014_v20  ;;  %v4060_v20 = vld [vmem:[#allocation3 + $0x46] sm:$0xff] }
 0x109   : > { %5661 = vmatpush3.bf16.msra.mxu0 %v3858_v56  ;;  %5644 = vmatprep.mubr.msk.bf16.mxu0 %vm6157_vm1, %v6156_v0  ;;  %v3953_v56 = vpack.c.bf16 %v3948_v52, %v3947_v23 }
 0x10a   : > { %5682 = vmatprep.subr.bf16.mxu0 %v6156_v0 }
 0x10d   : > { %5447 = vmatmul.mubr.msk.bf16.gmra.mrb[4].mxu1 %vm2053_vm4, %v6989_v1 }
 0x10e   : > { %5450 = vmatprep.mubr.msk.bf16.mxu1 %vm6157_vm1, %v6156_v0 }
 0x110   : > { %5645 = vmatmul.mubr.msk.bf16.gmra.mrb[4].mxu0 %vm1463_vm6, %v3715_v63  ;;  %v2998_v63 = vld [vmem:[#allocation2 + $0x1b] sm:$0xff] }
 0x111   : > { %5648 = vmatprep.mubr.msk.bf16.mxu0 %vm6157_vm1, %v6156_v0 }
 0x115   : > { %5451 = vmatmul.mubr.msk.bf16.gmra.mrb[8].mxu1 %vm2053_vm4, %v6999_v9 }
 0x116   : > { %5454 = vmatprep.mubr.msk.bf16.mxu1 %vm6157_vm1, %v6156_v0 }
 0x118   : > { %5649 = vmatmul.mubr.msk.bf16.gmra.mrb[8].mxu0 %vm1463_vm6, %v3716_v10  ;;  %v3000_v10 = vld [vmem:[#allocation2 + $0x2b] sm:$0xff] }
 0x119   : > { %5652 = vmatprep.mubr.msk.bf16.mxu0 %vm6157_vm1, %v6156_v0 }
 0x11d   : > { %5455 = vmatmul.mubr.msk.bf16.gmra.mrb[12].mxu1 %vm2053_vm4, %v7008_v17 }
 0x11e   : > { %5458 = vmatprep.mubr.msk.bf16.mxu1 %vm6157_vm1, %v6156_v0 }
 0x120   : > { %5653 = vmatmul.mubr.msk.bf16.gmra.mrb[12].mxu0 %vm1463_vm6, %v3717_v18  ;;  %v3002_v18 = vld [vmem:[#allocation2 + $0x3b] sm:$0xff] }
 0x121   : > { %5656 = vmatprep.mubr.msk.bf16.mxu0 %vm6157_vm1, %v6156_v0 }
 0x125   : > { %5459 = vmatmul.mubr.msk.bf16.gmra.mrb[16].mxu1 %vm2053_vm4, %v2653_v21 }
 0x126   : > { %5464 = vmatprep.mubr.msk.bf16.mxu1 %vm6157_vm1, %v6156_v0 }
 0x128   : > { %5657 = vmatmul.mubr.msk.bf16.gmra.mrb[16].mxu0 %vm1463_vm6, %v3718_v22  ;;  %v4067_v22 = vpack.c.bf16 %v4061_v3, %v4060_v20 }
 0x129   : > { %5662 = vmatprep.mubr.msk.bf16.mxu0 %vm6157_vm1, %v6156_v0 }
 0x12d   : > { %5465 = vmatmul.mubr.msk.bf16.vlgmr.msra.gmra.mrb[0].mxu1 %vm1463_vm6, %v6933_v47  ;;  %v3832_v47 = vpack.c.bf16 %v3827_v24, %v3826_v60 }
 0x12e   : > { %5485 = vmatpush3.bf16.msra.mxu1 %v2914_v38  ;;  %5468 = vmatprep.mubr.msk.bf16.mxu1 %vm6157_vm1, %v6156_v0  ;;  %v4063_v38 = vld [vmem:[#allocation3 + $0x5e] sm:$0xff] }
 0x12f   : > { %5506 = vmatprep.subr.bf16.mxu1 %v6156_v0 }
 0x130   : > { %5663 = vmatmul.mubr.msk.bf16.vlgmr.msra.gmra.mrb[0].mxu0 %vm2053_vm4, %v3829_v25  ;;  %v4068_v25 = vpack.c.bf16 %v4063_v38, %v4062_v30 }
 0x131   : > { %5683 = vmatpush3.bf16.msra.mxu0 %v3973_v19  ;;  %5666 = vmatprep.mubr.msk.bf16.mxu0 %vm6157_vm1, %v6156_v0  ;;  %v3005_v19 = vld [vmem:[#allocation2 + $0x53] sm:$0xff] }
 0x132   : > { %5704 = vmatprep.subr.bf16.mxu0 %v6156_v0  ;;  %v3010_v6 = vpack.c.bf16 %v3005_v19, %v3005_v19 }
 0x135   : > { %5469 = vmatmul.mubr.msk.bf16.gmra.mrb[4].mxu1 %vm1463_vm6, %v6944_v15  ;;  %v2774_v15 = vpack.c.bf16 %v2769_v54, %v2769_v54 }
 0x136   : > { %5472 = vmatprep.mubr.msk.bf16.mxu1 %vm6157_vm1, %v6156_v0 }
 0x138   : > { %5667 = vmatmul.mubr.msk.bf16.gmra.mrb[4].mxu0 %vm2053_vm4, %v3830_v49  ;;  %v4069_v49 = vpack.c.bf16 %v4064_v34, %v4064_v34 }
 0x139   : > { %5670 = vmatprep.mubr.msk.bf16.mxu0 %vm6157_vm1, %v6156_v0 }
 0x13d   : > { %5473 = vmatmul.mubr.msk.bf16.gmra.mrb[8].mxu1 %vm1463_vm6, %v6954_v37  ;;  %v3942_v37 = vld [vmem:[#allocation2 + $0x2e] sm:$0xff] }
 0x13e   : > { %5476 = vmatprep.mubr.msk.bf16.mxu1 %vm6157_vm1, %v6156_v0  ;;  %v3950_v43 = vpack.c.bf16 %v3942_v37, %v3941_v36 }
 0x140   : > { %5671 = vmatmul.mubr.msk.bf16.gmra.mrb[8].mxu0 %vm2053_vm4, %v3831_v32 }
 0x141   : > { %5674 = vmatprep.mubr.msk.bf16.mxu0 %vm6157_vm1, %v6156_v0 }
 0x145   : > { %5477 = vmatmul.mubr.msk.bf16.gmra.mrb[12].mxu1 %vm1463_vm6, %v2773_v42 }
 0x146   : > { %5480 = vmatprep.mubr.msk.bf16.mxu1 %vm6157_vm1, %v6156_v0 }
 0x148   : > { %5675 = vmatmul.mubr.msk.bf16.gmra.mrb[12].mxu0 %vm2053_vm4, %v3832_v47 }
 0x149   : > { %5678 = vmatprep.mubr.msk.bf16.mxu0 %vm6157_vm1, %v6156_v0 }
 0x14d   : > { %5481 = vmatmul.mubr.msk.bf16.gmra.mrb[16].mxu1 %vm1463_vm6, %v2774_v15 }
 0x14e   : > { %5486 = vmatprep.mubr.msk.bf16.mxu1 %vm6157_vm1, %v6156_v0 }
 0x150   : > { %5679 = vmatmul.mubr.msk.bf16.gmra.mrb[16].mxu0 %vm2053_vm4, %v3833_v33 }
 0x151   : > { %5684 = vmatprep.mubr.msk.bf16.mxu0 %vm6157_vm1, %v6156_v0 }
 0x155   : > { %5487 = vmatmul.mubr.msk.bf16.vlgmr.msra.gmra.mrb[0].mxu1 %vm2053_vm4, %v6989_v1  ;;  %v2997_v1 = vld [vmem:[#allocation2 + $0x13] sm:$0xff] }
 0x156   : > { %5507 = vmatpush3.bf16.msra.mxu1 %v3029_v46  ;;  %5490 = vmatprep.mubr.msk.bf16.mxu1 %vm6157_vm1, %v6156_v0  ;;  %v3006_v59 = vpack.c.bf16 %v2998_v63, %v2997_v1 }
 0x158   : > { %5685 = vmatmul.mubr.msk.bf16.vlgmr.msra.gmra.mrb[0].mxu0 %vm1463_vm6, %v3950_v43 }
 0x159   : > { %5705 = vmatpush3.bf16.msra.mxu0 %v4094_v44  ;;  %5688 = vmatprep.mubr.msk.bf16.mxu0 %vm6157_vm1, %v6156_v0 }
 0x15d   : > { %5491 = vmatmul.mubr.msk.bf16.gmra.mrb[4].mxu1 %vm2053_vm4, %v6999_v9  ;;  %v2999_v9 = vld [vmem:[#allocation2 + $0x23] sm:$0xff] }
 0x15e   : > { %5494 = vmatprep.mubr.msk.bf16.mxu1 %vm6157_vm1, %v6156_v0  ;;  %v3007_v14 = vpack.c.bf16 %v3000_v10, %v2999_v9 }
 0x160   : > { %5689 = vmatmul.mubr.msk.bf16.gmra.mrb[4].mxu0 %vm1463_vm6, %v3951_v51 }
 0x161   : > { %5692 = vmatprep.mubr.msk.bf16.mxu0 %vm6157_vm1, %v6156_v0 }
 0x165   : > { %5495 = vmatmul.mubr.msk.bf16.gmra.mrb[8].mxu1 %vm2053_vm4, %v7008_v17  ;;  %v3001_v17 = vld [vmem:[#allocation2 + $0x33] sm:$0xff] }
 0x166   : > { %5498 = vmatprep.mubr.msk.bf16.mxu1 %vm6157_vm1, %v6156_v0  ;;  %v3008_v21 = vpack.c.bf16 %v3002_v18, %v3001_v17 }
 0x168   : > { %5693 = vmatmul.mubr.msk.bf16.gmra.mrb[8].mxu0 %vm1463_vm6, %v3952_v41 }
 0x169   : > { %5696 = vmatprep.mubr.msk.bf16.mxu0 %vm6157_vm1, %v6156_v0 }
 0x16d   : > { %5499 = vmatmul.mubr.msk.bf16.gmra.mrb[12].mxu1 %vm2053_vm4, %v2888_v53 }
 0x16e   : > { %5502 = vmatprep.mubr.msk.bf16.mxu1 %vm6157_vm1, %v6156_v0 }
 0x170   : > { %5697 = vmatmul.mubr.msk.bf16.gmra.mrb[12].mxu0 %vm1463_vm6, %v3953_v56 }
 0x171   : > { %5700 = vmatprep.mubr.msk.bf16.mxu0 %vm6157_vm1, %v6156_v0 }
 0x175   : > { %5503 = vmatmul.mubr.msk.bf16.gmra.mrb[16].mxu1 %vm2053_vm4, %v2889_v62 }
 0x176   : > { %5508 = vmatprep.mubr.msk.bf16.mxu1 %vm6157_vm1, %v6156_v0 }
 0x178   : > { %5701 = vmatmul.mubr.msk.bf16.gmra.mrb[16].mxu0 %vm1463_vm6, %v3954_v57 }
 0x179   : > { %5706 = vmatprep.mubr.msk.bf16.mxu0 %vm6157_vm1, %v6156_v0 }
 0x17d   : > { %5509 = vmatmul.mubr.msk.bf16.vlgmr.msra.gmra.mrb[0].mxu1 %vm1463_vm6, %v3006_v59 }
 0x17e   : > { %5512 = vmatprep.mubr.msk.bf16.mxu1 %vm6157_vm1, %v6156_v0 }
 0x180   : > { %5707 = vmatmul.mubr.msk.bf16.vlgmr.msra.gmra.mrb[0].mxu0 %vm2053_vm4, %v4065_v5 }
 0x181   : > { %5710 = vmatprep.mubr.msk.bf16.mxu0 %vm6157_vm1, %v6156_v0 }
 0x185   : > { %5513 = vmatmul.mubr.msk.bf16.gmra.mrb[4].mxu1 %vm1463_vm6, %v3007_v14 }
 0x186   : > { %5516 = vmatprep.mubr.msk.bf16.mxu1 %vm6157_vm1, %v6156_v0 }
 0x188   : > { %5711 = vmatmul.mubr.msk.bf16.gmra.mrb[4].mxu0 %vm2053_vm4, %v4066_v16 }
 0x189   : > { %5714 = vmatprep.mubr.msk.bf16.mxu0 %vm6157_vm1, %v6156_v0 }
 0x18d   : > { %5517 = vmatmul.mubr.msk.bf16.gmra.mrb[8].mxu1 %vm1463_vm6, %v3008_v21 }
 0x18e   : > { %5520 = vmatprep.mubr.msk.bf16.mxu1 %vm6157_vm1, %v6156_v0 }
 0x190   : > { %5715 = vmatmul.mubr.msk.bf16.gmra.mrb[8].mxu0 %vm2053_vm4, %v4067_v22 }
 0x191   : > { %5718 = vmatprep.mubr.msk.bf16.mxu0 %vm6157_vm1, %v6156_v0 }
 0x195   : > { %5521 = vmatmul.mubr.msk.bf16.gmra.mrb[12].mxu1 %vm1463_vm6, %v3009_v4 }
 0x196   : > { %5524 = vmatprep.mubr.msk.bf16.mxu1 %vm6157_vm1, %v6156_v0 }
 0x198   : > { %5719 = vmatmul.mubr.msk.bf16.gmra.mrb[12].mxu0 %vm2053_vm4, %v4068_v25 }
 0x199   : > { %5722 = vmatprep.mubr.msk.bf16.mxu0 %vm6157_vm1, %v6156_v0 }
 0x19d   : > { %5525 = vmatmul.mubr.msk.bf16.gmra.mrb[16].mxu1 %vm1463_vm6, %v3010_v6 }
 0x1a0   : > { %5723 = vmatmul.mubr.msk.bf16.gmra.mrb[16].mxu0 %vm2053_vm4, %v4069_v49 }
 0x250   : > { %v3065_v27 = vpop.f32.mrb[0].mxu1 }
 0x251   : > { %v5510_v7 = vpop.f32.mrb[1].mxu1 }
 0x252   : > { %v3068_v32 = vpop.f32.mrb[2].mxu1 }
 0x253   : > { %v4130_v39 = vpop.f32.mrb[0].mxu0  ;;  %v5511_v60 = vpop.f32.mrb[3].mxu1 }
 0x254   : > { %v5708_v24 = vpop.f32.mrb[1].mxu0  ;;  %v5726_v42 = vadd.f32 %v4130_v39, %v3065_v27 }
 0x255   : > { %v4133_v47 = vpop.f32.mrb[2].mxu0 }
 0x256   : > { %v5709_v54 = vpop.f32.mrb[3].mxu0  ;;  %v4186_v31 = vcombine.high %v5726_v42, %v5726_v42  ;;  %v4193_v15 = vrot.slane %v5726_v42, %v6306_v13  ;;  %v5727_v0 = vadd.f32 %v4133_v47, %v3068_v32 }
 0x258   : > { %v4200_v33 = vrot.slane %v4186_v31, %v6306_v13  ;;  %v4201_v35 = vcombine.high %v4193_v15, %v4193_v15  ;;  %v4203_v36 = vcombine.high %v5727_v0, %v5727_v0  ;;  %v3073_v37 = vpop.f32.mrb[4].mxu1  ;;  %v4210_v40 = vrot.slane %v5727_v0, %v6306_v13 }
 0x259   : > { %v5514_v46 = vpop.f32.mrb[5].mxu1  ;;  %v4545_v45 = vmul.f32 %v4193_v15, %v4193_v15 }
 0x25a   : > { %v4202_v43 = vcombine.high %v4200_v33, %v4200_v33  ;;  %v4369_v44 = vcombine.low %v4193_v15, %v4201_v35  ;;  %v4546_v50 = vmul.f32 %v4201_v35, %v4201_v35  ;;  %v3076_v51 = vpop.f32.mrb[6].mxu1  ;;  %v4547_v28 = vmul.f32 %v4200_v33, %v4200_v33 }
 0x25b   : > { %v4217_v61 = vrot.slane %v4203_v36, %v6306_v13  ;;  %v4218_v41 = vcombine.high %v4210_v40, %v4210_v40  ;;  %v4138_v29 = vpop.f32.mrb[4].mxu0  ;;  %v5515_v23 = vpop.f32.mrb[7].mxu1  ;;  %v4549_v2 = vmul.f32 %v4210_v40, %v4210_v40 }
 0x25c   : > { %v4370_v52 = vcombine.low %v4200_v33, %v4202_v43  ;;  %v4548_v53 = vmul.f32 %v4202_v43, %v4202_v43  ;;  %v4609_v56 = vcombine.low %v4545_v45, %v4546_v50  ;;  %v5712_v58 = vpop.f32.mrb[5].mxu0  ;;  %v4377_v62 = vrot.slane %v4369_v44, %v6306_v13 }
 0x25d   : > { %v4219_v57 = vcombine.high %v4217_v61, %v4217_v61  ;;  %v4386_v1 = vcombine.low %v4210_v40, %v4218_v41  ;;  %v4550_v63 = vmul.f32 %v4218_v41, %v4218_v41  ;;  %v4141_v8 = vpop.f32.mrb[6].mxu0  ;;  %v4551_v5 = vmul.f32 %v4217_v61, %v4217_v61 }
 0x25e   : > { %v4384_v55 = vrot.slane %v4370_v52, %v6306_v13  ;;  %v4610_v59 = vcombine.low %v4547_v28, %v4548_v53  ;;  %v5713_v9 = vpop.f32.mrb[7].mxu0  ;;  %v5728_v10 = vadd.f32 %v4138_v29, %v3073_v37  ;;  %v4617_v11 = vrot.slane %v4609_v56, %v6306_v13 }
 0x25f   : > { %v4387_v12 = vcombine.low %v4217_v61, %v4219_v57  ;;  %v4552_v14 = vmul.f32 %v4219_v57, %v4219_v57  ;;  %v4626_v16 = vcombine.low %v4549_v2, %v4550_v63  ;;  %v4394_v22 = vrot.slane %v4386_v1, %v6306_v13 }
 0x260   : > { %v4385_v17 = vcombine.low %v4377_v62, %v4384_v55  ;;  %v4624_v18 = vrot.slane %v4610_v59, %v6306_v13  ;;  %v4220_v20 = vcombine.high %v5728_v10, %v5728_v10  ;;  %v4227_v3 = vrot.slane %v5728_v10, %v6306_v13  ;;  %v3081_v21 = vpop.f32.mrb[8].mxu1 }
 0x261   : > { %v4401_v26 = vrot.slane %v4387_v12, %v6306_v13  ;;  %v4627_v48 = vcombine.low %v4551_v5, %v4552_v14  ;;  %v5729_v30 = vadd.f32 %v4141_v8, %v3076_v51  ;;  %v5518_v38 = vpop.f32.mrb[9].mxu1  ;;  %v4634_v25 = vrot.slane %v4626_v16, %v6306_v13 }
 0x262   : > { %4514 = vst.msk [vmem:[%s7149_s29] sm:$0xff] %vm4513_vm8, %v4385_v17  ;;  %v4625_v4 = vcombine.low %v4617_v11, %v4624_v18  ;;  %v4234_v19 = vrot.slane %v4220_v20, %v6306_v13  ;;  %v4235_v34 = vcombine.high %v4227_v3, %v4227_v3  ;;  %v3084_v6 = vpop.f32.mrb[10].mxu1  ;;  %v4522_v24 = vsel %vm4513_vm8, %v4385_v17, 0.0 }
 0x263   : > { %v4402_v49 = vcombine.low %v4394_v22, %v4401_v26  ;;  %v4641_v27 = vrot.slane %v4627_v48, %v6306_v13  ;;  %v4237_v7 = vcombine.high %v5729_v30, %v5729_v30  ;;  %v4244_v32 = vrot.slane %v5729_v30, %v6306_v13  ;;  %v4146_v39 = vpop.f32.mrb[8].mxu0  ;;  %v5519_v60 = vpop.f32.mrb[11].mxu1 }
 0x264   : > { %v4403_v42 = vcombine.low %v4235_v34, %v4234_v19  ;;  %v4553_v47 = vmul.f32 %v4235_v34, %v4235_v34  ;;  %v4554_v54 = vmul.f32 %v4234_v19, %v4234_v19  ;;  %v5716_v31 = vpop.f32.mrb[9].mxu0  ;;  %v4236_v33 = vcombine.high %v4234_v19, %v4234_v19 }
 0x265   : > { %4515 = vst.msk [vmem:[%s7149_s29 + $0x8] sm:$0xff] %vm4513_vm8, %v4402_v49  ;;  %v4523_v15 = vsel %vm4513_vm8, %v4402_v49, 0.0  ;;  %v4642_v0 = vcombine.low %v4634_v25, %v4641_v27  ;;  %v4251_v35 = vrot.slane %v4237_v7, %v6306_v13  ;;  %v4149_v36 = vpop.f32.mrb[10].mxu0  ;;  %v4753_v37 = vsel %vm4513_vm8, %v4625_v4, 0.0 }
 0x266   : > { %v4524_v40 = vadd.f32 %v4523_v15, %v4522_v24  ;;  %v4643_v46 = vcombine.low %v4553_v47, %v4554_v54  ;;  %v4252_v43 = vcombine.high %v4244_v32, %v4244_v32  ;;  %v5717_v44 = vpop.f32.mrb[11].mxu0  ;;  %v4404_v50 = vcombine.low %v4236_v33, %v4244_v32 }
 0x267   : > { %v4754_v45 = vsel %vm4513_vm8, %v4642_v0, 0.0  ;;  %v4555_v51 = vmul.f32 %v4236_v33, %v4236_v33  ;;  %v4556_v28 = vmul.f32 %v4244_v32, %v4244_v32  ;;  %v4411_v41 = vrot.slane %v4403_v42, %v6306_v13 }
 0x268   : > { %v4755_v61 = vadd.f32 %v4754_v45, %v4753_v37  ;;  %v4420_v29 = vcombine.low %v4252_v43, %v4251_v35  ;;  %v4557_v23 = vmul.f32 %v4252_v43, %v4252_v43  ;;  %v7170_v52 = vpop.f32.mrb[12].mxu1  ;;  %v4418_v53 = vrot.slane %v4404_v50, %v6306_v13 }
 0x269   : > { %v4558_v56 = vmul.f32 %v4251_v35, %v4251_v35  ;;  %v4644_v2 = vcombine.low %v4555_v51, %v4556_v28  ;;  %v5730_v58 = vadd.f32 %v4146_v39, %v3081_v21  ;;  %v5522_v62 = vpop.f32.mrb[13].mxu1  ;;  %v4651_v57 = vrot.slane %v4643_v46, %v6306_v13 }
 0x26a   : > { %v4253_v1 = vcombine.high %v4251_v35, %v4251_v35  ;;  %v4428_v63 = vrot.slane %v4420_v29, %v6306_v13  ;;  %v5731_v8 = vadd.f32 %v4149_v36, %v3084_v6  ;;  %v3092_v55 = vpop.f32.mrb[14].mxu1  ;;  %v4419_v59 = vcombine.low %v4411_v41, %v4418_v53 }
 0x26b   : > { %v4658_v5 = vrot.slane %v4644_v2, %v6306_v13  ;;  %v4660_v9 = vcombine.low %v4557_v23, %v4558_v56  ;;  %v4254_v10 = vcombine.high %v5730_v58, %v5730_v58  ;;  %v4154_v11 = vpop.f32.mrb[12].mxu0  ;;  %v5523_v12 = vpop.f32.mrb[15].mxu1  ;;  %v4261_v14 = vrot.slane %v5730_v58, %v6306_v13 }
 0x26c   : > { %v4559_v16 = vmul.f32 %v4253_v1, %v4253_v1  ;;  %v4270_v17 = vcombine.high %v5731_v8, %v5731_v8  ;;  %v4277_v18 = vrot.slane %v5731_v8, %v6306_v13  ;;  %v5720_v20 = vpop.f32.mrb[13].mxu0  ;;  %4516 = vst.msk [vmem:[%s7149_s29 + $0x10] sm:$0xff] %vm4513_vm8, %v4419_v59  ;;  %v4525_v3 = vsel %vm4513_vm8, %v4419_v59, 0.0 }
 0x26d   : > { %v4659_v21 = vcombine.low %v4651_v57, %v4658_v5  ;;  %v4268_v22 = vrot.slane %v4254_v10, %v6306_v13  ;;  %v4668_v26 = vrot.slane %v4660_v9, %v6306_v13  ;;  %v4157_v48 = vpop.f32.mrb[14].mxu0  ;;  %v4421_v30 = vcombine.low %v4253_v1, %v4261_v14 }
 0x26e   : > { %v4526_v38 = vadd.f32 %v4525_v3, %v4524_v40  ;;  %v4560_v4 = vmul.f32 %v4261_v14, %v4261_v14  ;;  %v4284_v25 = vrot.slane %v4270_v17, %v6306_v13  ;;  %v5721_v19 = vpop.f32.mrb[15].mxu0  ;;  %v4285_v27 = vcombine.high %v4277_v18, %v4277_v18 }
 0x26f   : > { %v4756_v34 = vsel %vm4513_vm8, %v4659_v21, 0.0  ;;  %v4269_v6 = vcombine.high %v4268_v22, %v4268_v22  ;;  %v4561_v49 = vmul.f32 %v4268_v22, %v4268_v22  ;;  %v4435_v7 = vrot.slane %v4421_v30, %v6306_v13 }
 0x270   : > { %v4661_v32 = vcombine.low %v4559_v16, %v4560_v4  ;;  %v4757_v39 = vadd.f32 %v4756_v34, %v4755_v61  ;;  %v4286_v60 = vcombine.high %v4284_v25, %v4284_v25  ;;  %v3097_v24 = vpop.f32.mrb[16].mxu1  ;;  %v4438_v54 = vcombine.low %v4277_v18, %v4285_v27 }
 0x271   : > { %v4437_v42 = vcombine.low %v4268_v22, %v4269_v6  ;;  %v4562_v47 = vmul.f32 %v4269_v6, %v4269_v6  ;;  %v4563_v31 = vmul.f32 %v4277_v18, %v4277_v18  ;;  %v5526_v15 = vpop.f32.mrb[17].mxu1  ;;  %v4436_v0 = vcombine.low %v4428_v63, %v4435_v7 }
 0x272   : > { %v4675_v33 = vrot.slane %v4661_v32, %v6306_v13  ;;  %v4454_v35 = vcombine.low %v4284_v25, %v4286_v60  ;;  %v4564_v36 = vmul.f32 %v4285_v27, %v4285_v27  ;;  %v3100_v37 = vpop.f32.mrb[18].mxu1  ;;  %v4452_v43 = vrot.slane %v4438_v54, %v6306_v13 }
 0x273   : > { %v4445_v40 = vrot.slane %v4437_v42, %v6306_v13  ;;  %v4677_v46 = vcombine.low %v4561_v49, %v4562_v47  ;;  %v4565_v44 = vmul.f32 %v4284_v25, %v4284_v25  ;;  %v4162_v45 = vpop.f32.mrb[16].mxu0  ;;  %v5527_v50 = vpop.f32.mrb[19].mxu1  ;;  %4517 = vst.msk [vmem:[%s7149_s29 + $0x18] sm:$0xff] %vm4513_vm8, %v4436_v0  ;;  %v4527_v51 = vsel %vm4513_vm8, %v4436_v0, 0.0 }
 0x274   : > { %v4676_v28 = vcombine.low %v4668_v26, %v4675_v33  ;;  %v4462_v61 = vrot.slane %v4454_v35, %v6306_v13  ;;  %v4566_v41 = vmul.f32 %v4286_v60, %v4286_v60  ;;  %v5724_v29 = vpop.f32.mrb[17].mxu0  ;;  %v4528_v23 = vadd.f32 %v4527_v51, %v4526_v38 }
 0x275   : > { %v4685_v53 = vrot.slane %v4677_v46, %v6306_v13  ;;  %v4453_v56 = vcombine.low %v4445_v40, %v4452_v43  ;;  %v4678_v2 = vcombine.low %v4563_v31, %v4564_v36  ;;  %v4165_v58 = vpop.f32.mrb[18].mxu0  ;;  %v5732_v1 = vadd.f32 %v4154_v11, %v7170_v52 }
 0x276   : > { %v4758_v62 = vsel %vm4513_vm8, %v4676_v28, 0.0  ;;  %v4694_v57 = vcombine.low %v4565_v44, %v4566_v41  ;;  %v5733_v63 = vadd.f32 %v4157_v48, %v3092_v55  ;;  %v5725_v8 = vpop.f32.mrb[19].mxu0  ;;  %v5734_v10 = vadd.f32 %v4162_v45, %v3097_v24 }
 0x277   : > { %v4759_v59 = vadd.f32 %v4758_v62, %v4757_v39  ;;  %4518 = vst.msk [vmem:[%s7149_s29 + $0x20] sm:$0xff] %vm4513_vm8, %v4453_v56  ;;  %v4529_v5 = vsel %vm4513_vm8, %v4453_v56, 0.0  ;;  %v4692_v9 = vrot.slane %v4678_v2, %v6306_v13  ;;  %v4287_v16 = vcombine.high %v5732_v1, %v5732_v1 }
 0x278   : > { %v4530_v12 = vadd.f32 %v4529_v5, %v4528_v23  ;;  %v4702_v14 = vrot.slane %v4694_v57, %v6306_v13  ;;  %v4294_v17 = vrot.slane %v5732_v1, %v6306_v13  ;;  %v4304_v20 = vcombine.high %v5733_v63, %v5733_v63 }
 0x279   : > { %v4693_v18 = vcombine.low %v4685_v53, %v4692_v9  ;;  %v4311_v52 = vrot.slane %v5733_v63, %v6306_v13  ;;  %v4321_v55 = vcombine.high %v5734_v10, %v5734_v10  ;;  %v4301_v11 = vrot.slane %v4287_v16, %v6306_v13 }
 0x27a   : > { %v4302_v3 = vcombine.high %v4294_v17, %v4294_v17  ;;  %v4567_v21 = vmul.f32 %v4294_v17, %v4294_v17  ;;  %v4328_v22 = vrot.slane %v5734_v10, %v6306_v13  ;;  %v4318_v48 = vrot.slane %v4304_v20, %v6306_v13 }
 0x27b   : > { %v4760_v26 = vsel %vm4513_vm8, %v4693_v18, 0.0  ;;  %v4319_v30 = vcombine.high %v4311_v52, %v4311_v52  ;;  %v4570_v38 = vmul.f32 %v4311_v52, %v4311_v52  ;;  %v4303_v25 = vcombine.high %v4301_v11, %v4301_v11 }
 0x27c   : > { %v4761_v4 = vadd.f32 %v4760_v26, %v4759_v59  ;;  %v4455_v19 = vcombine.low %v4294_v17, %v4302_v3  ;;  %v4568_v34 = vmul.f32 %v4302_v3, %v4302_v3  ;;  %v4572_v27 = vmul.f32 %v4318_v48, %v4318_v48 }
 0x27d   : > { %v4472_v6 = vcombine.low %v4319_v30, %v4318_v48  ;;  %v4571_v49 = vmul.f32 %v4319_v30, %v4319_v30  ;;  %v4320_v7 = vcombine.high %v4318_v48, %v4318_v48  ;;  %v4569_v39 = vmul.f32 %v4303_v25, %v4303_v25 }
 0x27e   : > { %v4469_v32 = vrot.slane %v4455_v19, %v6306_v13  ;;  %v4695_v60 = vcombine.low %v4567_v21, %v4568_v34  ;;  %v4471_v24 = vcombine.low %v4303_v25, %v4311_v52  ;;  %v4335_v54 = vrot.slane %v4321_v55, %v6306_v13 }
 0x27f   : > { %v4486_v42 = vrot.slane %v4472_v6, %v6306_v13  ;;  %v4712_v47 = vcombine.low %v4571_v49, %v4572_v27  ;;  %v4336_v31 = vcombine.high %v4328_v22, %v4328_v22  ;;  %v4711_v35 = vcombine.low %v4569_v39, %v4570_v38 }
 0x280   : > { %v4470_v15 = vcombine.low %v4462_v61, %v4469_v32  ;;  %v4709_v0 = vrot.slane %v4695_v60, %v6306_v13  ;;  %v4479_v33 = vrot.slane %v4471_v24, %v6306_v13  ;;  %v4488_v37 = vcombine.low %v4320_v7, %v4328_v22 }
 0x281   : > { %v4726_v36 = vrot.slane %v4712_v47, %v6306_v13  ;;  %v4489_v40 = vcombine.low %v4336_v31, %v4335_v54  ;;  %v4573_v46 = vmul.f32 %v4320_v7, %v4320_v7  ;;  %v4719_v50 = vrot.slane %v4711_v35, %v6306_v13 }
 0x282   : > { %4519 = vst.msk [vmem:[%s7149_s29 + $0x28] sm:$0xff] %vm4513_vm8, %v4470_v15  ;;  %v4531_v43 = vsel %vm4513_vm8, %v4470_v15, 0.0  ;;  %v4710_v44 = vcombine.low %v4702_v14, %v4709_v0  ;;  %v4487_v45 = vcombine.low %v4479_v33, %v4486_v42  ;;  %v4496_v28 = vrot.slane %v4488_v37, %v6306_v13 }
 0x283   : > { %v4532_v51 = vadd.f32 %v4531_v43, %v4530_v12  ;;  %v4503_v61 = vrot.slane %v4489_v40, %v6306_v13  ;;  %v4574_v41 = vmul.f32 %v4328_v22, %v4328_v22  ;;  %v4727_v53 = vcombine.low %v4719_v50, %v4726_v36 }
 0x284   : > { %v4762_v29 = vsel %vm4513_vm8, %v4710_v44, 0.0  ;;  %4520 = vst.msk [vmem:[%s7149_s29 + $0x30] sm:$0xff] %vm4513_vm8, %v4487_v45  ;;  %v4533_v23 = vsel %vm4513_vm8, %v4487_v45, 0.0  ;;  %v4575_v56 = vmul.f32 %v4336_v31, %v4336_v31  ;;  %v4576_v57 = vmul.f32 %v4335_v54, %v4335_v54 }
 0x285   : > { %v4763_v2 = vadd.f32 %v4762_v29, %v4761_v4  ;;  %v4534_v58 = vadd.f32 %v4533_v23, %v4532_v51  ;;  %v4504_v62 = vcombine.low %v4496_v28, %v4503_v61  ;;  %v4764_v1 = vsel %vm4513_vm8, %v4727_v53, 0.0 }
 0x286   : > { %v4728_v63 = vcombine.low %v4573_v46, %v4574_v41  ;;  %v4729_v5 = vcombine.low %v4575_v56, %v4576_v57 }
 0x287   : > { %v4765_v8 = vadd.f32 %v4764_v1, %v4763_v2  ;;  %4521 = vst.msk [vmem:[%s7149_s29 + $0x38] sm:$0xff] %vm4513_vm8, %v4504_v62  ;;  %v4535_v59 = vsel %vm4513_vm8, %v4504_v62, 0.0 }
 0x288   : > { %v4536_v9 = vadd.f32 %v4535_v59, %v4534_v58  ;;  %v4736_v10 = vrot.slane %v4728_v63, %v6306_v13  ;;  %v4743_v12 = vrot.slane %v4729_v5, %v6306_v13 }
 0x28a   : > { %v4537_v14 = vrot.slane %v4536_v9, 4  ;;  %v4744_v16 = vcombine.low %v4736_v10, %v4743_v12 }
 0x28c   : > { %v4538_v17 = vadd.f32 %v4537_v14, %v4536_v9  ;;  %v4766_v18 = vsel %vm4513_vm8, %v4744_v16, 0.0 }
 0x28d   : > { %v4767_v52 = vadd.f32 %v4766_v18, %v4765_v8 }
 0x28e   : > { %v4539_v20 = vrot.slane %v4538_v17, 2 }
 0x28f   : > { %v4768_v11 = vrot.slane %v4767_v52, 4 }
 0x290   : > { %v4540_v55 = vadd.f32 %v4539_v20, %v4538_v17 }
 0x291   : > { %v4769_v21 = vadd.f32 %v4768_v11, %v4767_v52 }
 0x292   : > { %v4541_v3 = vrot.slane %v4540_v55, 1 }
 0x293   : > { %v4770_v22 = vrot.slane %v4769_v21, 2 }
 0x294   : > { %v4542_v13 = vadd.f32 %v4541_v3, %v4540_v55 }
 0x295   : > { %v4771_v26 = vadd.f32 %v4770_v22, %v4769_v21 }
 0x296   : > { %4544 = vst.msk [vmem:[%s738_s26] sm:$0x1] %vm4543_vm9, %v4542_v13 }
 0x297   : > { %v4772_v48 = vrot.slane %v4771_v26, 1 }
 0x299   : > { %v4773_v30 = vadd.f32 %v4772_v48, %v4771_v26 }
 0x29b   : > { %4774 = vst.msk [vmem:[%s738_s26 + $0x1] sm:$0x1] %vm4543_vm9, %v4773_v30 }
 0x29c PF: > { %s22_s21 = sadd.s32 1, %s6154_s21   ;;  %s7277_s18 = sld [smem:[#allocation4_spill]] }
 0x29d   : > { %p19_p12 = scmp.ge.s32.totalorder %s22_s21, 10   ;;  %s7278_s22 = sld [smem:[#allocation5_spill]] }
 0x29e   : > { %s7279_s20 = sld [smem:[#allocation6_spill]]  ;;  %s7280_s17 = smov %s6146_s19 }
 0x29f   :  { %21 = sbr.rel (!%p19_p12) target bundleno = 3 (0x3), region = 133 }
 0x2a3   : > { %s7281_s19 = smov %s7278_s22 }

</bundles_post_ra>
